<compile_context>
chip_gen: v5e
topology: v5e:2x2
jax: 0.10.0
libtpu: 0.0.40
codegen_flags: <defaults>
</compile_context>

<pallas_src>
import jax
import jax.numpy as jnp
from jax.experimental import pallas as pl
from jax.experimental.pallas import tpu as pltpu


# --------------------------------------------------------------------------
# Fused kernel: input projection -> unrolled LSTM recurrence -> output linear.
# Weight columns are pre-ordered (i, f, o, g) (PyTorch order is i, f, g, o).
# --------------------------------------------------------------------------
def fused_lstm_kernel(emb_ref, wih_ref, whh_ref, b_ref, h0_ref, c0_ref,
                      wlin_ref, blin_ref,
                      logits_ref, hn_ref, cn_ref,
                      hist_sc):
    B, T, E = emb_ref.shape
    H = h0_ref.shape[-1]

    # Phase 1: hoisted input projection for all B*T tokens (one MXU matmul).
    x_flat = emb_ref[...].reshape(B * T, E)                       # rows = b*T + t
    gates_x = (jnp.dot(x_flat, wih_ref[...],
                       preferred_element_type=jnp.float32)
               + b_ref[...])                                      # (B*T, 4H) f32
    gates_x = gates_x.reshape(B, T, 4 * H)

    whh = whh_ref[...]                                            # (H, 4H), load once
    h = h0_ref[...].astype(jnp.float32)                           # (B, H)
    c = c0_ref[...].astype(jnp.float32)                           # (B, H)

    # Columns ordered (i, f, o, g): first 3H lanes -> sigmoid, last H -> tanh.
    lane = jax.lax.broadcasted_iota(jnp.int32, (B, 4 * H), 1)
    sig_mask = lane < 3 * H

    # Phase 2: sequential recurrence.  T is small and static -> fully unrolled
    # (for long T, switch to lax.fori_loop over a gates_x VMEM scratch).
    for t in range(T):
        gates = gates_x[:, t, :] + jnp.dot(h, whh,
                                           preferred_element_type=jnp.float32)
        act = jnp.where(sig_mask, jax.nn.sigmoid(gates), jnp.tanh(gates))
        i_g = act[:, 0:H]
        f_g = act[:, H:2 * H]
        o_g = act[:, 2 * H:3 * H]
        g_g = act[:, 3 * H:4 * H]
        c = f_g * c + i_g * g_g
        h = o_g * jnp.tanh(c)
        hist_sc[:, t, :] = h                                      # batch_first history

    # Phase 3: fused output projection on the whole (B*T, H) slab.
    h_all = hist_sc[...].reshape(B * T, H)                        # rows = b*T + t
    logits_ref[...] = (jnp.dot(h_all, wlin_ref[...],
                               preferred_element_type=jnp.float32)
                       + blin_ref[...]).astype(logits_ref.dtype)
    hn_ref[...] = h.astype(hn_ref.dtype)
    cn_ref[...] = c.astype(cn_ref.dtype)


def fused_lstm_forward(emb, w_ih_t, w_hh_t, bias, h0, c0, w_lin_t, b_lin):
    """emb: (B, T, E) batch_first; w_ih_t: (E, 4H); w_hh_t: (H, 4H);
    bias: (1, 4H); h0, c0: (B, H); w_lin_t: (H, V); b_lin: (1, V).
    Returns logits (B*T, V) in PyTorch reshape order (row = b*T + t), h_n, c_n."""
    B, T, _ = emb.shape
    H = h0.shape[-1]
    V = w_lin_t.shape[-1]
    vmem = pltpu.MemorySpace.VMEM
    return pl.pallas_call(
        fused_lstm_kernel,
        out_shape=(jax.ShapeDtypeStruct((B * T, V), emb.dtype),
                   jax.ShapeDtypeStruct((B, H), emb.dtype),
                   jax.ShapeDtypeStruct((B, H), emb.dtype)),
        in_specs=[pl.BlockSpec(memory_space=vmem)] * 8,
        out_specs=(pl.BlockSpec(memory_space=vmem),
                   pl.BlockSpec(memory_space=vmem),
                   pl.BlockSpec(memory_space=vmem)),
        scratch_shapes=[pltpu.VMEM((B, T, H), jnp.float32)],
    )(emb, w_ih_t, w_hh_t, bias, h0, c0, w_lin_t, b_lin)


# --------------------------------------------------------------------------
# Parameter prep: PyTorch layout -> kernel layout (gate reorder + transpose).
# --------------------------------------------------------------------------
def prepare_params(raw):
    H = raw["w_hh"].shape[1]
    # PyTorch gate row order (i, f, g, o) -> kernel order (i, f, o, g).
    perm = jnp.concatenate([jnp.arange(0, H), jnp.arange(H, 2 * H),
                            jnp.arange(3 * H, 4 * H), jnp.arange(2 * H, 3 * H)])
    return {
        "embed": raw["embed"],
        "w_ih_t": jnp.transpose(raw["w_ih"][perm]),            # (E, 4H)
        "w_hh_t": jnp.transpose(raw["w_hh"][perm]),            # (H, 4H)
        "bias": (raw["b_ih"] + raw["b_hh"])[perm][None, :],    # (1, 4H)
        "w_lin_t": jnp.transpose(raw["w_lin"]),                # (H, V)
        "b_lin": raw["b_lin"][None, :],                        # (1, V)
    }


# --------------------------------------------------------------------------
# Full model forward (matches LSTMmodel.forward semantics).
# --------------------------------------------------------------------------
def lstm_model_forward(params, x_ids, h):
    h0, c0 = h                                   # each (num_layers=1, B, H)
    # TODO(synk): embedding lookup is a data-dependent row gather; kept in
    # plain JAX rather than a Pallas kernel.
    emb = jnp.take(params["embed"], x_ids, axis=0)              # (B, T, E)
    logits, hn, cn = fused_lstm_forward(
        emb, params["w_ih_t"], params["w_hh_t"], params["bias"],
        h0[0], c0[0], params["w_lin_t"], params["b_lin"])
    return logits, (hn[None], cn[None])


# --------------------------------------------------------------------------
# Pure-JAX reference (PyTorch gate order, lax.scan) for correctness checking.
# --------------------------------------------------------------------------
def reference_forward(raw, x_ids, h):
    h0, c0 = h
    emb = jnp.take(raw["embed"], x_ids, axis=0)                 # (B, T, E)
    x_tbe = jnp.transpose(emb, (1, 0, 2))
    H = h0.shape[-1]
    w_ih_t = raw["w_ih"].T
    w_hh_t = raw["w_hh"].T
    bias = (raw["b_ih"] + raw["b_hh"])[None, :]

    def step(carry, x_t):
        hp, cp = carry
        gates = x_t @ w_ih_t + hp @ w_hh_t + bias
        i = jax.nn.sigmoid(gates[:, 0 * H:1 * H])
        f = jax.nn.sigmoid(gates[:, 1 * H:2 * H])
        g = jnp.tanh(gates[:, 2 * H:3 * H])
        o = jax.nn.sigmoid(gates[:, 3 * H:4 * H])
        c = f * cp + i * g
        hh = o * jnp.tanh(c)
        return (hh, c), hh

    (hn, cn), out_tbh = jax.lax.scan(step, (h0[0], c0[0]), x_tbe)
    out_flat = jnp.transpose(out_tbh, (1, 0, 2)).reshape(-1, H)
    logits = out_flat @ raw["w_lin"].T + raw["b_lin"]
    return logits, (hn[None], cn[None])


if __name__ == "__main__":
    # Match f32 MXU path of the in-kernel dots in the XLA reference.
    jax.config.update("jax_default_matmul_precision", "highest")

    # Small, hardware-aligned shapes consistent with the module:
    # B = 8 (sublane-aligned), 4H = 128 (lane-aligned), V lane-dense.
    V, E, H = 256, 32, 32      # vocab, embed_size, hidden_size
    B, T = 8, 8                # batch, seq_len
    NUM_LAYERS = 1

    key = jax.random.PRNGKey(0)
    k = jax.random.split(key, 8)
    raw = {
        "embed": jax.random.normal(k[0], (V, E), jnp.float32) * 0.1,
        "w_ih": jax.random.normal(k[1], (4 * H, E), jnp.float32) * 0.1,   # PyTorch layout
        "w_hh": jax.random.normal(k[2], (4 * H, H), jnp.float32) * 0.1,
        "b_ih": jax.random.normal(k[3], (4 * H,), jnp.float32) * 0.1,
        "b_hh": jax.random.normal(k[4], (4 * H,), jnp.float32) * 0.1,
        "w_lin": jax.random.normal(k[5], (V, H), jnp.float32) * 0.1,
        "b_lin": jax.random.normal(k[6], (V,), jnp.float32) * 0.1,
    }
    params = prepare_params(raw)

    x_ids = jax.random.randint(k[7], (B, T), 0, V, dtype=jnp.int32)
    h0 = jnp.zeros((NUM_LAYERS, B, H), jnp.float32)
    c0 = jnp.zeros((NUM_LAYERS, B, H), jnp.float32)

    fwd = jax.jit(lstm_model_forward)
    logits, (hn, cn) = fwd(params, x_ids, (h0, c0))
    jax.block_until_ready((logits, hn, cn))

    # Sanity check against pure-JAX reference (original PyTorch gate order).
    ref_logits, (ref_hn, ref_cn) = reference_forward(raw, x_ids, (h0, c0))
    assert logits.shape == (B * T, V)
    assert hn.shape == (NUM_LAYERS, B, H) and cn.shape == (NUM_LAYERS, B, H)
    assert jnp.allclose(logits, ref_logits, atol=1e-4, rtol=1e-4)
    assert jnp.allclose(hn, ref_hn, atol=1e-5, rtol=1e-4)
    assert jnp.allclose(cn, ref_cn, atol=1e-5, rtol=1e-4)

    print("KERNEL_OK")
</pallas_src>

<mosaic_0001>
module attributes {stable_mosaic.version = 11 : i64} {
  func.func @fused_lstm_kernel(%arg0: memref<8x8x32xf32, #tpu.memory_space<vmem>>, %arg1: memref<32x128xf32, #tpu.memory_space<vmem>>, %arg2: memref<32x128xf32, #tpu.memory_space<vmem>>, %arg3: memref<1x128xf32, #tpu.memory_space<vmem>>, %arg4: memref<8x32xf32, #tpu.memory_space<vmem>>, %arg5: memref<8x32xf32, #tpu.memory_space<vmem>>, %arg6: memref<32x256xf32, #tpu.memory_space<vmem>>, %arg7: memref<1x256xf32, #tpu.memory_space<vmem>>, %arg8: memref<64x256xf32, #tpu.memory_space<vmem>>, %arg9: memref<8x32xf32, #tpu.memory_space<vmem>>, %arg10: memref<8x32xf32, #tpu.memory_space<vmem>>, %arg11: memref<8x8x32xf32, #tpu.memory_space<vmem>>) attributes {dimension_semantics = [], scalar_prefetch = 0 : i64, scratch_operands = 1 : i64, tpu.core_type = #tpu.core_type<tc>} {
    %c0 = arith.constant 0 : index
    %c0_0 = arith.constant 0 : index
    %c0_1 = arith.constant 0 : index
    %0 = vector.load %arg0[%c0, %c0_0, %c0_1] : memref<8x8x32xf32, #tpu.memory_space<vmem>>, vector<8x8x32xf32>
    %1 = vector.shape_cast %0 : vector<8x8x32xf32> to vector<64x32xf32>
    %c0_2 = arith.constant 0 : index
    %c0_3 = arith.constant 0 : index
    %2 = vector.load %arg1[%c0_2, %c0_3] : memref<32x128xf32, #tpu.memory_space<vmem>>, vector<32x128xf32>
    %cst = arith.constant dense<0.000000e+00> : vector<64x128xf32>
    %3 = tpu.matmul %1, %2, %cst {dimension_numbers = #tpu.dot_dimension_numbers<[1], [0], [0], [1], [0, 0, 1, 1], [], []>, precision = #tpu.contract_precision<fp32>} : vector<64x32xf32>, vector<32x128xf32>, vector<64x128xf32> -> vector<64x128xf32>
    %c0_4 = arith.constant 0 : index
    %c0_5 = arith.constant 0 : index
    %4 = vector.load %arg3[%c0_4, %c0_5] : memref<1x128xf32, #tpu.memory_space<vmem>>, vector<1x128xf32>
    %5 = vector.broadcast %4 : vector<1x128xf32> to vector<64x128xf32>
    %6 = arith.addf %3, %5 : vector<64x128xf32>
    %7 = vector.shape_cast %6 : vector<64x128xf32> to vector<8x8x128xf32>
    %c0_6 = arith.constant 0 : index
    %c0_7 = arith.constant 0 : index
    %8 = vector.load %arg2[%c0_6, %c0_7] : memref<32x128xf32, #tpu.memory_space<vmem>>, vector<32x128xf32>
    %c0_8 = arith.constant 0 : index
    %c0_9 = arith.constant 0 : index
    %9 = vector.load %arg4[%c0_8, %c0_9] : memref<8x32xf32, #tpu.memory_space<vmem>>, vector<8x32xf32>
    %c0_10 = arith.constant 0 : index
    %c0_11 = arith.constant 0 : index
    %10 = vector.load %arg5[%c0_10, %c0_11] : memref<8x32xf32, #tpu.memory_space<vmem>>, vector<8x32xf32>
    %11 = tpu.iota {dimensions = array<i32: 1>} : vector<8x128xi32>
    %c96_i32 = arith.constant 96 : i32
    %12 = vector.broadcast %c96_i32 : i32 to vector<8x128xi32>
    %13 = arith.cmpi slt, %11, %12 : vector<8x128xi32>
    %14 = vector.extract_strided_slice %7 {offsets = [0, 0, 0], sizes = [8, 1, 128], strides = [1, 1, 1]} : vector<8x8x128xf32> to vector<8x1x128xf32>
    %15 = vector.shape_cast %14 : vector<8x1x128xf32> to vector<8x128xf32>
    %cst_12 = arith.constant dense<0.000000e+00> : vector<8x128xf32>
    %16 = tpu.matmul %9, %8, %cst_12 {dimension_numbers = #tpu.dot_dimension_numbers<[1], [0], [0], [1], [0, 0, 1, 1], [], []>, precision = #tpu.contract_precision<fp32>} : vector<8x32xf32>, vector<32x128xf32>, vector<8x128xf32> -> vector<8x128xf32>
    %17 = arith.addf %15, %16 : vector<8x128xf32>
    %18 = arith.negf %17 : vector<8x128xf32>
    %19 = math.exp %18 : vector<8x128xf32>
    %cst_13 = arith.constant 1.000000e+00 : f32
    %20 = vector.broadcast %cst_13 : f32 to vector<8x128xf32>
    %21 = arith.addf %20, %19 : vector<8x128xf32>
    %22 = arith.divf %20, %21 : vector<8x128xf32>
    %23 = math.tanh %17 : vector<8x128xf32>
    %24 = arith.select %13, %22, %23 : vector<8x128xi1>, vector<8x128xf32>
    %25 = vector.extract_strided_slice %24 {offsets = [0, 0], sizes = [8, 32], strides = [1, 1]} : vector<8x128xf32> to vector<8x32xf32>
    %26 = vector.extract_strided_slice %24 {offsets = [0, 32], sizes = [8, 32], strides = [1, 1]} : vector<8x128xf32> to vector<8x32xf32>
    %27 = vector.extract_strided_slice %24 {offsets = [0, 64], sizes = [8, 32], strides = [1, 1]} : vector<8x128xf32> to vector<8x32xf32>
    %28 = vector.extract_strided_slice %24 {offsets = [0, 96], sizes = [8, 32], strides = [1, 1]} : vector<8x128xf32> to vector<8x32xf32>
    %29 = arith.mulf %26, %10 : vector<8x32xf32>
    %30 = arith.mulf %25, %28 : vector<8x32xf32>
    %31 = arith.addf %29, %30 : vector<8x32xf32>
    %32 = math.tanh %31 : vector<8x32xf32>
    %33 = arith.mulf %27, %32 : vector<8x32xf32>
    %c0_14 = arith.constant 0 : index
    %c0_15 = arith.constant 0 : index
    %c0_16 = arith.constant 0 : index
    %34 = vector.load %arg11[%c0_14, %c0_15, %c0_16] : memref<8x8x32xf32, #tpu.memory_space<vmem>>, vector<8x1x32xf32>
    %35 = vector.shape_cast %34 : vector<8x1x32xf32> to vector<8x32xf32>
    %36 = vector.shape_cast %33 : vector<8x32xf32> to vector<8x1x32xf32>
    tpu.vector_store %arg11[%c0_14, %c0_15, %c0_16], %36 {strides = array<i32>} : memref<8x8x32xf32, #tpu.memory_space<vmem>>, vector<8x1x32xf32>,
    %37 = vector.extract_strided_slice %7 {offsets = [0, 1, 0], sizes = [8, 1, 128], strides = [1, 1, 1]} : vector<8x8x128xf32> to vector<8x1x128xf32>
    %38 = vector.shape_cast %37 : vector<8x1x128xf32> to vector<8x128xf32>
    %cst_17 = arith.constant dense<0.000000e+00> : vector<8x128xf32>
    %39 = tpu.matmul %33, %8, %cst_17 {dimension_numbers = #tpu.dot_dimension_numbers<[1], [0], [0], [1], [0, 0, 1, 1], [], []>, precision = #tpu.contract_precision<fp32>} : vector<8x32xf32>, vector<32x128xf32>, vector<8x128xf32> -> vector<8x128xf32>
    %40 = arith.addf %38, %39 : vector<8x128xf32>
    %41 = arith.negf %40 : vector<8x128xf32>
    %42 = math.exp %41 : vector<8x128xf32>
    %cst_18 = arith.constant 1.000000e+00 : f32
    %43 = vector.broadcast %cst_18 : f32 to vector<8x128xf32>
    %44 = arith.addf %43, %42 : vector<8x128xf32>
    %45 = arith.divf %43, %44 : vector<8x128xf32>
    %46 = math.tanh %40 : vector<8x128xf32>
    %47 = arith.select %13, %45, %46 : vector<8x128xi1>, vector<8x128xf32>
    %48 = vector.extract_strided_slice %47 {offsets = [0, 0], sizes = [8, 32], strides = [1, 1]} : vector<8x128xf32> to vector<8x32xf32>
    %49 = vector.extract_strided_slice %47 {offsets = [0, 32], sizes = [8, 32], strides = [1, 1]} : vector<8x128xf32> to vector<8x32xf32>
    %50 = vector.extract_strided_slice %47 {offsets = [0, 64], sizes = [8, 32], strides = [1, 1]} : vector<8x128xf32> to vector<8x32xf32>
    %51 = vector.extract_strided_slice %47 {offsets = [0, 96], sizes = [8, 32], strides = [1, 1]} : vector<8x128xf32> to vector<8x32xf32>
    %52 = arith.mulf %49, %31 : vector<8x32xf32>
    %53 = arith.mulf %48, %51 : vector<8x32xf32>
    %54 = arith.addf %52, %53 : vector<8x32xf32>
    %55 = math.tanh %54 : vector<8x32xf32>
    %56 = arith.mulf %50, %55 : vector<8x32xf32>
    %c0_19 = arith.constant 0 : index
    %c1 = arith.constant 1 : index
    %c0_20 = arith.constant 0 : index
    %57 = vector.load %arg11[%c0_19, %c1, %c0_20] : memref<8x8x32xf32, #tpu.memory_space<vmem>>, vector<8x1x32xf32>
    %58 = vector.shape_cast %57 : vector<8x1x32xf32> to vector<8x32xf32>
    %59 = vector.shape_cast %56 : vector<8x32xf32> to vector<8x1x32xf32>
    tpu.vector_store %arg11[%c0_19, %c1, %c0_20], %59 {strides = array<i32>} : memref<8x8x32xf32, #tpu.memory_space<vmem>>, vector<8x1x32xf32>,
    %60 = vector.extract_strided_slice %7 {offsets = [0, 2, 0], sizes = [8, 1, 128], strides = [1, 1, 1]} : vector<8x8x128xf32> to vector<8x1x128xf32>
    %61 = vector.shape_cast %60 : vector<8x1x128xf32> to vector<8x128xf32>
    %cst_21 = arith.constant dense<0.000000e+00> : vector<8x128xf32>
    %62 = tpu.matmul %56, %8, %cst_21 {dimension_numbers = #tpu.dot_dimension_numbers<[1], [0], [0], [1], [0, 0, 1, 1], [], []>, precision = #tpu.contract_precision<fp32>} : vector<8x32xf32>, vector<32x128xf32>, vector<8x128xf32> -> vector<8x128xf32>
    %63 = arith.addf %61, %62 : vector<8x128xf32>
    %64 = arith.negf %63 : vector<8x128xf32>
    %65 = math.exp %64 : vector<8x128xf32>
    %cst_22 = arith.constant 1.000000e+00 : f32
    %66 = vector.broadcast %cst_22 : f32 to vector<8x128xf32>
    %67 = arith.addf %66, %65 : vector<8x128xf32>
    %68 = arith.divf %66, %67 : vector<8x128xf32>
    %69 = math.tanh %63 : vector<8x128xf32>
    %70 = arith.select %13, %68, %69 : vector<8x128xi1>, vector<8x128xf32>
    %71 = vector.extract_strided_slice %70 {offsets = [0, 0], sizes = [8, 32], strides = [1, 1]} : vector<8x128xf32> to vector<8x32xf32>
    %72 = vector.extract_strided_slice %70 {offsets = [0, 32], sizes = [8, 32], strides = [1, 1]} : vector<8x128xf32> to vector<8x32xf32>
    %73 = vector.extract_strided_slice %70 {offsets = [0, 64], sizes = [8, 32], strides = [1, 1]} : vector<8x128xf32> to vector<8x32xf32>
    %74 = vector.extract_strided_slice %70 {offsets = [0, 96], sizes = [8, 32], strides = [1, 1]} : vector<8x128xf32> to vector<8x32xf32>
    %75 = arith.mulf %72, %54 : vector<8x32xf32>
    %76 = arith.mulf %71, %74 : vector<8x32xf32>
    %77 = arith.addf %75, %76 : vector<8x32xf32>
    %78 = math.tanh %77 : vector<8x32xf32>
    %79 = arith.mulf %73, %78 : vector<8x32xf32>
    %c0_23 = arith.constant 0 : index
    %c2 = arith.constant 2 : index
    %c0_24 = arith.constant 0 : index
    %80 = vector.load %arg11[%c0_23, %c2, %c0_24] : memref<8x8x32xf32, #tpu.memory_space<vmem>>, vector<8x1x32xf32>
    %81 = vector.shape_cast %80 : vector<8x1x32xf32> to vector<8x32xf32>
    %82 = vector.shape_cast %79 : vector<8x32xf32> to vector<8x1x32xf32>
    tpu.vector_store %arg11[%c0_23, %c2, %c0_24], %82 {strides = array<i32>} : memref<8x8x32xf32, #tpu.memory_space<vmem>>, vector<8x1x32xf32>,
    %83 = vector.extract_strided_slice %7 {offsets = [0, 3, 0], sizes = [8, 1, 128], strides = [1, 1, 1]} : vector<8x8x128xf32> to vector<8x1x128xf32>
    %84 = vector.shape_cast %83 : vector<8x1x128xf32> to vector<8x128xf32>
    %cst_25 = arith.constant dense<0.000000e+00> : vector<8x128xf32>
    %85 = tpu.matmul %79, %8, %cst_25 {dimension_numbers = #tpu.dot_dimension_numbers<[1], [0], [0], [1], [0, 0, 1, 1], [], []>, precision = #tpu.contract_precision<fp32>} : vector<8x32xf32>, vector<32x128xf32>, vector<8x128xf32> -> vector<8x128xf32>
    %86 = arith.addf %84, %85 : vector<8x128xf32>
    %87 = arith.negf %86 : vector<8x128xf32>
    %88 = math.exp %87 : vector<8x128xf32>
    %cst_26 = arith.constant 1.000000e+00 : f32
    %89 = vector.broadcast %cst_26 : f32 to vector<8x128xf32>
    %90 = arith.addf %89, %88 : vector<8x128xf32>
    %91 = arith.divf %89, %90 : vector<8x128xf32>
    %92 = math.tanh %86 : vector<8x128xf32>
    %93 = arith.select %13, %91, %92 : vector<8x128xi1>, vector<8x128xf32>
    %94 = vector.extract_strided_slice %93 {offsets = [0, 0], sizes = [8, 32], strides = [1, 1]} : vector<8x128xf32> to vector<8x32xf32>
    %95 = vector.extract_strided_slice %93 {offsets = [0, 32], sizes = [8, 32], strides = [1, 1]} : vector<8x128xf32> to vector<8x32xf32>
    %96 = vector.extract_strided_slice %93 {offsets = [0, 64], sizes = [8, 32], strides = [1, 1]} : vector<8x128xf32> to vector<8x32xf32>
    %97 = vector.extract_strided_slice %93 {offsets = [0, 96], sizes = [8, 32], strides = [1, 1]} : vector<8x128xf32> to vector<8x32xf32>
    %98 = arith.mulf %95, %77 : vector<8x32xf32>
    %99 = arith.mulf %94, %97 : vector<8x32xf32>
    %100 = arith.addf %98, %99 : vector<8x32xf32>
    %101 = math.tanh %100 : vector<8x32xf32>
    %102 = arith.mulf %96, %101 : vector<8x32xf32>
    %c0_27 = arith.constant 0 : index
    %c3 = arith.constant 3 : index
    %c0_28 = arith.constant 0 : index
    %103 = vector.load %arg11[%c0_27, %c3, %c0_28] : memref<8x8x32xf32, #tpu.memory_space<vmem>>, vector<8x1x32xf32>
    %104 = vector.shape_cast %103 : vector<8x1x32xf32> to vector<8x32xf32>
    %105 = vector.shape_cast %102 : vector<8x32xf32> to vector<8x1x32xf32>
    tpu.vector_store %arg11[%c0_27, %c3, %c0_28], %105 {strides = array<i32>} : memref<8x8x32xf32, #tpu.memory_space<vmem>>, vector<8x1x32xf32>,
    %106 = vector.extract_strided_slice %7 {offsets = [0, 4, 0], sizes = [8, 1, 128], strides = [1, 1, 1]} : vector<8x8x128xf32> to vector<8x1x128xf32>
    %107 = vector.shape_cast %106 : vector<8x1x128xf32> to vector<8x128xf32>
    %cst_29 = arith.constant dense<0.000000e+00> : vector<8x128xf32>
    %108 = tpu.matmul %102, %8, %cst_29 {dimension_numbers = #tpu.dot_dimension_numbers<[1], [0], [0], [1], [0, 0, 1, 1], [], []>, precision = #tpu.contract_precision<fp32>} : vector<8x32xf32>, vector<32x128xf32>, vector<8x128xf32> -> vector<8x128xf32>
    %109 = arith.addf %107, %108 : vector<8x128xf32>
    %110 = arith.negf %109 : vector<8x128xf32>
    %111 = math.exp %110 : vector<8x128xf32>
    %cst_30 = arith.constant 1.000000e+00 : f32
    %112 = vector.broadcast %cst_30 : f32 to vector<8x128xf32>
    %113 = arith.addf %112, %111 : vector<8x128xf32>
    %114 = arith.divf %112, %113 : vector<8x128xf32>
    %115 = math.tanh %109 : vector<8x128xf32>
    %116 = arith.select %13, %114, %115 : vector<8x128xi1>, vector<8x128xf32>
    %117 = vector.extract_strided_slice %116 {offsets = [0, 0], sizes = [8, 32], strides = [1, 1]} : vector<8x128xf32> to vector<8x32xf32>
    %118 = vector.extract_strided_slice %116 {offsets = [0, 32], sizes = [8, 32], strides = [1, 1]} : vector<8x128xf32> to vector<8x32xf32>
    %119 = vector.extract_strided_slice %116 {offsets = [0, 64], sizes = [8, 32], strides = [1, 1]} : vector<8x128xf32> to vector<8x32xf32>
    %120 = vector.extract_strided_slice %116 {offsets = [0, 96], sizes = [8, 32], strides = [1, 1]} : vector<8x128xf32> to vector<8x32xf32>
    %121 = arith.mulf %118, %100 : vector<8x32xf32>
    %122 = arith.mulf %117, %120 : vector<8x32xf32>
    %123 = arith.addf %121, %122 : vector<8x32xf32>
    %124 = math.tanh %123 : vector<8x32xf32>
    %125 = arith.mulf %119, %124 : vector<8x32xf32>
    %c0_31 = arith.constant 0 : index
    %c4 = arith.constant 4 : index
    %c0_32 = arith.constant 0 : index
    %126 = vector.load %arg11[%c0_31, %c4, %c0_32] : memref<8x8x32xf32, #tpu.memory_space<vmem>>, vector<8x1x32xf32>
    %127 = vector.shape_cast %126 : vector<8x1x32xf32> to vector<8x32xf32>
    %128 = vector.shape_cast %125 : vector<8x32xf32> to vector<8x1x32xf32>
    tpu.vector_store %arg11[%c0_31, %c4, %c0_32], %128 {strides = array<i32>} : memref<8x8x32xf32, #tpu.memory_space<vmem>>, vector<8x1x32xf32>,
    %129 = vector.extract_strided_slice %7 {offsets = [0, 5, 0], sizes = [8, 1, 128], strides = [1, 1, 1]} : vector<8x8x128xf32> to vector<8x1x128xf32>
    %130 = vector.shape_cast %129 : vector<8x1x128xf32> to vector<8x128xf32>
    %cst_33 = arith.constant dense<0.000000e+00> : vector<8x128xf32>
    %131 = tpu.matmul %125, %8, %cst_33 {dimension_numbers = #tpu.dot_dimension_numbers<[1], [0], [0], [1], [0, 0, 1, 1], [], []>, precision = #tpu.contract_precision<fp32>} : vector<8x32xf32>, vector<32x128xf32>, vector<8x128xf32> -> vector<8x128xf32>
    %132 = arith.addf %130, %131 : vector<8x128xf32>
    %133 = arith.negf %132 : vector<8x128xf32>
    %134 = math.exp %133 : vector<8x128xf32>
    %cst_34 = arith.constant 1.000000e+00 : f32
    %135 = vector.broadcast %cst_34 : f32 to vector<8x128xf32>
    %136 = arith.addf %135, %134 : vector<8x128xf32>
    %137 = arith.divf %135, %136 : vector<8x128xf32>
    %138 = math.tanh %132 : vector<8x128xf32>
    %139 = arith.select %13, %137, %138 : vector<8x128xi1>, vector<8x128xf32>
    %140 = vector.extract_strided_slice %139 {offsets = [0, 0], sizes = [8, 32], strides = [1, 1]} : vector<8x128xf32> to vector<8x32xf32>
    %141 = vector.extract_strided_slice %139 {offsets = [0, 32], sizes = [8, 32], strides = [1, 1]} : vector<8x128xf32> to vector<8x32xf32>
    %142 = vector.extract_strided_slice %139 {offsets = [0, 64], sizes = [8, 32], strides = [1, 1]} : vector<8x128xf32> to vector<8x32xf32>
    %143 = vector.extract_strided_slice %139 {offsets = [0, 96], sizes = [8, 32], strides = [1, 1]} : vector<8x128xf32> to vector<8x32xf32>
    %144 = arith.mulf %141, %123 : vector<8x32xf32>
    %145 = arith.mulf %140, %143 : vector<8x32xf32>
    %146 = arith.addf %144, %145 : vector<8x32xf32>
    %147 = math.tanh %146 : vector<8x32xf32>
    %148 = arith.mulf %142, %147 : vector<8x32xf32>
    %c0_35 = arith.constant 0 : index
    %c5 = arith.constant 5 : index
    %c0_36 = arith.constant 0 : index
    %149 = vector.load %arg11[%c0_35, %c5, %c0_36] : memref<8x8x32xf32, #tpu.memory_space<vmem>>, vector<8x1x32xf32>
    %150 = vector.shape_cast %149 : vector<8x1x32xf32> to vector<8x32xf32>
    %151 = vector.shape_cast %148 : vector<8x32xf32> to vector<8x1x32xf32>
    tpu.vector_store %arg11[%c0_35, %c5, %c0_36], %151 {strides = array<i32>} : memref<8x8x32xf32, #tpu.memory_space<vmem>>, vector<8x1x32xf32>,
    %152 = vector.extract_strided_slice %7 {offsets = [0, 6, 0], sizes = [8, 1, 128], strides = [1, 1, 1]} : vector<8x8x128xf32> to vector<8x1x128xf32>
    %153 = vector.shape_cast %152 : vector<8x1x128xf32> to vector<8x128xf32>
    %cst_37 = arith.constant dense<0.000000e+00> : vector<8x128xf32>
    %154 = tpu.matmul %148, %8, %cst_37 {dimension_numbers = #tpu.dot_dimension_numbers<[1], [0], [0], [1], [0, 0, 1, 1], [], []>, precision = #tpu.contract_precision<fp32>} : vector<8x32xf32>, vector<32x128xf32>, vector<8x128xf32> -> vector<8x128xf32>
    %155 = arith.addf %153, %154 : vector<8x128xf32>
    %156 = arith.negf %155 : vector<8x128xf32>
    %157 = math.exp %156 : vector<8x128xf32>
    %cst_38 = arith.constant 1.000000e+00 : f32
    %158 = vector.broadcast %cst_38 : f32 to vector<8x128xf32>
    %159 = arith.addf %158, %157 : vector<8x128xf32>
    %160 = arith.divf %158, %159 : vector<8x128xf32>
    %161 = math.tanh %155 : vector<8x128xf32>
    %162 = arith.select %13, %160, %161 : vector<8x128xi1>, vector<8x128xf32>
    %163 = vector.extract_strided_slice %162 {offsets = [0, 0], sizes = [8, 32], strides = [1, 1]} : vector<8x128xf32> to vector<8x32xf32>
    %164 = vector.extract_strided_slice %162 {offsets = [0, 32], sizes = [8, 32], strides = [1, 1]} : vector<8x128xf32> to vector<8x32xf32>
    %165 = vector.extract_strided_slice %162 {offsets = [0, 64], sizes = [8, 32], strides = [1, 1]} : vector<8x128xf32> to vector<8x32xf32>
    %166 = vector.extract_strided_slice %162 {offsets = [0, 96], sizes = [8, 32], strides = [1, 1]} : vector<8x128xf32> to vector<8x32xf32>
    %167 = arith.mulf %164, %146 : vector<8x32xf32>
    %168 = arith.mulf %163, %166 : vector<8x32xf32>
    %169 = arith.addf %167, %168 : vector<8x32xf32>
    %170 = math.tanh %169 : vector<8x32xf32>
    %171 = arith.mulf %165, %170 : vector<8x32xf32>
    %c0_39 = arith.constant 0 : index
    %c6 = arith.constant 6 : index
    %c0_40 = arith.constant 0 : index
    %172 = vector.load %arg11[%c0_39, %c6, %c0_40] : memref<8x8x32xf32, #tpu.memory_space<vmem>>, vector<8x1x32xf32>
    %173 = vector.shape_cast %172 : vector<8x1x32xf32> to vector<8x32xf32>
    %174 = vector.shape_cast %171 : vector<8x32xf32> to vector<8x1x32xf32>
    tpu.vector_store %arg11[%c0_39, %c6, %c0_40], %174 {strides = array<i32>} : memref<8x8x32xf32, #tpu.memory_space<vmem>>, vector<8x1x32xf32>,
    %175 = vector.extract_strided_slice %7 {offsets = [0, 7, 0], sizes = [8, 1, 128], strides = [1, 1, 1]} : vector<8x8x128xf32> to vector<8x1x128xf32>
    %176 = vector.shape_cast %175 : vector<8x1x128xf32> to vector<8x128xf32>
    %cst_41 = arith.constant dense<0.000000e+00> : vector<8x128xf32>
    %177 = tpu.matmul %171, %8, %cst_41 {dimension_numbers = #tpu.dot_dimension_numbers<[1], [0], [0], [1], [0, 0, 1, 1], [], []>, precision = #tpu.contract_precision<fp32>} : vector<8x32xf32>, vector<32x128xf32>, vector<8x128xf32> -> vector<8x128xf32>
    %178 = arith.addf %176, %177 : vector<8x128xf32>
    %179 = arith.negf %178 : vector<8x128xf32>
    %180 = math.exp %179 : vector<8x128xf32>
    %cst_42 = arith.constant 1.000000e+00 : f32
    %181 = vector.broadcast %cst_42 : f32 to vector<8x128xf32>
    %182 = arith.addf %181, %180 : vector<8x128xf32>
    %183 = arith.divf %181, %182 : vector<8x128xf32>
    %184 = math.tanh %178 : vector<8x128xf32>
    %185 = arith.select %13, %183, %184 : vector<8x128xi1>, vector<8x128xf32>
    %186 = vector.extract_strided_slice %185 {offsets = [0, 0], sizes = [8, 32], strides = [1, 1]} : vector<8x128xf32> to vector<8x32xf32>
    %187 = vector.extract_strided_slice %185 {offsets = [0, 32], sizes = [8, 32], strides = [1, 1]} : vector<8x128xf32> to vector<8x32xf32>
    %188 = vector.extract_strided_slice %185 {offsets = [0, 64], sizes = [8, 32], strides = [1, 1]} : vector<8x128xf32> to vector<8x32xf32>
    %189 = vector.extract_strided_slice %185 {offsets = [0, 96], sizes = [8, 32], strides = [1, 1]} : vector<8x128xf32> to vector<8x32xf32>
    %190 = arith.mulf %187, %169 : vector<8x32xf32>
    %191 = arith.mulf %186, %189 : vector<8x32xf32>
    %192 = arith.addf %190, %191 : vector<8x32xf32>
    %193 = math.tanh %192 : vector<8x32xf32>
    %194 = arith.mulf %188, %193 : vector<8x32xf32>
    %c0_43 = arith.constant 0 : index
    %c7 = arith.constant 7 : index
    %c0_44 = arith.constant 0 : index
    %195 = vector.load %arg11[%c0_43, %c7, %c0_44] : memref<8x8x32xf32, #tpu.memory_space<vmem>>, vector<8x1x32xf32>
    %196 = vector.shape_cast %195 : vector<8x1x32xf32> to vector<8x32xf32>
    %197 = vector.shape_cast %194 : vector<8x32xf32> to vector<8x1x32xf32>
    tpu.vector_store %arg11[%c0_43, %c7, %c0_44], %197 {strides = array<i32>} : memref<8x8x32xf32, #tpu.memory_space<vmem>>, vector<8x1x32xf32>,
    %c0_45 = arith.constant 0 : index
    %c0_46 = arith.constant 0 : index
    %c0_47 = arith.constant 0 : index
    %198 = vector.load %arg11[%c0_45, %c0_46, %c0_47] : memref<8x8x32xf32, #tpu.memory_space<vmem>>, vector<8x8x32xf32>
    %199 = vector.shape_cast %198 : vector<8x8x32xf32> to vector<64x32xf32>
    %c0_48 = arith.constant 0 : index
    %c0_49 = arith.constant 0 : index
    %200 = vector.load %arg6[%c0_48, %c0_49] : memref<32x256xf32, #tpu.memory_space<vmem>>, vector<32x256xf32>
    %cst_50 = arith.constant dense<0.000000e+00> : vector<64x256xf32>
    %201 = tpu.matmul %199, %200, %cst_50 {dimension_numbers = #tpu.dot_dimension_numbers<[1], [0], [0], [1], [0, 0, 1, 1], [], []>, precision = #tpu.contract_precision<fp32>} : vector<64x32xf32>, vector<32x256xf32>, vector<64x256xf32> -> vector<64x256xf32>
    %c0_51 = arith.constant 0 : index
    %c0_52 = arith.constant 0 : index
    %202 = vector.load %arg7[%c0_51, %c0_52] : memref<1x256xf32, #tpu.memory_space<vmem>>, vector<1x256xf32>
    %203 = vector.broadcast %202 : vector<1x256xf32> to vector<64x256xf32>
    %204 = arith.addf %201, %203 : vector<64x256xf32>
    %c0_53 = arith.constant 0 : index
    %c0_54 = arith.constant 0 : index
    %205 = vector.load %arg8[%c0_53, %c0_54] : memref<64x256xf32, #tpu.memory_space<vmem>>, vector<64x256xf32>
    tpu.vector_store %arg8[%c0_53, %c0_54], %204 {strides = array<i32>} : memref<64x256xf32, #tpu.memory_space<vmem>>, vector<64x256xf32>,
    %c0_55 = arith.constant 0 : index
    %c0_56 = arith.constant 0 : index
    %206 = vector.load %arg9[%c0_55, %c0_56] : memref<8x32xf32, #tpu.memory_space<vmem>>, vector<8x32xf32>
    tpu.vector_store %arg9[%c0_55, %c0_56], %194 {strides = array<i32>} : memref<8x32xf32, #tpu.memory_space<vmem>>, vector<8x32xf32>,
    %c0_57 = arith.constant 0 : index
    %c0_58 = arith.constant 0 : index
    %207 = vector.load %arg10[%c0_57, %c0_58] : memref<8x32xf32, #tpu.memory_space<vmem>>, vector<8x32xf32>
    tpu.vector_store %arg10[%c0_57, %c0_58], %192 {strides = array<i32>} : memref<8x32xf32, #tpu.memory_space<vmem>>, vector<8x32xf32>,
    return
  }
}

</mosaic_0001>

<bundles_post_ra>
// kernel: lstm_model_forward.1
= control target key start
LH: loop header
LB: loop body
LE: loop exit
PB: predicated region body
PF: predicated region fallthrough
CT: control target
= control target key end

     0   :  { %16 = vsyncpa [#allocation4], 0  ;;  %vm9080_vm0 = vcmask 261120   ;;  %s9051_s0 = inlined_call_operand.vmem [shape: f32[8,8,32], index: 0, kind: input, shape index: {}]   ;;  %s9052_s1 = inlined_call_operand.vmem [shape: f32[32,128], index: 1, kind: input, shape index: {}]   ;;  %s9053_s2 = inlined_call_operand.vmem [shape: f32[32,128], index: 2, kind: input, shape index: {}]   ;;  %s9054_s3 = inlined_call_operand.vmem [shape: f32[1,128], index: 3, kind: input, shape index: {}]   ;;  %s9055_s4 = inlined_call_operand.vmem [shape: f32[8,32], index: 4, kind: input, shape index: {}]   ;;  %s9056_s5 = inlined_call_operand.vmem [shape: f32[8,32], index: 5, kind: input, shape index: {}]   ;;  %s9057_s6 = inlined_call_operand.vmem [shape: f32[32,256], index: 6, kind: input, shape index: {}]   ;;  %s9058_s7 = inlined_call_operand.vmem [shape: f32[1,256], index: 7, kind: input, shape index: {}]   ;;  %s9059_s8 = inlined_call_operand.hbm [shape: f32[64,256], index: 8, kind: output, shape index: {0}]   ;;  %s9060_s9 = inlined_call_operand.hbm [shape: f32[8,32], index: 9, kind: output, shape index: {1}]   ;;  %s9061_s10 = inlined_call_operand.hbm [shape: f32[8,32], index: 10, kind: output, shape index: {2}]  }
   0x1   :  { %v45_v0 = vld [vmem:[%s9052_s1 + $0x18] sm:$0xff]  ;;  %v44_v1 = vld [vmem:[%s9052_s1 + $0x10] sm:$0xff]  ;;  %v43_v2 = vld [vmem:[%s9052_s1 + $0x8] sm:$0xff] }
   0x2   :  { %v5922_v3 = vand.u32 4294901760, %v45_v0  ;;  %v5924_v4 = vand.u32 4294901760, %v44_v1  ;;  %v5926_v5 = vand.u32 4294901760, %v43_v2  ;;  %v42_v6 = vld [vmem:[%s9052_s1] sm:$0xff]  ;;  %v35_v8 = vld [vmem:[%s9051_s0 + $0x8] sm:$0xff]  ;;  %v36_v12 = vld [vmem:[%s9051_s0 + $0x10] sm:$0xff] }
   0x3   :  { %v34_v7 = vld [vmem:[%s9051_s0] sm:$0xff]  ;;  %v5937_v9 = vand.u32 4294901760, %v42_v6  ;;  %v55_v11 = vsel %vm9080_vm0, %v35_v8, 0 }
   0x4   :  { %v52_v10 = vsel %vm9080_vm0, %v34_v7, 0  ;;  %88 = vmatpush.msra.mxu0 %v5922_v3  ;;  %v173_v13 = vsub.f32 %v45_v0, %v5922_v3  ;;  %v179_v14 = vsub.f32 %v44_v1, %v5924_v4  ;;  %307 = vmatpush.msra.mxu3 %v5922_v3  ;;  %v185_v15 = vsub.f32 %v43_v2, %v5926_v5 }
   0x5   :  { %v5949_v16 = vand.u32 4294901760, %v52_v10 }
   0x6   :  { %17 = vsyncpa [#allocation6], 0  ;;  %v191_v17 = vsub.f32 %v42_v6, %v5937_v9  ;;  %v5952_v18 = vand.u32 4294901760, %v55_v11  ;;  %v58_v19 = vsel %vm9080_vm0, %v36_v12, 0  ;;  %243 = vmatpush.msra.mxu2 %v173_v13  ;;  %90 = vmatpush.msra.mxu0 %v5924_v4  ;;  %v174_v20 = vand.u32 4294901760, %v173_v13  ;;  %v480_v36 = vld [vmem:[%s9053_s2 + $0x18] sm:$0xff] }
   0x7   :  { %v96_v21 = vsub.f32 %v52_v10, %v5949_v16  ;;  %v180_v22 = vand.u32 4294901760, %v179_v14  ;;  %v186_v23 = vand.u32 4294901760, %v185_v15  ;;  %309 = vmatpush.msra.mxu3 %v5924_v4  ;;  %v5961_v31 = vand.u32 4294901760, %v58_v19  ;;  %v37_v39 = vld [vmem:[%s9051_s0 + $0x18] sm:$0xff]  ;;  %v38_v51 = vld [vmem:[%s9051_s0 + $0x20] sm:$0xff]  ;;  %v479_v59 = vld [vmem:[%s9053_s2 + $0x10] sm:$0xff] }
   0x8   :  { %v192_v24 = vand.u32 4294901760, %v191_v17  ;;  %v104_v25 = vsub.f32 %v55_v11, %v5952_v18  ;;  %246 = vmatpush.msra.mxu2 %v179_v14  ;;  %92 = vmatpush.msra.mxu0 %v5926_v5  ;;  %v175_v26 = vsub.f32 %v173_v13, %v174_v20  ;;  %v5971_v40 = vand.u32 4294901760, %v480_v36  ;;  %v39_v60 = vld [vmem:[%s9051_s0 + $0x28] sm:$0xff]  ;;  %v477_v11 = vld [vmem:[%s9053_s2] sm:$0xff]  ;;  %s5852_s1 = smov 96   ;;  %s5272_s23 = sshll.u32 %s9060_s9, 4  ;;  %s5273_s23 = int_to_ptr.hbm [resolvable:$true] %s5272_s23 }
   0x9   :  { %v97_v27 = vand.u32 4294901760, %v96_v21  ;;  %v181_v28 = vsub.f32 %v179_v14, %v180_v22  ;;  %v187_v29 = vsub.f32 %v185_v15, %v186_v23  ;;  %311 = vmatpush.msra.mxu3 %v5926_v5  ;;  %v112_v43 = vsub.f32 %v58_v19, %v5961_v31  ;;  %v478_v7 = vld [vmem:[%s9053_s2 + $0x8] sm:$0xff]  ;;  %s5283_s25 = sshll.u32 %s9061_s10, 4  ;;  %s5854_s26 = smov [#allocation7]   ;;  %s5284_s25 = int_to_ptr.hbm [resolvable:$true] %s5283_s25 }
   0xa   :  { %v193_v30 = vsub.f32 %v191_v17, %v192_v24  ;;  %249 = vmatpush.msra.mxu2 %v185_v15  ;;  %94 = vmatpush.msra.mxu0 %v5937_v9  ;;  %v176_v32 = vand.u32 4294901760, %v175_v26  ;;  %v105_v35 = vand.u32 4294901760, %v104_v25  ;;  %v5975_v44 = vsub.f32 %v480_v36, %v5971_v40  ;;  %s5855_s10 = smov [#allocation3]   ;;  %s5258_s29 = sshll.u32 %s9059_s8, 4  ;;  %s5259_s29 = int_to_ptr.hbm [resolvable:$true] %s5258_s29 }
   0xb   :  { %v98_v33 = vsub.f32 %v96_v21, %v97_v27  ;;  %v182_v34 = vand.u32 4294901760, %v181_v28  ;;  %313 = vmatpush.msra.mxu3 %v5937_v9  ;;  %v188_v38 = vand.u32 4294901760, %v187_v29  ;;  %v61_v45 = vsel %vm9080_vm0, %v37_v39, 0  ;;  %v41_v28 = vld [vmem:[%s9051_s0 + $0x38] sm:$0xff]  ;;  %s5856_s30 = smov 256   ;;  %s5857_s11 = smov 16  }
   0xc   :  { %378 = vmatpush.msrb.mxu0 %v174_v20  ;;  %177 = vmatpush.msra.mxu1 %v176_v32  ;;  %v194_v41 = vand.u32 4294901760, %v193_v30  ;;  %v106_v42 = vsub.f32 %v104_v25, %v105_v35  ;;  %9117 = vst [vmem:[#allocation10_spill] sm:$0xff] %v5975_v44  ;;  %v5980_v46 = vand.u32 4294901760, %v5975_v44  ;;  %v113_v48 = vand.u32 4294901760, %v112_v43 }
   0xd   :  { %252 = vmatpush.msra.mxu2 %v191_v17  ;;  %v99_v37 = vand.u32 4294901760, %v98_v33  ;;  %317 = vmatmul.f32.vlgmr.msra.gmra.mxu3 %v97_v27  ;;  %v5982_v49 = vand.u32 4294901760, %v61_v45  ;;  %v64_v55 = vsel %vm9080_vm0, %v38_v51, 0  ;;  %v6009_v61 = vand.u32 4294901760, %v479_v59 }
   0xe   :  { %255 = vmatmul.f32.vlgmr.msra.gmra.mxu2 %v96_v21  ;;  %183 = vmatpush.msra.mxu1 %v182_v34  ;;  %v107_v47 = vand.u32 4294901760, %v106_v42  ;;  %v533_v50 = vsub.f32 %v5975_v44, %v5980_v46  ;;  %v114_v53 = vsub.f32 %v112_v43, %v113_v48  ;;  %v5999_v58 = vand.u32 4294901760, %v64_v55 }
   0xf   :  { %100 = vmatmul.f32.vlgmr.msra.gmra.mxu0 %v99_v37  ;;  %502 = vmatpush.msrb.mxu2 %v5971_v40  ;;  %v120_v54 = vsub.f32 %v61_v45, %v5982_v49  ;;  %v6015_v0 = vsub.f32 %v479_v59, %v6009_v61  ;;  %v67_v1 = vsel %vm9080_vm0, %v39_v60, 0  ;;  %v6031_v8 = vand.u32 4294901760, %v478_v7  ;;  %v481_v37 = vld [vmem:[%s9055_s4] sm:$0xff]  ;;  %s5853_s4 = smov [#allocation5]  }
  0x10   :  { %382 = vmatpush.msrb.mxu0 %v180_v22  ;;  %189 = vmatpush.msra.mxu1 %v188_v38  ;;  %v5991_v52 = vand.u32 4294901760, %v533_v50  ;;  %v115_v56 = vand.u32 4294901760, %v114_v53  ;;  %v128_v63 = vsub.f32 %v64_v55, %v5999_v58  ;;  %v6041_v12 = vand.u32 4294901760, %v477_v11  ;;  %s5270_s24 = sshll.u32 %s5853_s4, 4  ;;  %s5271_s24 = int_to_ptr.vmem [resolvable:$true] %s5270_s24 }
  0x11   :  { %v121_v57 = vand.u32 4294901760, %v120_v54  ;;  %504 = vmatpush.msrb.mxu2 %v6009_v61  ;;  %9118 = vst [vmem:[#allocation11_spill] sm:$0xff] %v6015_v0  ;;  %v6020_v2 = vand.u32 4294901760, %v6015_v0  ;;  %v6044_v13 = vsub.f32 %v478_v7, %v6031_v8  ;;  %v73_v33 = vsel %vm9080_vm0, %v41_v28, 0 }
  0x12   :  { %386 = vmatpush.msrb.mxu0 %v186_v23  ;;  %195 = vmatpush.msra.mxu1 %v194_v41  ;;  %v6054_v20 = vsub.f32 %v477_v11, %v6041_v12  ;;  %v6087_v36 = vand.u32 4294901760, %v73_v33  ;;  %v487_v41 = vsel %vm9080_vm0, %v481_v37, 0  ;;  %v6178_v37 = vld [vmem:[%s9054_s3] ss:$0 sm:$0xff]  ;;  %vm9092_vm1 = vcmask 1041409   ;;  %s5850_s3 = smov 32  }
  0x13   :  { %197 = vmatmul.f32.vlgmr.msra.gmra.mxu1 %v5949_v16  ;;  %535 = vmatpush.msrb.mxu3 %v5991_v52  ;;  %v122_v62 = vsub.f32 %v120_v54, %v121_v57  ;;  %v539_v6 = vsub.f32 %v6015_v0, %v6020_v2  ;;  %9120 = vst [vmem:[#allocation13_spill] sm:$0xff] %v6044_v13  ;;  %v6051_v19 = vand.u32 4294901760, %v6044_v13  ;;  %v509_v42 = vand.u32 4294901760, %v487_v41 }
  0x14   :  { %390 = vmatpush.msrb.mxu0 %v192_v24  ;;  %437 = vmatpush.msrb.mxu1 %v5922_v3  ;;  %9122 = vst [vmem:[#allocation15_spill] sm:$0xff] %v6054_v20  ;;  %v6061_v22 = vand.u32 4294901760, %v6054_v20  ;;  %v152_v39 = vsub.f32 %v73_v33, %v6087_v36  ;;  %vm9091_vm2 = vcmask 1042434  }
  0x15   :  { %323 = vmatmul.f32.gmra.mxu3 %v105_v35  ;;  %v123_v3 = vand.u32 4294901760, %v122_v62  ;;  %v6036_v10 = vand.u32 4294901760, %v539_v6  ;;  %506 = vmatpush.msrb.mxu2 %v6031_v8  ;;  %9121 = vst [vmem:[#allocation14_spill] sm:$0xff] %v6051_v19  ;;  %v545_v21 = vsub.f32 %v6044_v13, %v6051_v19 }
  0x16   :  { %1613 = vmatpush.msra.mxu0 %v5980_v46  ;;  %260 = vmatmul.f32.gmra.mxu2 %v104_v25  ;;  %9123 = vst [vmem:[#allocation16_spill] sm:$0xff] %v6061_v22  ;;  %v551_v27 = vsub.f32 %v6054_v20, %v6061_v22  ;;  %v153_v45 = vand.u32 4294901760, %v152_v39 }
  0x17   :  { %108 = vmatmul.f32.gmra.mxu0 %v107_v47  ;;  %439 = vmatpush.msrb.mxu1 %v5924_v4  ;;  %v129_v4 = vand.u32 4294901760, %v128_v63  ;;  %9119 = vst [vmem:[#allocation12_spill] sm:$0xff] %v6036_v10  ;;  %v6069_v26 = vand.u32 4294901760, %v545_v21  ;;  %v510_v47 = vsub.f32 %v487_v41, %v509_v42 }
  0x18   :  { %1617 = vmatpush.msra.mxu0 %v6020_v2  ;;  %541 = vmatpush.msrb.mxu3 %v6036_v10  ;;  %v6078_v29 = vand.u32 4294901760, %v551_v27 }
  0x19   :  { %441 = vmatpush.msrb.mxu1 %v5926_v5  ;;  %v6022_v5 = vand.u32 4294901760, %v67_v1  ;;  %v130_v14 = vsub.f32 %v128_v63, %v129_v4  ;;  %508 = vmatpush.msrb.mxu2 %v6041_v12  ;;  %9124 = vst [vmem:[#allocation17_spill] sm:$0xff] %v6069_v26  ;;  %v511_v50 = vand.u32 4294901760, %v510_v47 }
  0x1a   :  { %1621 = vmatpush.msra.mxu0 %v6051_v19  ;;  %9125 = vst [vmem:[#allocation18_spill] sm:$0xff] %v6078_v29  ;;  %547 = vmatpush.msrb.mxu3 %v6069_v26 }
  0x1b   :  { %443 = vmatpush.msrb.mxu1 %v5937_v9  ;;  %v40_v9 = vld [vmem:[%s9051_s0 + $0x30] sm:$0xff]  ;;  %v136_v15 = vsub.f32 %v67_v1, %v6022_v5  ;;  %v131_v23 = vand.u32 4294901760, %v130_v14  ;;  %573 = vmatpush.msra.mxu2 %v5975_v44  ;;  %v512_v53 = vsub.f32 %v510_v47, %v511_v50 }
  0x1c   :  { %201 = vmatmul.f32.gmra.mxu1 %v5952_v18  ;;  %v70_v17 = vsel %vm9080_vm0, %v40_v9, 0  ;;  %1625 = vmatpush.msra.mxu0 %v6061_v22 }
  0x1d   :  { %1644 = vmatpush.msra.mxu1 %v5971_v40  ;;  %329 = vmatmul.f32.gmra.mxu3 %v113_v48  ;;  %v137_v24 = vand.u32 4294901760, %v136_v15  ;;  %v6064_v25 = vand.u32 4294901760, %v70_v17  ;;  %v154_v48 = vsub.f32 %v152_v39, %v153_v45 }
  0x1e   :  { %265 = vmatmul.f32.gmra.mxu2 %v112_v43  ;;  %553 = vmatpush.msrb.mxu3 %v6078_v29 }
  0x1f   :  { %116 = vmatmul.f32.gmra.mxu0 %v115_v56  ;;  %1646 = vmatpush.msra.mxu1 %v6009_v61  ;;  %v138_v30 = vsub.f32 %v136_v15, %v137_v24  ;;  %v144_v32 = vsub.f32 %v70_v17, %v6064_v25  ;;  %v155_v51 = vand.u32 4294901760, %v154_v48 }
  0x20   :  { %576 = vmatpush.msra.mxu2 %v6015_v0  ;;  %602 = vmatpush.msra.mxu3 %v5971_v40 }
  0x21   :  { %1648 = vmatpush.msra.mxu1 %v6031_v8  ;;  %v139_v34 = vand.u32 4294901760, %v138_v30  ;;  %v145_v35 = vand.u32 4294901760, %v144_v32 }
  0x22   :  { %579 = vmatpush.msra.mxu2 %v6044_v13  ;;  %604 = vmatpush.msra.mxu3 %v6009_v61 }
  0x23   :  { %1650 = vmatpush.msra.mxu1 %v6041_v12  ;;  %v146_v38 = vsub.f32 %v144_v32, %v145_v35 }
  0x24   :  { %205 = vmatmul.f32.gmra.mxu1 %v5961_v31  ;;  %582 = vmatpush.msra.mxu2 %v6054_v20 }
  0x25   :  { %335 = vmatmul.f32.gmra.mxu3 %v121_v57  ;;  %v147_v43 = vand.u32 4294901760, %v146_v38 }
  0x26   :  { %270 = vmatmul.f32.gmra.mxu2 %v120_v54  ;;  %606 = vmatpush.msra.mxu3 %v6031_v8  ;;  %v513_v54 = vand.u32 4294901760, %v512_v53 }
  0x27   :  { %124 = vmatmul.f32.gmra.mxu0 %v123_v3 }
  0x28   :  { %608 = vmatpush.msra.mxu3 %v6041_v12 }
  0x2c   :  { %209 = vmatmul.f32.gmra.mxu1 %v5982_v49 }
  0x2d   :  { %341 = vmatmul.f32.gmra.mxu3 %v129_v4 }
  0x2e   :  { %275 = vmatmul.f32.gmra.mxu2 %v128_v63 }
  0x2f   :  { %132 = vmatmul.f32.gmra.mxu0 %v131_v23 }
  0x34   :  { %213 = vmatmul.f32.gmra.mxu1 %v5999_v58 }
  0x35   :  { %347 = vmatmul.f32.gmra.mxu3 %v137_v24 }
  0x36   :  { %280 = vmatmul.f32.gmra.mxu2 %v136_v15 }
  0x37   :  { %140 = vmatmul.f32.gmra.mxu0 %v139_v34 }
  0x3c   :  { %217 = vmatmul.f32.gmra.mxu1 %v6022_v5 }
  0x3d   :  { %353 = vmatmul.f32.gmra.mxu3 %v145_v35 }
  0x3e   :  { %285 = vmatmul.f32.gmra.mxu2 %v144_v32 }
  0x3f   :  { %148 = vmatmul.f32.gmra.mxu0 %v147_v43 }
  0x44   :  { %221 = vmatmul.f32.gmra.mxu1 %v6064_v25 }
  0x45   :  { %359 = vmatmul.f32.gmra.mxu3 %v153_v45 }
  0x46   :  { %290 = vmatmul.f32.gmra.mxu2 %v152_v39 }
  0x47   :  { %156 = vmatmul.f32.gmra.mxu0 %v155_v51 }
  0x4c   :  { %225 = vmatmul.f32.gmra.mxu1 %v6087_v36 }
  0x4d   :  { %555 = vmatmul.f32.vlgmr.msrb.gmra.mxu3 %v509_v42 }
  0x4e   :  { %514 = vmatmul.f32.vlgmr.msrb.gmra.mxu2 %v513_v54  ;;  %662 = vmatpush.msrb.mxu3 %v5971_v40 }
  0x4f   :  { %392 = vmatmul.f32.vlgmr.msrb.gmra.mxu0 %v5949_v16  ;;  %631 = vmatpush.msrb.mxu2 %v5980_v46 }
  0x50   :  { %2040 = vmatpush.msrb.mxu0 %v5975_v44  ;;  %664 = vmatpush.msrb.mxu3 %v6009_v61 }
  0x51   :  { %635 = vmatpush.msrb.mxu2 %v6020_v2 }
  0x52   :  { %2043 = vmatpush.msrb.mxu0 %v6015_v0  ;;  %666 = vmatpush.msrb.mxu3 %v6031_v8 }
  0x53   :  { %639 = vmatpush.msrb.mxu2 %v6051_v19 }
  0x54   :  { %445 = vmatmul.f32.vlgmr.msrb.gmra.mxu1 %v5949_v16  ;;  %668 = vmatpush.msrb.mxu3 %v6041_v12 }
  0x55   :  { %643 = vmatpush.msrb.mxu2 %v6061_v22  ;;  %2069 = vmatpush.msrb.mxu1 %v5971_v40 }
  0x56   :  { %585 = vmatmul.f32.vlgmr.msra.gmra.mxu2 %v510_v47  ;;  %612 = vmatmul.f32.vlgmr.msra.gmra.mxu3 %v511_v50 }
  0x57   :  { %396 = vmatmul.f32.gmra.mxu0 %v5952_v18  ;;  %1032 = vmatpush.msra.mxu3 %v5991_v52 }
  0x58   :  { %999 = vmatpush.msra.mxu2 %v5971_v40  ;;  %2046 = vmatpush.msrb.mxu0 %v6044_v13 }
  0x59   :  { %2071 = vmatpush.msrb.mxu1 %v6009_v61  ;;  %1038 = vmatpush.msra.mxu3 %v6036_v10 }
  0x5a   :  { %1001 = vmatpush.msra.mxu2 %v6009_v61  ;;  %2049 = vmatpush.msrb.mxu0 %v6054_v20 }
  0x5b   :  { %2073 = vmatpush.msrb.mxu1 %v6031_v8  ;;  %1044 = vmatpush.msra.mxu3 %v6069_v26 }
  0x5c   :  { %449 = vmatmul.f32.gmra.mxu1 %v5952_v18  ;;  %1003 = vmatpush.msra.mxu2 %v6031_v8 }
  0x5d   :  { %2075 = vmatpush.msrb.mxu1 %v6041_v12  ;;  %1050 = vmatpush.msra.mxu3 %v6078_v29 }
  0x5e   :  { %645 = vmatmul.f32.vlgmr.msrb.gmra.mxu2 %v509_v42  ;;  %670 = vmatmul.f32.vlgmr.msrb.gmra.mxu3 %v509_v42 }
  0x5f   :  { %400 = vmatmul.f32.gmra.mxu0 %v5961_v31  ;;  %1099 = vmatpush.msrb.mxu3 %v5971_v40 }
  0x60   :  { %1005 = vmatpush.msra.mxu2 %v6041_v12 }
  0x61   :  { %1101 = vmatpush.msrb.mxu3 %v6009_v61 }
  0x62   :  { %1070 = vmatpush.msrb.mxu2 %v5975_v44 }
  0x63   :  { %1103 = vmatpush.msrb.mxu3 %v6031_v8 }
  0x64   :  { %1073 = vmatpush.msrb.mxu2 %v6015_v0  ;;  %453 = vmatmul.f32.gmra.mxu1 %v5961_v31 }
  0x65   :  { %1105 = vmatpush.msrb.mxu3 %v6041_v12 }
  0x66   :  { %1076 = vmatpush.msrb.mxu2 %v6044_v13 }
  0x67   :  { %404 = vmatmul.f32.gmra.mxu0 %v5982_v49 }
  0x68   :  { %1079 = vmatpush.msrb.mxu2 %v6054_v20 }
  0x6c   :  { %457 = vmatmul.f32.gmra.mxu1 %v5982_v49 }
  0x6f   :  { %408 = vmatmul.f32.gmra.mxu0 %v5999_v58 }
  0x74   :  { %461 = vmatmul.f32.gmra.mxu1 %v5999_v58 }
  0x77   :  { %412 = vmatmul.f32.gmra.mxu0 %v6022_v5 }
  0x7c   :  { %465 = vmatmul.f32.gmra.mxu1 %v6022_v5 }
  0x7f   :  { %416 = vmatmul.f32.gmra.mxu0 %v6064_v25 }
  0x84   :  { %469 = vmatmul.f32.gmra.mxu1 %v6064_v25 }
  0x87   :  { %420 = vmatmul.f32.gmra.mxu0 %v6087_v36 }
  0x8c   :  { %v101_v16 = vpop.f32.mrf.mxu0  ;;  %473 = vmatmul.f32.gmra.mxu1 %v6087_v36 }
  0x8d   :  { %v102_v41 = vadd.f32 %v6178_v37, %v101_v16 }
  0x90   :  { %v198_v18 = vpop.f32.mrf.mxu1  ;;  %v318_v49 = vpop.f32.mrf.mxu3 }
  0x91   :  { %v256_v31 = vpop.f32.mrf.mxu2  ;;  %v199_v50 = vadd.f32 %v198_v18, %v102_v41 }
  0x93   :  { %v257_v44 = vadd.f32 %v256_v31, %v199_v50 }
  0x94   :  { %v109_v55 = vpop.f32.mrf.mxu0 }
  0x95   :  { %v110_v43 = vadd.f32 %v6178_v37, %v109_v55 }
  0x98   :  { %v324_v58 = vpop.f32.mrf.mxu3 }
  0x99   :  { %v202_v56 = vpop.f32.mrf.mxu1  ;;  %v261_v57 = vpop.f32.mrf.mxu2 }
  0x9a   :  { %v203_v54 = vadd.f32 %v202_v56, %v110_v43 }
  0x9c   :  { %v117_v59 = vpop.f32.mrf.mxu0  ;;  %v262_v22 = vadd.f32 %v261_v57, %v203_v54 }
  0x9d   :  { %v118_v45 = vadd.f32 %v6178_v37, %v117_v59  ;;  %v319_v59 = vadd.f32 %v318_v49, %v257_v44 }
  0x9e   :  { %v325_v18 = vadd.f32 %v324_v58, %v262_v22 }
  0xa0   :  { %v330_v63 = vpop.f32.mrf.mxu3 }
  0xa1   :  { %v206_v60 = vpop.f32.mrf.mxu1  ;;  %v266_v62 = vpop.f32.mrf.mxu2 }
  0xa2   :  { %v207_v13 = vadd.f32 %v206_v60, %v118_v45 }
  0xa4   :  { %v125_v1 = vpop.f32.mrf.mxu0  ;;  %v267_v16 = vadd.f32 %v266_v62, %v207_v13 }
  0xa5   :  { %v126_v20 = vadd.f32 %v6178_v37, %v125_v1 }
  0xa8   :  { %v336_v5 = vpop.f32.mrf.mxu3 }
  0xa9   :  { %v210_v3 = vpop.f32.mrf.mxu1  ;;  %v271_v4 = vpop.f32.mrf.mxu2 }
  0xaa   :  { %v211_v26 = vadd.f32 %v210_v3, %v126_v20 }
  0xac   :  { %v133_v6 = vpop.f32.mrf.mxu0  ;;  %v272_v41 = vadd.f32 %v271_v4, %v211_v26 }
  0xae   :  { %v337_v62 = vadd.f32 %v336_v5, %v272_v41 }
  0xb0   :  { %v6151_v11 = vpop.f32.mrf.mxu3 }
  0xb1   :  { %v214_v7 = vpop.f32.mrf.mxu1  ;;  %v6149_v9 = vpop.f32.mrf.mxu2 }
  0xb4   :  { %v141_v14 = vpop.f32.mrf.mxu0 }
  0xb8   :  { %v6157_v21 = vpop.f32.mrf.mxu3 }
  0xb9   :  { %v6153_v15 = vpop.f32.mrf.mxu1  ;;  %v6155_v17 = vpop.f32.mrf.mxu2 }
  0xbc   :  { %v6159_v23 = vpop.f32.mrf.mxu0 }
  0xbd   :  { %v150_v50 = vadd.f32 %v6178_v37, %v6159_v23 }
  0xc0   :  { %v6165_v27 = vpop.f32.mrf.mxu3 }
  0xc1   :  { %v6161_v24 = vpop.f32.mrf.mxu1  ;;  %v6163_v25 = vpop.f32.mrf.mxu2 }
  0xc4   :  { %v6167_v28 = vpop.f32.mrf.mxu0 }
  0xc8   :  { %v6173_v33 = vpop.f32.mrf.mxu3 }
  0xc9   :  { %v6169_v30 = vpop.f32.mrf.mxu1  ;;  %v6171_v32 = vpop.f32.mrf.mxu2 }
  0xcc   :  { %v393_v34 = vpop.f32.mrf.mxu0 }
  0xcd   :  { %v394_v56 = vadd.f32 %v393_v34, %v319_v59 }
  0xd0   :  { %v556_v38 = vpop.f32.mrf.mxu3 }
  0xd1   :  { %v446_v35 = vpop.f32.mrf.mxu1  ;;  %v515_v36 = vpop.f32.mrf.mxu2 }
  0xd2   :  { %v557_v42 = vadd.f32 %v556_v38, %v515_v36  ;;  %v134_v36 = vadd.f32 %v6178_v37, %v133_v6  ;;  %v6187_v45 = vadd.f32 %v446_v35, %v394_v56  ;;  %v158_v56 = vadd.f32 %v6178_v37, %v6167_v28 }
  0xd4   :  { %v397_v39 = vpop.f32.mrf.mxu0  ;;  %v215_v60 = vadd.f32 %v214_v7, %v134_v36  ;;  %v223_v36 = vadd.f32 %v6161_v24, %v150_v50 }
  0xd5   :  { %v398_v31 = vadd.f32 %v397_v39, %v325_v18 }
  0xd6   :  { %v277_v49 = vadd.f32 %v6149_v9, %v215_v60 }
  0xd8   :  { %v343_v7 = vadd.f32 %v6151_v11, %v277_v49 }
  0xd9   :  { %v450_v47 = vpop.f32.mrf.mxu1  ;;  %v586_v48 = vpop.f32.mrf.mxu2 }
  0xda   :  { %v587_v51 = vadd.f32 %v586_v48, %v557_v42  ;;  %v613_v53 = vpop.f32.mrf.mxu3  ;;  %v331_v42 = vadd.f32 %v330_v63, %v267_v16  ;;  %v6191_v44 = vadd.f32 %v450_v47, %v398_v31 }
  0xdc   :  { %v401_v0 = vpop.f32.mrf.mxu0  ;;  %v614_v29 = vadd.f32 %v613_v53, %v587_v51  ;;  %9126 = vst [vmem:[#allocation19_spill] sm:$0xff] %v6191_v44 }
  0xdd   :  { %v402_v20 = vadd.f32 %v401_v0, %v331_v42  ;;  %v142_v0 = vadd.f32 %v6178_v37, %v141_v14  ;;  %v287_v42 = vadd.f32 %v6163_v25, %v223_v36  ;;  %v227_v25 = vadd.f32 %v6169_v30, %v158_v56 }
  0xdf   :  { %v219_v34 = vadd.f32 %v6153_v15, %v142_v0 }
  0xe1   :  { %v454_v55 = vpop.f32.mrf.mxu1  ;;  %v646_v38 = vpop.f32.mrf.mxu2  ;;  %v282_v48 = vadd.f32 %v6155_v17, %v219_v34 }
  0xe2   :  { %v647_v19 = vadd.f32 %v646_v38, %v614_v29  ;;  %v671_v10 = vpop.f32.mrf.mxu3  ;;  %v6193_v29 = vadd.f32 %v454_v55, %v402_v20 }
  0xe3   :  { %v349_v16 = vadd.f32 %v6157_v21, %v282_v48 }
  0xe4   :  { %v405_v43 = vpop.f32.mrf.mxu0  ;;  %v6185_v1 = vadd.f32 %v671_v10, %v647_v19  ;;  %9127 = vst [vmem:[#allocation20_spill] sm:$0xff] %v6193_v29 }
  0xe5   :  { %v406_v10 = vadd.f32 %v405_v43, %v337_v62 }
  0xe6   :  { %v675_v13 = vrot.slane %v6185_v1, 1  ;;  %v676_v57 = vrot.slane %v6185_v1, 2  ;;  %v6197_v22 = vadd.f32 %v6185_v1, %v6187_v45  ;;  %v677_v3 = vrot.slane %v6185_v1, 3 }
  0xe7   :  { %v678_v39 = vrot.slane %v6185_v1, 4  ;;  %v679_v59 = vrot.slane %v6185_v1, 5 }
  0xe8   :  { %v691_v26 = vadd.f32 %v675_v13, %v6191_v44  ;;  %v6203_v58 = vadd.f32 %v676_v57, %v6193_v29  ;;  %v5301_v4 = vmul.f32 -1.442695, %v6197_v22  ;;  %v355_v13 = vadd.f32 %v6165_v27, %v287_v42 }
  0xe9   :  { %v458_v19 = vpop.f32.mrf.mxu1  ;;  %v680_v27 = vrot.slane %v6185_v1, 6 }
  0xea   :  { %v6205_v63 = vadd.f32 %v458_v19, %v406_v10  ;;  %v5302_v6 = vmul.f32 -1.442695, %v691_v26  ;;  %v5303_v35 = vmul.f32 -1.442695, %v6203_v58  ;;  %5374 = vpow2.f32 %v5301_v4 }
  0xeb   :  { %v292_v19 = vadd.f32 %v6171_v32, %v227_v25 }
  0xec   :  { %9128 = vst [vmem:[#allocation21_spill] sm:$0xff] %v6205_v63  ;;  %v409_v5 = vpop.f32.mrf.mxu0  ;;  %v6213_v9 = vadd.f32 %v677_v3, %v6205_v63  ;;  %5376 = vpow2.f32 %v5302_v6 }
  0xed   :  { %v410_v14 = vadd.f32 %v409_v5, %v343_v7  ;;  %5378 = vpow2.f32 %v5303_v35  ;;  %v361_v7 = vadd.f32 %v6173_v33, %v292_v19  ;;  %v681_v33 = vrot.slane %v6185_v1, 7 }
  0xee   :  { %v5304_v11 = vmul.f32 -1.442695, %v6213_v9 }
  0xf0   :  { %v5375_v54 = vpop.eup %5374  ;;  %5380 = vpow2.f32 %v5304_v11 }
  0xf1   :  { %v462_v47 = vpop.f32.mrf.mxu1  ;;  %v6229_v41 = vadd.f32 1.0, %v5375_v54 }
  0xf2   :  { %v6219_v51 = vadd.f32 %v462_v47, %v410_v14  ;;  %v5377_v17 = vpop.eup %5376 }
  0xf3   :  { %v5379_v38 = vpop.eup %5378  ;;  %v6236_v24 = vadd.f32 1.0, %v5377_v17  ;;  %v741_v36 = vand.u32 2147483648, %v6229_v41  ;;  %vm735_vm3 = vweird.f32 %v6229_v41 }
  0xf4   :  { %9129 = vst [vmem:[#allocation22_spill] sm:$0xff] %v6219_v51  ;;  %v413_v15 = vpop.f32.mrf.mxu0  ;;  %v6223_v53 = vadd.f32 %v678_v39, %v6219_v51  ;;  %v6238_v43 = vadd.f32 1.0, %v5379_v38  ;;  %v739_v38 = vand.u32 2147483647, %v6229_v41 }
  0xf5   :  { %v414_v23 = vadd.f32 %v413_v15, %v349_v16  ;;  %vm750_vm4 = vweird.f32 %v6236_v24 }
  0xf6   :  { %v5305_v55 = vmul.f32 -1.442695, %v6223_v53  ;;  %v5381_v20 = vpop.eup %5380  ;;  %vm765_vm5 = vweird.f32 %v6238_v43  ;;  %vm6313_vm6 = vcmp.eq.f32.partialorder %v739_v38, 8.507059e+37 }
  0xf7   :  { %v6249_v62 = vadd.f32 1.0, %v5381_v20 }
  0xf8   :  { %5382 = vpow2.f32 %v5305_v55 }
  0xf9   :  { %v466_v18 = vpop.f32.mrf.mxu1  ;;  %5384 = vrcp.f32 %v6229_v41  ;;  %vm780_vm11 = vweird.f32 %v6249_v62 }
  0xfa   :  { %v6234_v21 = vadd.f32 %v466_v18, %v414_v23  ;;  %5386 = vrcp.f32 %v6236_v24  ;;  %v756_v23 = vand.u32 2147483648, %v6236_v24 }
  0xfb   :  { %5388 = vrcp.f32 %v6238_v43 }
  0xfc   :  { %9130 = vst [vmem:[#allocation23_spill] sm:$0xff] %v6234_v21  ;;  %v417_v60 = vpop.f32.mrf.mxu0  ;;  %v6241_v31 = vadd.f32 %v679_v59, %v6234_v21 }
  0xfd   :  { %v418_v37 = vadd.f32 %v417_v60, %v355_v13  ;;  %v742_v13 = vor.u32 1.1754944e-38, %v741_v36 }
  0xfe   :  { %v5306_v57 = vmul.f32 -1.442695, %v6241_v31  ;;  %v5383_v28 = vpop.eup %5382 }
  0xff   :  { %v6255_v0 = vadd.f32 1.0, %v5383_v28  ;;  %v6257_v30 = vpop.eup %5384 }
 0x100   :  { %5390 = vpow2.f32 %v5306_v57  ;;  %v6259_v3 = vpop.eup %5386  ;;  %v731_v35 = vmul.f32 %v6257_v30, %v6229_v41  ;;  %vm736_vm8 = vweird.f32 %v6257_v30 }
 0x101   :  { %v470_v10 = vpop.f32.mrf.mxu1  ;;  %5392 = vtanh.f32 %v691_v26  ;;  %v6265_v5 = vpop.eup %5388  ;;  %v483_v26 = vlaneseq  ;;  %v746_v39 = vmul.f32 %v6259_v3, %v6236_v24  ;;  %vm751_vm9 = vweird.f32 %v6259_v3  ;;  %vm6342_vm12 = vmor %vm735_vm3, %vm736_vm8 }
 0x102   :  { %v6252_v49 = vadd.f32 %v470_v10, %v418_v37  ;;  %5394 = vrcp.f32 %v6249_v62  ;;  %v761_v11 = vmul.f32 %v6265_v5, %v6238_v43  ;;  %v732_v16 = vsub.f32 1.0, %v731_v35  ;;  %vm6355_vm14 = vmor %vm750_vm4, %vm751_vm9 }
 0x103   :  { %5396 = vrcp.f32 %v6255_v0  ;;  %v747_v55 = vsub.f32 1.0, %v746_v39  ;;  %v769_v37 = vand.u32 2147483647, %v6238_v43  ;;  %vm766_vm13 = vweird.f32 %v6265_v5 }
 0x104   :  { %9131 = vst [vmem:[#allocation24_spill] sm:$0xff] %v6252_v49  ;;  %v6262_v4 = vadd.f32 %v680_v27, %v6252_v49  ;;  %v421_v6 = vpop.f32.mrf.mxu0  ;;  %5398 = vtanh.f32 %v6203_v58  ;;  %v6287_v58 = vand.u32 127, %v483_v26  ;;  %v762_v42 = vsub.f32 1.0, %v761_v11  ;;  %vm6380_vm3 = vmor %vm765_vm5, %vm766_vm13 }
 0x105   :  { %v422_v47 = vadd.f32 %v421_v6, %v361_v7  ;;  %v733_v20 = vmul.f32 %v6257_v30, %v732_v16  ;;  %v748_v28 = vmul.f32 %v6259_v3, %v747_v55  ;;  %v757_v6 = vor.u32 1.1754944e-38, %v756_v23 }
 0x106   :  { %v5391_v32 = vpop.eup %5390  ;;  %v5307_v34 = vmul.f32 -1.442695, %v6262_v4  ;;  %v763_v26 = vmul.f32 %v6265_v5, %v762_v42  ;;  %vm6335_vm10 = vcmp.eq.f32.partialorder %v769_v37, 8.507059e+37  ;;  %v799_v37 = vand.u32 2147483647, %v6255_v0 }
 0x107   :  { %v6272_v14 = vadd.f32 1.0, %v5391_v32  ;;  %v5393_v48 = vpop.eup %5392  ;;  %v771_v32 = vand.u32 2147483648, %v6238_v43  ;;  %v749_v11 = vadd.f32 %v6259_v3, %v748_v28  ;;  %vm795_vm8 = vweird.f32 %v6255_v0 }
 0x108   :  { %5400 = vpow2.f32 %v5307_v34  ;;  %v6281_v15 = vpop.eup %5394  ;;  %v896_v59 = vrot.slane %v5393_v48, 7  ;;  %v734_v48 = vadd.f32 %v6257_v30, %v733_v20  ;;  %vm9090_vm5 = vcmask 1043459  }
 0x109   :  { %v474_v50 = vpop.f32.mrf.mxu1  ;;  %5402 = vrcp.f32 %v6272_v14  ;;  %v6290_v1 = vpop.eup %5396  ;;  %v772_v38 = vor.u32 1.1754944e-38, %v771_v32  ;;  %vm781_vm4 = vweird.f32 %v6281_v15  ;;  %vm6404_vm9 = vcmp.eq.f32.partialorder %v799_v37, 8.507059e+37 }
 0x10a   :  { %v6283_v54 = vadd.f32 %v474_v50, %v422_v47  ;;  %5404 = vtanh.f32 %v6197_v22  ;;  %v5399_v18 = vpop.eup %5398  ;;  %v754_v22 = vand.u32 2147483647, %v6236_v24  ;;  %v791_v10 = vmul.f32 %v6290_v1, %v6255_v0 }
 0x10b   :  { %5406 = vtanh.f32 %v6213_v9  ;;  %v776_v9 = vmul.f32 %v6281_v15, %v6249_v62  ;;  %v784_v47 = vand.u32 2147483647, %v6249_v62  ;;  %v786_v50 = vand.u32 2147483648, %v6249_v62 }
 0x10c   :  { %9132 = vst [vmem:[#allocation25_spill] sm:$0xff] %v6283_v54  ;;  %v6293_v17 = vadd.f32 %v681_v33, %v6283_v54  ;;  %vm6322_vm7 = vcmp.eq.f32.partialorder %v754_v22, 8.507059e+37  ;;  %v898_v33 = vrot.slane %v5399_v18, 6  ;;  %v792_v16 = vsub.f32 1.0, %v791_v10 }
 0x10d   :  { %v777_v39 = vsub.f32 1.0, %v776_v9  ;;  %v764_v18 = vadd.f32 %v6265_v5, %v763_v26  ;;  %v738_v9 = vsel %vm6342_vm12, %v6257_v30, %v734_v48  ;;  %v753_v30 = vsel %vm6355_vm14, %v6259_v3, %v749_v11 }
 0x10e   :  { %v5401_v56 = vpop.eup %5400  ;;  %v5308_v60 = vmul.f32 -1.442695, %v6293_v17  ;;  %vm6370_vm15 = vcmp.eq.f32.partialorder %v784_v47, 8.507059e+37  ;;  %v793_v28 = vmul.f32 %v6290_v1, %v792_v16  ;;  %v801_v26 = vand.u32 2147483648, %v6255_v0 }
 0x10f   :  { %v6304_v25 = vpop.eup %5402  ;;  %v6306_v57 = vadd.f32 1.0, %v5401_v56  ;;  %v787_v56 = vor.u32 1.1754944e-38, %v786_v50  ;;  %v768_v43 = vsel %vm6380_vm3, %v6265_v5, %v764_v18  ;;  %v816_v11 = vand.u32 2147483648, %v6272_v14 }
 0x110   :  { %v5405_v19 = vpop.eup %5404  ;;  %5408 = vpow2.f32 %v5308_v60  ;;  %v806_v7 = vmul.f32 %v6304_v25, %v6272_v14  ;;  %vm811_vm12 = vweird.f32 %v6304_v25  ;;  %vm810_vm13 = vweird.f32 %v6272_v14 }
 0x111   :  { %v6320_v34 = vpop.eup %5406  ;;  %5410 = vrcp.f32 %v6306_v57  ;;  %v897_v36 = vsel %vm9092_vm1, %v896_v59, %v5405_v19  ;;  %v778_v59 = vmul.f32 %v6281_v15, %v777_v39  ;;  %v743_v19 = vsel %vm6313_vm6, %v742_v13, %v738_v9  ;;  %vm6442_vm3 = vmor %vm810_vm13, %vm811_vm12 }
 0x112   :  { %v807_v23 = vsub.f32 1.0, %v806_v7  ;;  %5412 = vtanh.f32 %v6223_v53  ;;  %v6361_v60 = vsel %vm9091_vm2, %v898_v33, %v897_v36  ;;  %v758_v7 = vsel %vm6322_vm7, %v757_v6, %v753_v30  ;;  %vm6417_vm7 = vmor %vm780_vm11, %vm781_vm4 }
 0x113   :  { %5414 = vtanh.f32 %v6241_v31  ;;  %v779_v32 = vadd.f32 %v6281_v15, %v778_v59  ;;  %v900_v47 = vrot.slane %v6320_v34, 5  ;;  %v794_v13 = vadd.f32 %v6290_v1, %v793_v28 }
 0x114   :  { %v808_v3 = vmul.f32 %v6304_v25, %v807_v23  ;;  %vm796_vm6 = vweird.f32 %v6290_v1  ;;  %v773_v6 = vsel %vm6335_vm10, %v772_v38, %v768_v43  ;;  %v814_v33 = vand.u32 2147483647, %v6272_v14 }
 0x115   :  { %vm6432_vm11 = vmor %vm795_vm8, %vm796_vm6  ;;  %v831_v36 = vand.u32 2147483648, %v6306_v57  ;;  %v866_v55 = vrot.slane %v758_v7, 7  ;;  %vm9089_vm14 = vcmask 1044484   ;;  %vm825_vm4 = vweird.f32 %v6306_v57 }
 0x116   :  { %v5409_v42 = vpop.eup %5408  ;;  %v809_v35 = vadd.f32 %v6304_v25, %v808_v3  ;;  %v798_v38 = vsel %vm6432_vm11, %v6290_v1, %v794_v13  ;;  %v829_v0 = vand.u32 2147483647, %v6306_v57  ;;  %vm9086_vm8 = vcmask 1045509  }
 0x117   :  { %v6363_v20 = vpop.eup %5410  ;;  %v6365_v53 = vadd.f32 1.0, %v5409_v42  ;;  %v802_v22 = vor.u32 1.1754944e-38, %v801_v26  ;;  %v869_v9 = vrot.slane %v773_v6, 6  ;;  %v868_v30 = vsel %vm9092_vm1, %v866_v55, %v743_v19 }
 0x118   :  { %v821_v10 = vmul.f32 %v6363_v20, %v6306_v57  ;;  %v6400_v48 = vpop.eup %5412  ;;  %vm826_vm10 = vweird.f32 %v6363_v20  ;;  %v813_v18 = vsel %vm6442_vm3, %v6304_v25, %v809_v35  ;;  %v832_v25 = vor.u32 1.1754944e-38, %v831_v36 }
 0x119   :  { %5416 = vrcp.f32 %v6365_v53  ;;  %v6409_v27 = vpop.eup %5414  ;;  %vm6456_vm6 = vmor %vm825_vm4, %vm826_vm10  ;;  %v803_v41 = vsel %vm6404_vm9, %v802_v22, %v798_v38  ;;  %v846_v28 = vand.u32 2147483648, %v6365_v53  ;;  %vm9085_vm10 = vcmask 1046534  }
 0x11a   :  { %v822_v39 = vsub.f32 1.0, %v821_v10  ;;  %5418 = vtanh.f32 %v6262_v4  ;;  %v783_v4 = vsel %vm6417_vm7, %v6281_v15, %v779_v32  ;;  %vm815_vm7 = vcmp.eq.f32.partialorder %v814_v33, 8.507059e+37 }
 0x11b   :  { %5420 = vtanh.f32 %v6293_v17  ;;  %v788_v14 = vsel %vm6370_vm15, %v787_v56, %v783_v4  ;;  %v817_v17 = vor.u32 1.1754944e-38, %v816_v11  ;;  %vm830_vm15 = vcmp.eq.f32.partialorder %v829_v0, 8.507059e+37 }
 0x11c   :  { %v823_v50 = vmul.f32 %v6363_v20, %v822_v39  ;;  %v872_v37 = vrot.slane %v788_v14, 5  ;;  %v844_v10 = vand.u32 2147483647, %v6365_v53  ;;  %v901_v32 = vsel %vm9090_vm5, %v900_v47, %v6361_v60 }
 0x11d   :  { %v818_v24 = vsel %vm815_vm7, %v817_v17, %v813_v18  ;;  %v902_v7 = vrot.slane %v6400_v48, 4  ;;  %vm840_vm9 = vweird.f32 %v6365_v53  ;;  %v904_v39 = vrot.slane %v6409_v27, 3 }
 0x11e   :  { %v824_v16 = vadd.f32 %v6363_v20, %v823_v50  ;;  %v878_v19 = vrot.slane %v818_v24, 3  ;;  %v847_v13 = vor.u32 1.1754944e-38, %v846_v28  ;;  %v871_v5 = vsel %vm9091_vm2, %v869_v9, %v868_v30  ;;  %v9158_v24 = vld [vmem:[#allocation12_spill] sm:$0xff]  ;;  %v9159_v28 = vld [vmem:[#allocation14_spill] sm:$0xff] }
 0x11f   :  { %v5417_v15 = vpop.eup %5416  ;;  %vm845_vm13 = vcmp.eq.f32.partialorder %v844_v10, 8.507059e+37  ;;  %v874_v50 = vsel %vm9090_vm5, %v872_v37, %v871_v5  ;;  %vm9084_vm3 = vcmask 1047559   ;;  %vm9081_vm4 = vcmp.lt.s32.totalorder %v6287_v58, 96  ;;  %v9160_v37 = vld [vmem:[#allocation17_spill] sm:$0xff]  ;;  %v9163_v10 = vld [vmem:[#allocation10_spill] sm:$0xff] }
 0x120   :  { %v836_v59 = vmul.f32 %v5417_v15, %v6365_v53  ;;  %v5419_v57 = vpop.eup %5418  ;;  %v828_v42 = vsel %vm6456_vm6, %v6363_v20, %v824_v16  ;;  %vm841_vm12 = vweird.f32 %v5417_v15  ;;  %v875_v20 = vrot.slane %v803_v41, 4 }
 0x121   :  { %v833_v31 = vsel %vm830_vm15, %v832_v25, %v828_v42  ;;  %v5421_v43 = vpop.eup %5420  ;;  %vm842_vm11 = vmor %vm840_vm9, %vm841_vm12  ;;  %v906_v34 = vrot.slane %v5419_v57, 2  ;;  %v903_v53 = vsel %vm9089_vm14, %v902_v7, %v901_v32  ;;  %v9166_v32 = vld [vmem:[#allocation15_spill] sm:$0xff] }
 0x122   :  { %v837_v56 = vsub.f32 1.0, %v836_v59  ;;  %v881_v6 = vrot.slane %v833_v31, 2  ;;  %v908_v4 = vrot.slane %v5421_v43, 1  ;;  %v877_v47 = vsel %vm9089_vm14, %v875_v20, %v874_v50  ;;  %v9161_v31 = vld [vmem:[#allocation16_spill] sm:$0xff]  ;;  %v9164_v43 = vld [vmem:[#allocation11_spill] sm:$0xff]  ;;  %v9165_v20 = vld [vmem:[#allocation13_spill] sm:$0xff] }
 0x123   :  { %v880_v48 = vsel %vm9086_vm8, %v878_v19, %v877_v47  ;;  %v905_v33 = vsel %vm9086_vm8, %v904_v39, %v903_v53 }
 0x124   :  { %v838_v3 = vmul.f32 %v5417_v15, %v837_v56  ;;  %v883_v11 = vsel %vm9085_vm10, %v881_v6, %v880_v48  ;;  %v907_v62 = vsel %vm9085_vm10, %v906_v34, %v905_v33 }
 0x125   :  { %v909_v36 = vsel %vm9084_vm3, %v908_v4, %v907_v62 }
 0x126   :  { %v839_v26 = vadd.f32 %v5417_v15, %v838_v3  ;;  %v9162_v3 = vld [vmem:[#allocation18_spill] sm:$0xff] }
 0x128   :  { %v843_v35 = vsel %vm842_vm11, %v5417_v15, %v839_v26  ;;  %v482_v15 = vld [vmem:[%s9056_s5] sm:$0xff]  ;;  %s5851_s5 = smov 64  }
 0x129   :  { %v848_v60 = vsel %vm845_vm13, %v847_v13, %v843_v35 }
 0x12a   :  { %v884_v27 = vrot.slane %v848_v60, 1 }
 0x12c   :  { %v886_v16 = vsel %vm9084_vm3, %v884_v27, %v883_v11 }
 0x12d   :  { %v911_v55 = vsel %vm9081_vm4, %v886_v16, %v909_v36 }
 0x12e   :  { %918 = vrot.lane.b32.xlu0 %v911_v55, %s5850_s3 }
 0x136   :  { %913 = vrot.lane.b32.xlu0 %v482_v15, %s5850_s3 }
 0x1a0   :  { %v919_v38 = vpop.permute.xlu0 %918 }
 0x1a1   :  { %v921_v23 = vmul.f32 %v919_v38, %v911_v55 }
 0x1a3   :  { %923 = vrot.lane.b32.xlu1 %v921_v23, %s5850_s3 }
 0x1a8   :  { %v914_v0 = vpop.permute.xlu0 %913 }
 0x1a9   :  { %v916_v14 = vmul.f32 %v914_v0, %v911_v55 }
 0x215   :  { %v924_v22 = vpop.permute.xlu1 %923 }
 0x216   :  { %v6493_v18 = vadd.f32 %v924_v22, %v916_v14 }
 0x218   :  { %5422 = vtanh.f32 %v6493_v18 }
 0x21e   :  { %v5423_v1 = vpop.eup %5422 }
 0x21f   :  { %929 = vrot.lane.b32.xlu1 %v5423_v1, %s5850_s3 }
 0x291   :  { %v930_v59 = vpop.permute.xlu1 %929 }
 0x292   :  { %v6497_v57 = vmul.f32 %v930_v59, %v911_v55 }
 0x294   :  { %9157 = vst [vmem:[#allocation26_spill] sm:$0xff] %v6497_v57  ;;  %982 = vrot.lane.b32.xlu2 %v6497_v57, %s5851_s5 }
 0x2ee   :  { %v983_v17 = vpop.permute.xlu2 %982 }
 0x2ef   :  { %v984_v42 = vsel %vm9080_vm0, %v983_v17, 0 }
 0x2f0   :  { %v1006_v9 = vand.u32 4294901760, %v984_v42 }
 0x2f2   :  { %v1007_v41 = vsub.f32 %v984_v42, %v1006_v9  ;;  %1052 = vmatmul.f32.vlgmr.msra.gmra.mxu3 %v1006_v9 }
 0x2f3   :  { %1159 = vmatpush.msra.mxu3 %v5971_v40 }
 0x2f4   :  { %v1008_v25 = vand.u32 4294901760, %v1007_v41 }
 0x2f5   :  { %1161 = vmatpush.msra.mxu3 %v6009_v61 }
 0x2f6   :  { %v1009_v56 = vsub.f32 %v1007_v41, %v1008_v25 }
 0x2f7   :  { %1163 = vmatpush.msra.mxu3 %v6031_v8 }
 0x2f8   :  { %v1010_v30 = vand.u32 4294901760, %v1009_v56 }
 0x2f9   :  { %1165 = vmatpush.msra.mxu3 %v6041_v12 }
 0x2fa   :  { %1011 = vmatmul.f32.vlgmr.msra.gmra.mxu2 %v1010_v30  ;;  %1109 = vmatmul.f32.vlgmr.msrb.gmra.mxu3 %v1008_v25 }
 0x2fb   :  { %1128 = vmatpush.msra.mxu2 %v5980_v46  ;;  %1517 = vmatpush.msrb.mxu3 %v5991_v52 }
 0x2fd   :  { %1132 = vmatpush.msra.mxu2 %v6020_v2  ;;  %1523 = vmatpush.msrb.mxu3 %v9158_v24 }
 0x2ff   :  { %1136 = vmatpush.msra.mxu2 %v9159_v28  ;;  %1529 = vmatpush.msrb.mxu3 %v9160_v37 }
 0x301   :  { %1140 = vmatpush.msra.mxu2 %v9161_v31  ;;  %1535 = vmatpush.msrb.mxu3 %v9162_v3 }
 0x302   :  { %1082 = vmatmul.f32.vlgmr.msrb.gmra.mxu2 %v1007_v41  ;;  %1167 = vmatmul.f32.vlgmr.msra.gmra.mxu3 %v1006_v9 }
 0x303   :  { %1484 = vmatpush.msrb.mxu2 %v5971_v40  ;;  %1584 = vmatpush.msra.mxu3 %v5971_v40 }
 0x305   :  { %1486 = vmatpush.msrb.mxu2 %v6009_v61  ;;  %1586 = vmatpush.msra.mxu3 %v6009_v61 }
 0x307   :  { %1488 = vmatpush.msrb.mxu2 %v6031_v8  ;;  %1588 = vmatpush.msra.mxu3 %v6031_v8 }
 0x309   :  { %1490 = vmatpush.msrb.mxu2 %v6041_v12  ;;  %1590 = vmatpush.msra.mxu3 %v6041_v12 }
 0x30a   :  { %1142 = vmatmul.f32.vlgmr.msra.gmra.mxu2 %v1006_v9 }
 0x30b   :  { %1555 = vmatpush.msra.mxu2 %v9163_v10 }
 0x30d   :  { %1558 = vmatpush.msra.mxu2 %v9164_v43 }
 0x30f   :  { %1561 = vmatpush.msra.mxu2 %v9165_v20 }
 0x311   :  { %1564 = vmatpush.msra.mxu2 %v9166_v32 }
 0x375   :  { %v1053_v7 = vpop.f32.mrf.mxu3 }
 0x37d   :  { %v1012_v26 = vpop.f32.mrf.mxu2  ;;  %v1110_v19 = vpop.f32.mrf.mxu3 }
 0x37e   :  { %v1054_v13 = vadd.f32 %v1053_v7, %v1012_v26 }
 0x385   :  { %v1083_v39 = vpop.f32.mrf.mxu2  ;;  %v1168_v50 = vpop.f32.mrf.mxu3 }
 0x386   :  { %v1084_v5 = vadd.f32 %v1083_v39, %v1054_v13 }
 0x388   :  { %v1111_v6 = vadd.f32 %v1110_v19, %v1084_v5 }
 0x38d   :  { %v1143_v34 = vpop.f32.mrf.mxu2 }
 0x38e   :  { %v1144_v35 = vadd.f32 %v1143_v34, %v1111_v6 }
 0x390   :  { %v1169_v4 = vadd.f32 %v1168_v50, %v1144_v35 }
 0x392   :  { %v1188_v60 = vadd.f32 %v1169_v4, %v6191_v44  ;;  %v1172_v47 = vrot.slane %v1169_v4, 7  ;;  %v1173_v53 = vrot.slane %v1169_v4, 1  ;;  %v1174_v48 = vrot.slane %v1169_v4, 2 }
 0x393   :  { %v1175_v27 = vrot.slane %v1169_v4, 3  ;;  %v1176_v33 = vrot.slane %v1169_v4, 4  ;;  %v1177_v11 = vrot.slane %v1169_v4, 5  ;;  %v1178_v62 = vrot.slane %v1169_v4, 6 }
 0x394   :  { %v5310_v16 = vmul.f32 -1.442695, %v1188_v60  ;;  %v1187_v36 = vadd.f32 %v1172_v47, %v6187_v45  ;;  %v6529_v55 = vadd.f32 %v1173_v53, %v6193_v29  ;;  %v6532_v15 = vadd.f32 %v1174_v48, %v6205_v63 }
 0x395   :  { %v6535_v38 = vadd.f32 %v1175_v27, %v6219_v51  ;;  %v6538_v23 = vadd.f32 %v1176_v33, %v6234_v21  ;;  %v6541_v0 = vadd.f32 %v1177_v11, %v6252_v49  ;;  %v6547_v17 = vadd.f32 %v1178_v62, %v6283_v54 }
 0x396   :  { %5424 = vpow2.f32 %v5310_v16  ;;  %v5309_v14 = vmul.f32 -1.442695, %v1187_v36  ;;  %v5311_v22 = vmul.f32 -1.442695, %v6529_v55  ;;  %v5312_v1 = vmul.f32 -1.442695, %v6532_v15 }
 0x397   :  { %v5313_v59 = vmul.f32 -1.442695, %v6535_v38  ;;  %v5314_v42 = vmul.f32 -1.442695, %v6538_v23  ;;  %v5315_v9 = vmul.f32 -1.442695, %v6541_v0 }
 0x398   :  { %5426 = vpow2.f32 %v5309_v14  ;;  %v5316_v25 = vmul.f32 -1.442695, %v6547_v17 }
 0x399   :  { %5428 = vpow2.f32 %v5311_v22 }
 0x39a   :  { %5430 = vpow2.f32 %v5312_v1 }
 0x39b   :  { %5432 = vpow2.f32 %v5313_v59 }
 0x39c   :  { %v5425_v41 = vpop.eup %5424  ;;  %5434 = vpow2.f32 %v5314_v42 }
 0x39d   :  { %v6552_v56 = vadd.f32 1.0, %v5425_v41  ;;  %5436 = vpow2.f32 %v5315_v9 }
 0x39e   :  { %v5427_v30 = vpop.eup %5426 }
 0x39f   :  { %v5429_v7 = vpop.eup %5428  ;;  %v6554_v26 = vadd.f32 1.0, %v5427_v30  ;;  %5438 = vrcp.f32 %v6552_v56  ;;  %v1253_v35 = vand.u32 2147483648, %v6552_v56  ;;  %v1251_v11 = vand.u32 2147483647, %v6552_v56 }
 0x3a0   :  { %v5431_v19 = vpop.eup %5430  ;;  %5440 = vpow2.f32 %v5316_v25  ;;  %v6557_v39 = vadd.f32 1.0, %v5429_v7  ;;  %vm1247_vm7 = vweird.f32 %v6552_v56 }
 0x3a1   :  { %v5433_v13 = vpop.eup %5432  ;;  %v6559_v5 = vadd.f32 1.0, %v5431_v19  ;;  %5442 = vrcp.f32 %v6554_v26  ;;  %v1238_v4 = vand.u32 2147483648, %v6554_v26  ;;  %v1236_v48 = vand.u32 2147483647, %v6554_v26 }
 0x3a2   :  { %v5435_v6 = vpop.eup %5434  ;;  %v6562_v34 = vadd.f32 1.0, %v5433_v13  ;;  %5444 = vrcp.f32 %v6557_v39  ;;  %vm1232_vm6 = vweird.f32 %v6554_v26  ;;  %v6580_v16 = vor.u32 1.1754944e-38, %v1253_v35 }
 0x3a3   :  { %v5437_v50 = vpop.eup %5436  ;;  %5446 = vtanh.f32 %v1187_v36  ;;  %v6569_v53 = vadd.f32 1.0, %v5435_v6  ;;  %v1266_v36 = vand.u32 2147483647, %v6557_v39  ;;  %v1268_v14 = vand.u32 2147483648, %v6557_v39 }
 0x3a4   :  { %5448 = vrcp.f32 %v6559_v5  ;;  %v6585_v22 = vadd.f32 1.0, %v5437_v50  ;;  %v1239_v59 = vor.u32 1.1754944e-38, %v1238_v4  ;;  %vm1262_vm15 = vweird.f32 %v6557_v39 }
 0x3a5   :  { %v6567_v47 = vpop.eup %5438  ;;  %5450 = vtanh.f32 %v1188_v60  ;;  %vm6594_vm12 = vcmp.eq.f32.partialorder %v1236_v48, 8.507059e+37  ;;  %v1281_v25 = vand.u32 2147483647, %v6559_v5  ;;  %v1283_v30 = vand.u32 2147483648, %v6559_v5 }
 0x3a6   :  { %v5441_v27 = vpop.eup %5440  ;;  %v1243_v33 = vmul.f32 %v6567_v47, %v6552_v56  ;;  %5452 = vrcp.f32 %v6562_v34  ;;  %vm1248_vm9 = vweird.f32 %v6567_v47  ;;  %vm1277_vm11 = vweird.f32 %v6559_v5 }
 0x3a7   :  { %v6577_v62 = vpop.eup %5442  ;;  %v6592_v9 = vadd.f32 1.0, %v5441_v27  ;;  %5454 = vrcp.f32 %v6569_v53  ;;  %vm6609_vm0 = vcmp.eq.f32.partialorder %v1266_v36, 8.507059e+37  ;;  %v1269_v4 = vor.u32 1.1754944e-38, %v1268_v14  ;;  %vm6655_vm1 = vmor %vm1247_vm7, %vm1248_vm9 }
 0x3a8   :  { %v1228_v1 = vmul.f32 %v6577_v62, %v6554_v26  ;;  %v1244_v42 = vsub.f32 1.0, %v1243_v33  ;;  %v6590_v60 = vpop.eup %5444  ;;  %vm1233_vm13 = vweird.f32 %v6577_v62  ;;  %v1298_v48 = vand.u32 2147483648, %v6562_v34 }
 0x3a9   :  { %v6601_v7 = vpop.eup %5446  ;;  %v1258_v6 = vmul.f32 %v6590_v60, %v6557_v39  ;;  %v1313_v27 = vand.u32 2147483648, %v6569_v53  ;;  %vm6618_vm4 = vcmp.eq.f32.partialorder %v1251_v11, 8.507059e+37  ;;  %v1296_v36 = vand.u32 2147483647, %v6562_v34  ;;  %vm6642_vm5 = vmor %vm1232_vm6, %vm1233_vm13 }
 0x3aa   :  { %v1229_v19 = vsub.f32 1.0, %v1228_v1  ;;  %v1245_v13 = vmul.f32 %v6567_v47, %v1244_v42  ;;  %v5449_v35 = vpop.eup %5448  ;;  %vm6627_vm3 = vcmp.eq.f32.partialorder %v1281_v25, 8.507059e+37  ;;  %v1284_v10 = vor.u32 1.1754944e-38, %v1283_v30 }
 0x3ab   :  { %v6615_v33 = vpop.eup %5450  ;;  %v1259_v57 = vsub.f32 1.0, %v1258_v6  ;;  %v1273_v32 = vmul.f32 %v5449_v35, %v6559_v5  ;;  %vm1292_vm10 = vweird.f32 %v6562_v34  ;;  %v1311_v11 = vand.u32 2147483647, %v6569_v53 }
 0x3ac   :  { %v1230_v1 = vmul.f32 %v6577_v62, %v1229_v19  ;;  %v6624_v20 = vpop.eup %5452  ;;  %v1246_v14 = vadd.f32 %v6567_v47, %v1245_v13  ;;  %5456 = vrcp.f32 %v6585_v22  ;;  %vm1263_vm8 = vweird.f32 %v6590_v60 }
 0x3ad   :  { %v1260_v6 = vmul.f32 %v6590_v60, %v1259_v57  ;;  %v1274_v54 = vsub.f32 1.0, %v1273_v32  ;;  %vm1307_vm14 = vweird.f32 %v6569_v53  ;;  %v5455_v25 = vpop.eup %5454  ;;  %vm1278_vm2 = vweird.f32 %v5449_v35 }
 0x3ae   :  { %v1231_v19 = vadd.f32 %v6577_v62, %v1230_v1  ;;  %v1288_v13 = vmul.f32 %v6624_v20, %v6562_v34  ;;  %v1299_v1 = vor.u32 1.1754944e-38, %v1298_v48  ;;  %v1314_v57 = vor.u32 1.1754944e-38, %v1313_v27 }
 0x3af   :  { %v1261_v49 = vadd.f32 %v6590_v60, %v1260_v6  ;;  %v1275_v21 = vmul.f32 %v5449_v35, %v1274_v54  ;;  %vm6660_vm6 = vcmp.eq.f32.partialorder %v1296_v36, 8.507059e+37  ;;  %v1303_v48 = vmul.f32 %v5455_v25, %v6569_v53 }
 0x3b0   :  { %v1235_v32 = vsel %vm6642_vm5, %v6577_v62, %v1231_v19  ;;  %v1250_v62 = vsel %vm6655_vm1, %v6567_v47, %v1246_v14  ;;  %vm6672_vm5 = vmor %vm1262_vm15, %vm1263_vm8  ;;  %v1289_v27 = vsub.f32 1.0, %v1288_v13  ;;  %vm1293_vm7 = vweird.f32 %v6624_v20 }
 0x3b1   :  { %vm6677_vm9 = vcmp.eq.f32.partialorder %v1311_v11, 8.507059e+37  ;;  %v1326_v36 = vand.u32 2147483647, %v6585_v22  ;;  %v1240_v47 = vsel %vm6594_vm12, %v1239_v59, %v1235_v32  ;;  %v1265_v39 = vsel %vm6672_vm5, %v6590_v60, %v1261_v49  ;;  %vm1279_vm1 = vmor %vm1277_vm11, %vm1278_vm2 }
 0x3b2   :  { %v1276_v14 = vadd.f32 %v5449_v35, %v1275_v21  ;;  %v1304_v19 = vsub.f32 1.0, %v1303_v48  ;;  %v5457_v6 = vpop.eup %5456  ;;  %v1290_v11 = vmul.f32 %v6624_v20, %v1289_v27  ;;  %vm1308_vm8 = vweird.f32 %v5455_v25 }
 0x3b3   :  { %v1328_v30 = vand.u32 2147483648, %v6585_v22  ;;  %5458 = vrcp.f32 %v6592_v9  ;;  %v1270_v59 = vsel %vm6609_vm0, %v1269_v4, %v1265_v39  ;;  %v1318_v21 = vmul.f32 %v5457_v6, %v6585_v22  ;;  %vm1294_vm0 = vmor %vm1292_vm10, %vm1293_vm7 }
 0x3b4   :  { %v1280_v41 = vsel %vm1279_vm1, %v5449_v35, %v1276_v14  ;;  %v1305_v13 = vmul.f32 %v5455_v25, %v1304_v19  ;;  %v1255_v49 = vsel %vm6618_vm4, %v6580_v16, %v1250_v62  ;;  %v1291_v5 = vadd.f32 %v6624_v20, %v1290_v11  ;;  %vm1309_vm4 = vmor %vm1307_vm14, %vm1308_vm8 }
 0x3b5   :  { %vm1322_vm2 = vweird.f32 %v6585_v22  ;;  %vm6701_vm15 = vcmp.eq.f32.partialorder %v1326_v36, 8.507059e+37  ;;  %v1285_v50 = vsel %vm6627_vm3, %v1284_v10, %v1280_v41  ;;  %v1319_v4 = vsub.f32 1.0, %v1318_v21 }
 0x3b6   :  { %v1306_v35 = vadd.f32 %v5455_v25, %v1305_v13  ;;  %vm1323_vm12 = vweird.f32 %v5457_v6  ;;  %v1295_v16 = vsel %vm1294_vm0, %v6624_v20, %v1291_v5  ;;  %5460 = vtanh.f32 %v6529_v55 }
 0x3b7   :  { %v1363_v42 = vrot.slane %v1240_v47, 1  ;;  %v1365_v32 = vrot.slane %v1270_v59, 7  ;;  %v1320_v10 = vmul.f32 %v5457_v6, %v1319_v4  ;;  %v1329_v26 = vor.u32 1.1754944e-38, %v1328_v30  ;;  %vm1324_vm14 = vmor %vm1322_vm2, %vm1323_vm12 }
 0x3b8   :  { %v1310_v43 = vsel %vm1309_vm4, %v5455_v25, %v1306_v35  ;;  %v1341_v48 = vand.u32 2147483647, %v6592_v9  ;;  %v1300_v62 = vsel %vm6660_vm6, %v1299_v1, %v1295_v16  ;;  %v1343_v56 = vand.u32 2147483648, %v6592_v9 }
 0x3b9   :  { %v5459_v34 = vpop.eup %5458  ;;  %5462 = vtanh.f32 %v6532_v15  ;;  %vm9187_vm10 = vcmask 1041409   ;;  %v1315_v55 = vsel %vm6677_vm9, %v1314_v57, %v1310_v43  ;;  %v1321_v53 = vadd.f32 %v5457_v6, %v1320_v10 }
 0x3ba   :  { %v1364_v20 = vsel %vm9187_vm10, %v1255_v49, %v1363_v42  ;;  %v1333_v25 = vmul.f32 %v5459_v34, %v6592_v9  ;;  %5464 = vtanh.f32 %v6535_v38  ;;  %vm1338_vm3 = vweird.f32 %v5459_v34  ;;  %vm9191_vm7 = vmmov %vm9187_vm10 }
 0x3bb   :  { %5466 = vtanh.f32 %v6538_v23  ;;  %vm9188_vm11 = vcmask 1042434   ;;  %v1367_v15 = vrot.slane %v1285_v50, 6  ;;  %v1325_v1 = vsel %vm1324_vm14, %v5457_v6, %v1321_v53 }
 0x3bc   :  { %v1366_v51 = vsel %vm9188_vm11, %v1365_v32, %v1364_v20  ;;  %v1334_v27 = vsub.f32 1.0, %v1333_v25  ;;  %5468 = vtanh.f32 %v6541_v0  ;;  %v1369_v57 = vrot.slane %v1300_v62, 5  ;;  %v5461_v54 = vpop.eup %5460  ;;  %vm9193_vm1 = vmmov %vm9188_vm11 }
 0x3bd   :  { %5470 = vtanh.f32 %v6547_v17  ;;  %vm9189_vm13 = vcmask 1043459   ;;  %v1371_v36 = vrot.slane %v1315_v55, 4  ;;  %v1386_v22 = vrot.slane %v6601_v7, 1 }
 0x3be   :  { %v1368_v38 = vsel %vm9189_vm13, %v1367_v15, %v1366_v51  ;;  %v1330_v47 = vsel %vm6701_vm15, %v1329_v26, %v1325_v1  ;;  %v1335_v23 = vmul.f32 %v5459_v34, %v1334_v27  ;;  %vm9190_vm6 = vcmask 1044484   ;;  %vm9194_vm15 = vmmov %vm9189_vm13 }
 0x3bf   :  { %v1370_v39 = vsel %vm9190_vm6, %v1369_v57, %v1368_v38  ;;  %v1388_v14 = vrot.slane %v5461_v54, 7  ;;  %v5463_v19 = vpop.eup %5462  ;;  %vm1337_vm5 = vweird.f32 %v6592_v9  ;;  %v1387_v0 = vsel %vm9191_vm7, %v6615_v33, %v1386_v22  ;;  %vm9196_vm12 = vmmov %vm9190_vm6 }
 0x3c0   :  { %v5465_v6 = vpop.eup %5464  ;;  %v1336_v17 = vadd.f32 %v5459_v34, %v1335_v23  ;;  %vm9192_vm9 = vcmask 1045509   ;;  %v1390_v7 = vrot.slane %v5463_v19, 6  ;;  %vm1339_vm8 = vmor %vm1337_vm5, %vm1338_vm3  ;;  %v1344_v41 = vor.u32 1.1754944e-38, %v1343_v56 }
 0x3c1   :  { %v1372_v11 = vsel %vm9192_vm9, %v1371_v36, %v1370_v39  ;;  %v1389_v30 = vsel %vm9193_vm1, %v1388_v14, %v1387_v0  ;;  %v5467_v59 = vpop.eup %5466  ;;  %v1373_v13 = vrot.slane %v1330_v47, 3  ;;  %v1392_v21 = vrot.slane %v5465_v6, 5  ;;  %vm9197_vm4 = vmmov %vm9192_vm9 }
 0x3c2   :  { %v5469_v49 = vpop.eup %5468  ;;  %v1340_v5 = vsel %vm1339_vm8, %v5459_v34, %v1336_v17  ;;  %vm1342_vm2 = vcmp.eq.f32.partialorder %v1341_v48, 8.507059e+37  ;;  %v1391_v9 = vsel %vm9194_vm15, %v1390_v7, %v1389_v30  ;;  %v1394_v60 = vrot.slane %v5467_v59, 4 }
 0x3c3   :  { %v5471_v33 = vpop.eup %5470  ;;  %v1345_v50 = vsel %vm1342_vm2, %v1344_v41, %v1340_v5  ;;  %vm9195_vm0 = vcmask 1046534   ;;  %v1393_v4 = vsel %vm9196_vm12, %v1392_v21, %v1391_v9  ;;  %v1396_v16 = vrot.slane %v5469_v49, 3 }
 0x3c4   :  { %v1374_v35 = vsel %vm9195_vm0, %v1373_v13, %v1372_v11  ;;  %v1375_v42 = vrot.slane %v1345_v50, 2  ;;  %v1395_v32 = vsel %vm9197_vm4, %v1394_v60, %v1393_v4  ;;  %v1398_v43 = vrot.slane %v5471_v33, 2  ;;  %vm9198_vm10 = vmmov %vm9195_vm0 }
 0x3c5   :  { %v1397_v10 = vsel %vm9198_vm10, %v1396_v16, %v1395_v32  ;;  %vm9199_vm14 = vcmask 1047559   ;;  %vm9201_vm11 = vcmp.lt.s32.totalorder %v6287_v58, 96  ;;  %vm9203_vm13 = vcmask 261120   ;;  %v9205_v16 = vld [vmem:[#allocation23_spill] sm:$0xff] }
 0x3c6   :  { %v1376_v26 = vsel %vm9199_vm14, %v1375_v42, %v1374_v35  ;;  %vm9200_vm3 = vmmov %vm9199_vm14  ;;  %v9204_v35 = vld [vmem:[#allocation22_spill] sm:$0xff] }
 0x3c7   :  { %v1399_v48 = vsel %vm9200_vm3, %v1398_v43, %v1397_v10  ;;  %v9206_v43 = vld [vmem:[#allocation24_spill] sm:$0xff] }
 0x3c8   :  { %v1401_v34 = vsel %vm9201_vm11, %v1376_v26, %v1399_v48 }
 0x3c9   :  { %1404 = vrot.lane.b32.xlu2 %v1401_v34, %s5850_s3  ;;  %v1402_v20 = vmul.f32 %v1401_v34, %v6493_v18 }
 0x423   :  { %v1405_v62 = vpop.permute.xlu2 %1404 }
 0x424   :  { %v1407_v56 = vmul.f32 %v1405_v62, %v1401_v34  ;;  %v9207_v62 = vld [vmem:[#allocation25_spill] sm:$0xff] }
 0x426   :  { %1409 = vrot.lane.b32.xlu0 %v1407_v56, %s5850_s3 }
 0x498   :  { %v1410_v55 = vpop.permute.xlu0 %1409 }
 0x499   :  { %v6756_v53 = vadd.f32 %v1410_v55, %v1402_v20 }
 0x49b   :  { %5472 = vtanh.f32 %v6756_v53 }
 0x4a1   :  { %v5473_v25 = vpop.eup %5472 }
 0x4a2   :  { %1415 = vrot.lane.b32.xlu1 %v5473_v25, %s5850_s3 }
 0x514   :  { %v1416_v51 = vpop.permute.xlu1 %1415 }
 0x515   :  { %v6760_v15 = vmul.f32 %v1416_v51, %v1401_v34 }
 0x517   :  { %9202 = vst [vmem:[#allocation12_spill] sm:$0xff] %v6760_v15  ;;  %1467 = vrot.lane.b32.xlu2 %v6760_v15, %s5851_s5 }
 0x571   :  { %v1468_v1 = vpop.permute.xlu2 %1467 }
 0x572   :  { %v1469_v27 = vsel %vm9203_vm13, %v1468_v1, 0 }
 0x573   :  { %v1491_v57 = vand.u32 4294901760, %v1469_v27 }
 0x575   :  { %v1492_v54 = vsub.f32 %v1469_v27, %v1491_v57  ;;  %1537 = vmatmul.f32.vlgmr.msrb.gmra.mxu3 %v1491_v57  ;;  %1627 = vmatmul.f32.vlgmr.msra.gmra.mxu0 %v1491_v57 }
 0x576   :  { %1652 = vmatmul.f32.vlgmr.msra.gmra.mxu1 %v1491_v57  ;;  %2002 = vmatpush.msrb.mxu3 %v5991_v52 }
 0x577   :  { %v1493_v18 = vand.u32 4294901760, %v1492_v54  ;;  %2487 = vmatpush.msra.mxu1 %v5991_v52  ;;  %2454 = vmatpush.msra.mxu0 %v5971_v40 }
 0x578   :  { %2008 = vmatpush.msrb.mxu3 %v9158_v24 }
 0x579   :  { %v1494_v38 = vsub.f32 %v1492_v54, %v1493_v18  ;;  %2493 = vmatpush.msra.mxu1 %v9158_v24  ;;  %2456 = vmatpush.msra.mxu0 %v6009_v61 }
 0x57a   :  { %2014 = vmatpush.msrb.mxu3 %v9160_v37 }
 0x57b   :  { %v1495_v36 = vand.u32 4294901760, %v1494_v38  ;;  %2499 = vmatpush.msra.mxu1 %v9160_v37  ;;  %2458 = vmatpush.msra.mxu0 %v6031_v8 }
 0x57c   :  { %2020 = vmatpush.msrb.mxu3 %v9162_v3 }
 0x57d   :  { %1496 = vmatmul.f32.vlgmr.msrb.gmra.mxu2 %v1495_v36  ;;  %1594 = vmatmul.f32.vlgmr.msra.gmra.mxu3 %v1493_v18 }
 0x57e   :  { %1969 = vmatpush.msrb.mxu2 %v5971_v40  ;;  %2129 = vmatpush.msra.mxu3 %v5971_v40 }
 0x57f   :  { %2505 = vmatpush.msra.mxu1 %v9162_v3  ;;  %2460 = vmatpush.msra.mxu0 %v6041_v12 }
 0x580   :  { %1971 = vmatpush.msrb.mxu2 %v6009_v61  ;;  %2131 = vmatpush.msra.mxu3 %v6009_v61 }
 0x582   :  { %1973 = vmatpush.msrb.mxu2 %v6031_v8  ;;  %2133 = vmatpush.msra.mxu3 %v6031_v8 }
 0x584   :  { %1975 = vmatpush.msrb.mxu2 %v6041_v12  ;;  %2135 = vmatpush.msra.mxu3 %v6041_v12 }
 0x585   :  { %1567 = vmatmul.f32.vlgmr.msra.gmra.mxu2 %v1492_v54 }
 0x586   :  { %2098 = vmatpush.msra.mxu2 %v5980_v46 }
 0x588   :  { %2102 = vmatpush.msra.mxu2 %v6020_v2 }
 0x58a   :  { %2106 = vmatpush.msra.mxu2 %v9159_v28 }
 0x58c   :  { %2110 = vmatpush.msra.mxu2 %v9161_v31 }
 0x5f2   :  { %v1628_v6 = vpop.f32.mrf.mxu0 }
 0x5f3   :  { %v1653_v11 = vpop.f32.mrf.mxu1 }
 0x5f8   :  { %v1538_v22 = vpop.f32.mrf.mxu3 }
 0x600   :  { %v1497_v47 = vpop.f32.mrf.mxu2  ;;  %v1595_v19 = vpop.f32.mrf.mxu3 }
 0x601   :  { %v1539_v23 = vadd.f32 %v1538_v22, %v1497_v47 }
 0x608   :  { %v1568_v39 = vpop.f32.mrf.mxu2 }
 0x609   :  { %v1569_v14 = vadd.f32 %v1568_v39, %v1539_v23 }
 0x60b   :  { %v1596_v0 = vadd.f32 %v1595_v19, %v1569_v14 }
 0x60d   :  { %v1629_v17 = vadd.f32 %v1628_v6, %v1596_v0 }
 0x60f   :  { %v1654_v30 = vadd.f32 %v1653_v11, %v1629_v17 }
 0x611   :  { %v1657_v7 = vrot.slane %v1654_v30, 6  ;;  %v1658_v59 = vrot.slane %v1654_v30, 7  ;;  %v1659_v41 = vrot.slane %v1654_v30, 1  ;;  %v1660_v13 = vrot.slane %v1654_v30, 2 }
 0x612   :  { %v1661_v21 = vrot.slane %v1654_v30, 3  ;;  %v1662_v49 = vrot.slane %v1654_v30, 4  ;;  %v1663_v5 = vrot.slane %v1654_v30, 5  ;;  %v6790_v9 = vadd.f32 %v1654_v30, %v6193_v29 }
 0x613   :  { %v1672_v60 = vadd.f32 %v1657_v7, %v6187_v45  ;;  %v1673_v33 = vadd.f32 %v1658_v59, %v6191_v44  ;;  %v6795_v50 = vadd.f32 %v1659_v41, %v6205_v63  ;;  %v6798_v4 = vadd.f32 %v1660_v13, %v9204_v35 }
 0x614   :  { %v6801_v42 = vadd.f32 %v1661_v21, %v9205_v16  ;;  %v5319_v32 = vmul.f32 -1.442695, %v6790_v9  ;;  %v6805_v10 = vadd.f32 %v1662_v49, %v9206_v43  ;;  %v6809_v56 = vadd.f32 %v1663_v5, %v9207_v62 }
 0x615   :  { %v5317_v26 = vmul.f32 -1.442695, %v1672_v60  ;;  %v5318_v48 = vmul.f32 -1.442695, %v1673_v33  ;;  %v5320_v34 = vmul.f32 -1.442695, %v6795_v50 }
 0x616   :  { %5474 = vpow2.f32 %v5319_v32  ;;  %v5321_v20 = vmul.f32 -1.442695, %v6798_v4  ;;  %v5322_v55 = vmul.f32 -1.442695, %v6801_v42  ;;  %v5323_v25 = vmul.f32 -1.442695, %v6805_v10 }
 0x617   :  { %5476 = vpow2.f32 %v5317_v26  ;;  %v5324_v51 = vmul.f32 -1.442695, %v6809_v56 }
 0x618   :  { %5478 = vpow2.f32 %v5318_v48 }
 0x619   :  { %5480 = vpow2.f32 %v5320_v34 }
 0x61a   :  { %5482 = vpow2.f32 %v5321_v20 }
 0x61b   :  { %5484 = vpow2.f32 %v5322_v55 }
 0x61c   :  { %v5475_v1 = vpop.eup %5474  ;;  %5486 = vpow2.f32 %v5323_v25 }
 0x61d   :  { %v5477_v27 = vpop.eup %5476  ;;  %v6815_v57 = vadd.f32 1.0, %v5475_v1  ;;  %5488 = vpow2.f32 %v5324_v51 }
 0x61e   :  { %v5479_v54 = vpop.eup %5478  ;;  %v6817_v18 = vadd.f32 1.0, %v5477_v27 }
 0x61f   :  { %v5481_v38 = vpop.eup %5480  ;;  %v6819_v36 = vadd.f32 1.0, %v5479_v54  ;;  %5490 = vrcp.f32 %v6815_v57  ;;  %v1751_v17 = vand.u32 2147483647, %v6815_v57  ;;  %v1753_v11 = vand.u32 2147483648, %v6815_v57 }
 0x620   :  { %v5483_v22 = vpop.eup %5482  ;;  %v6822_v47 = vadd.f32 1.0, %v5481_v38  ;;  %5492 = vrcp.f32 %v6817_v18  ;;  %v1723_v14 = vand.u32 2147483648, %v6817_v18  ;;  %v1721_v59 = vand.u32 2147483647, %v6817_v18 }
 0x621   :  { %5494 = vrcp.f32 %v6819_v36  ;;  %v5485_v23 = vpop.eup %5484  ;;  %v6826_v39 = vadd.f32 1.0, %v5483_v22  ;;  %v1738_v0 = vand.u32 2147483648, %v6819_v36  ;;  %v1736_v41 = vand.u32 2147483647, %v6819_v36 }
 0x622   :  { %5496 = vtanh.f32 %v1672_v60  ;;  %v5487_v19 = vpop.eup %5486  ;;  %v6835_v7 = vadd.f32 1.0, %v5485_v23  ;;  %vm1747_vm6 = vweird.f32 %v6815_v57  ;;  %vm1717_vm5 = vweird.f32 %v6817_v18 }
 0x623   :  { %5498 = vtanh.f32 %v1673_v33  ;;  %v5489_v6 = vpop.eup %5488  ;;  %v6842_v21 = vadd.f32 1.0, %v5487_v19  ;;  %v6845_v49 = vor.u32 1.1754944e-38, %v1723_v14  ;;  %vm1732_vm7 = vweird.f32 %v6819_v36 }
 0x624   :  { %5500 = vrcp.f32 %v6822_v47  ;;  %v6852_v33 = vadd.f32 1.0, %v5489_v6  ;;  %v6857_v26 = vor.u32 1.1754944e-38, %v1738_v0  ;;  %v1768_v48 = vand.u32 2147483648, %v6822_v47 }
 0x625   :  { %v6833_v30 = vpop.eup %5490  ;;  %5502 = vrcp.f32 %v6826_v39  ;;  %vm6864_vm9 = vcmp.eq.f32.partialorder %v1751_v17, 8.507059e+37  ;;  %v1754_v51 = vor.u32 1.1754944e-38, %v1753_v11  ;;  %v1766_v1 = vand.u32 2147483647, %v6822_v47 }
 0x626   :  { %v6840_v13 = vpop.eup %5492  ;;  %v1743_v5 = vmul.f32 %v6833_v30, %v6815_v57  ;;  %vm1748_vm1 = vweird.f32 %v6833_v30  ;;  %vm1762_vm8 = vweird.f32 %v6822_v47  ;;  %5504 = vrcp.f32 %v6835_v7 }
 0x627   :  { %v6850_v60 = vpop.eup %5494  ;;  %v1713_v32 = vmul.f32 %v6840_v13, %v6817_v18  ;;  %vm1718_vm2 = vweird.f32 %v6840_v13  ;;  %vm6875_vm15 = vcmp.eq.f32.partialorder %v1721_v59, 8.507059e+37  ;;  %v1781_v19 = vand.u32 2147483647, %v6826_v39  ;;  %vm6903_vm14 = vmor %vm1747_vm6, %vm1748_vm1 }
 0x628   :  { %v6860_v34 = vpop.eup %5496  ;;  %v1728_v20 = vmul.f32 %v6850_v60, %v6819_v36  ;;  %v1744_v55 = vsub.f32 1.0, %v1743_v5  ;;  %vm6882_vm0 = vcmp.eq.f32.partialorder %v1736_v41, 8.507059e+37  ;;  %v1769_v11 = vor.u32 1.1754944e-38, %v1768_v48  ;;  %vm6922_vm13 = vmor %vm1717_vm5, %vm1718_vm2 }
 0x629   :  { %v6869_v27 = vpop.eup %5498  ;;  %v1714_v54 = vsub.f32 1.0, %v1713_v32  ;;  %vm1777_vm12 = vweird.f32 %v6826_v39  ;;  %v1783_v59 = vand.u32 2147483648, %v6826_v39  ;;  %vm6891_vm4 = vcmp.eq.f32.partialorder %v1766_v1, 8.507059e+37 }
 0x62a   :  { %v5501_v38 = vpop.eup %5500  ;;  %v1729_v23 = vsub.f32 1.0, %v1728_v20  ;;  %v1745_v14 = vmul.f32 %v6833_v30, %v1744_v55  ;;  %v1796_v41 = vand.u32 2147483647, %v6835_v7  ;;  %vm1733_vm10 = vweird.f32 %v6850_v60 }
 0x62b   :  { %v1715_v0 = vmul.f32 %v6840_v13, %v1714_v54  ;;  %v1758_v17 = vmul.f32 %v5501_v38, %v6822_v47  ;;  %v5503_v5 = vpop.eup %5502  ;;  %v1798_v54 = vand.u32 2147483648, %v6835_v7  ;;  %vm6912_vm3 = vcmp.eq.f32.partialorder %v1781_v19, 8.507059e+37  ;;  %vm6933_vm1 = vmor %vm1732_vm7, %vm1733_vm10 }
 0x62c   :  { %v1730_v32 = vmul.f32 %v6850_v60, %v1729_v23  ;;  %v1746_v20 = vadd.f32 %v6833_v30, %v1745_v14  ;;  %v1773_v23 = vmul.f32 %v5503_v5, %v6826_v39  ;;  %vm1792_vm11 = vweird.f32 %v6835_v7  ;;  %v5505_v57 = vpop.eup %5504 }
 0x62d   :  { %v1716_v15 = vadd.f32 %v6840_v13, %v1715_v0  ;;  %v1759_v1 = vsub.f32 1.0, %v1758_v17  ;;  %5506 = vrcp.f32 %v6842_v21  ;;  %vm1763_vm6 = vweird.f32 %v5501_v38 }
 0x62e   :  { %v1731_v14 = vadd.f32 %v6850_v60, %v1730_v32  ;;  %v1750_v62 = vsel %vm6903_vm14, %v6833_v30, %v1746_v20  ;;  %v1774_v30 = vsub.f32 1.0, %v1773_v23  ;;  %v1784_v19 = vor.u32 1.1754944e-38, %v1783_v59  ;;  %vm6949_vm7 = vmor %vm1762_vm8, %vm1763_vm6 }
 0x62f   :  { %v1760_v32 = vmul.f32 %v5501_v38, %v1759_v1  ;;  %v1720_v20 = vsel %vm6922_vm13, %v6840_v13, %v1716_v15  ;;  %vm1778_vm5 = vweird.f32 %v5503_v5  ;;  %v1788_v18 = vmul.f32 %v5505_v57, %v6835_v7 }
 0x630   :  { %vm6938_vm2 = vcmp.eq.f32.partialorder %v1796_v41, 8.507059e+37  ;;  %v1799_v59 = vor.u32 1.1754944e-38, %v1798_v54  ;;  %v1735_v15 = vsel %vm6933_vm1, %v6850_v60, %v1731_v14  ;;  %v1755_v13 = vsel %vm6864_vm9, %v1754_v51, %v1750_v62  ;;  %vm1779_vm8 = vmor %vm1777_vm12, %vm1778_vm5 }
 0x631   :  { %v1761_v36 = vadd.f32 %v5501_v38, %v1760_v32  ;;  %v1775_v23 = vmul.f32 %v5503_v5, %v1774_v30  ;;  %v1789_v41 = vsub.f32 1.0, %v1788_v18  ;;  %v1811_v43 = vand.u32 2147483647, %v6842_v21 }
 0x632   :  { %v1813_v54 = vand.u32 2147483648, %v6842_v21  ;;  %5508 = vrcp.f32 %v6852_v33  ;;  %v1725_v60 = vsel %vm6875_vm15, %v6845_v49, %v1720_v20  ;;  %vm1793_vm9 = vweird.f32 %v5505_v57 }
 0x633   :  { %v1765_v62 = vsel %vm6949_vm7, %v5501_v38, %v1761_v36  ;;  %v1776_v25 = vadd.f32 %v5503_v5, %v1775_v23  ;;  %v5507_v47 = vpop.eup %5506  ;;  %v1740_v51 = vsel %vm6882_vm0, %v6857_v26, %v1735_v15  ;;  %v1790_v14 = vmul.f32 %v5505_v57, %v1789_v41  ;;  %vm1794_vm0 = vmor %vm1792_vm11, %vm1793_vm9 }
 0x634   :  { %vm1807_vm10 = vweird.f32 %v6842_v21  ;;  %v1826_v22 = vand.u32 2147483647, %v6852_v33  ;;  %v1770_v49 = vsel %vm6891_vm4, %v1769_v11, %v1765_v62  ;;  %v1803_v32 = vmul.f32 %v5507_v47, %v6842_v21 }
 0x635   :  { %v1780_v38 = vsel %vm1779_vm8, %v5503_v5, %v1776_v25  ;;  %vm6972_vm15 = vcmp.eq.f32.partialorder %v1811_v43, 8.507059e+37  ;;  %v1791_v39 = vadd.f32 %v5505_v57, %v1790_v14  ;;  %v1814_v6 = vor.u32 1.1754944e-38, %v1813_v54 }
 0x636   :  { %v1785_v26 = vsel %vm6912_vm3, %v1784_v19, %v1780_v38  ;;  %5510 = vtanh.f32 %v6790_v9  ;;  %v1804_v55 = vsub.f32 1.0, %v1803_v32  ;;  %v1848_v11 = vrot.slane %v1725_v60, 2 }
 0x637   :  { %5512 = vtanh.f32 %v6795_v50  ;;  %v1849_v5 = vrot.slane %v1740_v51, 1  ;;  %v1795_v20 = vsel %vm1794_vm0, %v5505_v57, %v1791_v39  ;;  %vm1808_vm12 = vweird.f32 %v5507_v47 }
 0x638   :  { %v5509_v43 = vpop.eup %5508  ;;  %v1828_v48 = vand.u32 2147483648, %v6852_v33  ;;  %5514 = vtanh.f32 %v6798_v4  ;;  %v1800_v0 = vsel %vm6938_vm2, %v1799_v59, %v1795_v20  ;;  %v1805_v9 = vmul.f32 %v5507_v47, %v1804_v55  ;;  %vm1809_vm11 = vmor %vm1807_vm10, %vm1808_vm12 }
 0x639   :  { %v1818_v19 = vmul.f32 %v5509_v43, %v6852_v33  ;;  %v1852_v7 = vrot.slane %v1770_v49, 7  ;;  %vm1823_vm4 = vweird.f32 %v5509_v43  ;;  %5516 = vtanh.f32 %v6801_v42 }
 0x63a   :  { %vm9230_vm14 = vcmask 1041409   ;;  %v1854_v18 = vrot.slane %v1785_v26, 6  ;;  %v1806_v15 = vadd.f32 %v5507_v47, %v1805_v9  ;;  %5518 = vtanh.f32 %v6805_v10 }
 0x63b   :  { %v1850_v50 = vsel %vm9230_vm14, %v1849_v5, %v1848_v11  ;;  %v1819_v57 = vsub.f32 1.0, %v1818_v19  ;;  %vm9231_vm3 = vcmask 1042434   ;;  %5520 = vtanh.f32 %v6809_v56  ;;  %vm9234_vm5 = vmmov %vm9230_vm14 }
 0x63c   :  { %v1851_v36 = vsel %vm9231_vm3, %v1755_v13, %v1850_v50  ;;  %v5511_v4 = vpop.eup %5510  ;;  %vm9232_vm13 = vcmask 1043459   ;;  %v1871_v42 = vrot.slane %v6860_v34, 2  ;;  %v1872_v59 = vrot.slane %v6869_v27, 1  ;;  %vm9236_vm7 = vmmov %vm9231_vm3 }
 0x63d   :  { %v1853_v1 = vsel %vm9232_vm13, %v1852_v7, %v1851_v36  ;;  %v5513_v23 = vpop.eup %5512  ;;  %v1810_v17 = vsel %vm1809_vm11, %v5507_v47, %v1806_v15  ;;  %v1820_v41 = vmul.f32 %v5509_v43, %v1819_v57  ;;  %vm9233_vm6 = vcmask 1044484   ;;  %vm9237_vm8 = vmmov %vm9232_vm13 }
 0x63e   :  { %v1855_v10 = vsel %vm9233_vm6, %v1854_v18, %v1853_v1  ;;  %v1856_v54 = vrot.slane %v1800_v0, 5  ;;  %v5515_v13 = vpop.eup %5514  ;;  %v1815_v60 = vsel %vm6972_vm15, %v1814_v6, %v1810_v17  ;;  %vm1822_vm1 = vweird.f32 %v6852_v33  ;;  %vm9238_vm15 = vmmov %vm9233_vm6 }
 0x63f   :  { %v1873_v56 = vsel %vm9234_vm5, %v1872_v59, %v1871_v42  ;;  %v1875_v21 = vrot.slane %v5513_v23, 7  ;;  %v1821_v62 = vadd.f32 %v5509_v43, %v1820_v41  ;;  %vm9235_vm2 = vcmask 1045509   ;;  %v5517_v47 = vpop.eup %5516  ;;  %vm1824_vm9 = vmor %vm1822_vm1, %vm1823_vm4  ;;  %v9247_v41 = vld [vmem:[#allocation10_spill] sm:$0xff] }
 0x640   :  { %v1857_v34 = vsel %vm9235_vm2, %v1856_v54, %v1855_v10  ;;  %v1874_v27 = vsel %vm9236_vm7, %v5511_v4, %v1873_v56  ;;  %v1877_v25 = vrot.slane %v5515_v13, 6  ;;  %v1829_v51 = vor.u32 1.1754944e-38, %v1828_v48  ;;  %v5519_v38 = vpop.eup %5518  ;;  %vm9240_vm12 = vmmov %vm9235_vm2  ;;  %v9248_v10 = vld [vmem:[#allocation11_spill] sm:$0xff]  ;;  %v9249_v54 = vld [vmem:[#allocation13_spill] sm:$0xff] }
 0x641   :  { %v1858_v14 = vrot.slane %v1815_v60, 4  ;;  %v1876_v49 = vsel %vm9237_vm8, %v1875_v21, %v1874_v27  ;;  %v1825_v32 = vsel %vm1824_vm9, %v5509_v43, %v1821_v62  ;;  %vm1827_vm10 = vcmp.eq.f32.partialorder %v1826_v22, 8.507059e+37  ;;  %v5521_v26 = vpop.eup %5520  ;;  %v9250_v13 = vld [vmem:[#allocation15_spill] sm:$0xff] }
 0x642   :  { %v1878_v33 = vsel %vm9238_vm15, %v1877_v25, %v1876_v49  ;;  %v1879_v30 = vrot.slane %v5517_v47, 5  ;;  %v1830_v39 = vsel %vm1827_vm10, %v1829_v51, %v1825_v32  ;;  %vm9239_vm0 = vcmask 1046534  }
 0x643   :  { %v1859_v6 = vsel %vm9239_vm0, %v1858_v14, %v1857_v34  ;;  %v1881_v55 = vrot.slane %v5519_v38, 4  ;;  %v1860_v11 = vrot.slane %v1830_v39, 3  ;;  %v1883_v20 = vrot.slane %v5521_v26, 3  ;;  %vm9241_vm4 = vmmov %vm9239_vm0 }
 0x644   :  { %v1880_v5 = vsel %vm9240_vm12, %v1879_v30, %v1878_v33  ;;  %vm9242_vm14 = vcmask 1047559   ;;  %vm9244_vm11 = vcmp.lt.s32.totalorder %v6287_v58, 96  ;;  %vm9246_vm13 = vcmask 261120  }
 0x645   :  { %v1882_v48 = vsel %vm9241_vm4, %v1881_v55, %v1880_v5  ;;  %v1861_v0 = vsel %vm9242_vm14, %v1860_v11, %v1859_v6  ;;  %vm9243_vm3 = vmmov %vm9242_vm14 }
 0x646   :  { %v1884_v9 = vsel %vm9243_vm3, %v1883_v20, %v1882_v48 }
 0x647   :  { %v1886_v22 = vsel %vm9244_vm11, %v1861_v0, %v1884_v9 }
 0x648   :  { %1889 = vrot.lane.b32.xlu0 %v1886_v22, %s5850_s3  ;;  %v1887_v7 = vmul.f32 %v1886_v22, %v6756_v53 }
 0x6ba   :  { %v1890_v43 = vpop.permute.xlu0 %1889 }
 0x6bb   :  { %v1892_v19 = vmul.f32 %v1890_v43, %v1886_v22 }
 0x6bd   :  { %1894 = vrot.lane.b32.xlu1 %v1892_v19, %s5850_s3 }
 0x72f   :  { %v1895_v50 = vpop.permute.xlu1 %1894 }
 0x730   :  { %v7019_v18 = vadd.f32 %v1895_v50, %v1887_v7 }
 0x732   :  { %5522 = vtanh.f32 %v7019_v18 }
 0x738   :  { %v5523_v15 = vpop.eup %5522 }
 0x739   :  { %1900 = vrot.lane.b32.xlu2 %v5523_v15, %s5850_s3  ;;  %v9252_v15 = vld [vmem:[#allocation25_spill] sm:$0xff] }
 0x793   :  { %v1901_v57 = vpop.permute.xlu2 %1900 }
 0x794   :  { %v7023_v36 = vmul.f32 %v1901_v57, %v1886_v22  ;;  %v9251_v22 = vld [vmem:[#allocation24_spill] sm:$0xff] }
 0x796   :  { %9245 = vst [vmem:[#allocation14_spill] sm:$0xff] %v7023_v36  ;;  %1952 = vrot.lane.b32.xlu0 %v7023_v36, %s5851_s5 }
 0x808   :  { %v1953_v4 = vpop.permute.xlu0 %1952 }
 0x809   :  { %v1954_v1 = vsel %vm9246_vm13, %v1953_v4, 0 }
 0x80a   :  { %v1976_v42 = vand.u32 4294901760, %v1954_v1 }
 0x80c   :  { %v1977_v59 = vsub.f32 %v1954_v1, %v1976_v42  ;;  %2022 = vmatmul.f32.vlgmr.msrb.gmra.mxu3 %v1976_v42 }
 0x80d   :  { %2554 = vmatpush.msrb.mxu3 %v5971_v40 }
 0x80e   :  { %v1978_v53 = vand.u32 4294901760, %v1977_v59  ;;  %2052 = vmatmul.f32.vlgmr.msrb.gmra.mxu0 %v1977_v59 }
 0x80f   :  { %2556 = vmatpush.msrb.mxu3 %v6009_v61  ;;  %2583 = vmatpush.msrb.mxu0 %v5980_v46 }
 0x810   :  { %v1979_v23 = vsub.f32 %v1977_v59, %v1978_v53  ;;  %2079 = vmatmul.f32.vlgmr.msrb.gmra.mxu1 %v1978_v53 }
 0x811   :  { %2558 = vmatpush.msrb.mxu3 %v6031_v8  ;;  %2614 = vmatpush.msrb.mxu1 %v5971_v40 }
 0x812   :  { %v1980_v17 = vand.u32 4294901760, %v1979_v23  ;;  %2587 = vmatpush.msrb.mxu0 %v6020_v2 }
 0x813   :  { %2560 = vmatpush.msrb.mxu3 %v6041_v12  ;;  %2616 = vmatpush.msrb.mxu1 %v6009_v61 }
 0x814   :  { %1981 = vmatmul.f32.vlgmr.msrb.gmra.mxu2 %v1980_v17  ;;  %2137 = vmatmul.f32.vlgmr.msra.gmra.mxu3 %v1976_v42 }
 0x815   :  { %2525 = vmatpush.msrb.mxu2 %v9247_v41  ;;  %2618 = vmatpush.msrb.mxu1 %v6031_v8 }
 0x816   :  { %2591 = vmatpush.msrb.mxu0 %v9159_v28  ;;  %2972 = vmatpush.msra.mxu3 %v5991_v52 }
 0x817   :  { %2528 = vmatpush.msrb.mxu2 %v9248_v10  ;;  %2620 = vmatpush.msrb.mxu1 %v6041_v12 }
 0x818   :  { %2595 = vmatpush.msrb.mxu0 %v9161_v31  ;;  %2978 = vmatpush.msra.mxu3 %v9158_v24 }
 0x819   :  { %2531 = vmatpush.msrb.mxu2 %v9249_v54 }
 0x81a   :  { %2984 = vmatpush.msra.mxu3 %v9160_v37 }
 0x81b   :  { %2534 = vmatpush.msrb.mxu2 %v9250_v13 }
 0x81c   :  { %2112 = vmatmul.f32.vlgmr.msra.gmra.mxu2 %v1976_v42  ;;  %2990 = vmatpush.msra.mxu3 %v9162_v3 }
 0x81d   :  { %2939 = vmatpush.msra.mxu2 %v5971_v40 }
 0x81f   :  { %2941 = vmatpush.msra.mxu2 %v6009_v61 }
 0x821   :  { %2943 = vmatpush.msra.mxu2 %v6031_v8 }
 0x823   :  { %2945 = vmatpush.msra.mxu2 %v6041_v12 }
 0x88b   :  { %v2053_v62 = vpop.f32.mrf.mxu0 }
 0x88d   :  { %v2080_v27 = vpop.f32.mrf.mxu1 }
 0x88f   :  { %v2023_v60 = vpop.f32.mrf.mxu3 }
 0x897   :  { %v1982_v56 = vpop.f32.mrf.mxu2  ;;  %v2138_v14 = vpop.f32.mrf.mxu3 }
 0x898   :  { %v2024_v21 = vadd.f32 %v2023_v60, %v1982_v56 }
 0x89a   :  { %v2054_v34 = vadd.f32 %v2053_v62, %v2024_v21 }
 0x89c   :  { %v2081_v25 = vadd.f32 %v2080_v27, %v2054_v34 }
 0x89f   :  { %v2113_v47 = vpop.f32.mrf.mxu2 }
 0x8a0   :  { %v2114_v51 = vadd.f32 %v2113_v47, %v2081_v25 }
 0x8a2   :  { %v2139_v49 = vadd.f32 %v2138_v14, %v2114_v51 }
 0x8a4   :  { %v2142_v38 = vrot.slane %v2139_v49, 5  ;;  %v2143_v32 = vrot.slane %v2139_v49, 6  ;;  %v2144_v33 = vrot.slane %v2139_v49, 7  ;;  %v2145_v30 = vrot.slane %v2139_v49, 1 }
 0x8a5   :  { %v2146_v26 = vrot.slane %v2139_v49, 2  ;;  %v2147_v39 = vrot.slane %v2139_v49, 3  ;;  %v2148_v6 = vrot.slane %v2139_v49, 4  ;;  %v7053_v55 = vadd.f32 %v2139_v49, %v6205_v63 }
 0x8a6   :  { %v2157_v11 = vadd.f32 %v2142_v38, %v6187_v45  ;;  %v2158_v5 = vadd.f32 %v2143_v32, %v6191_v44  ;;  %v7058_v20 = vadd.f32 %v2144_v33, %v6193_v29  ;;  %v7061_v48 = vadd.f32 %v2145_v30, %v9204_v35 }
 0x8a7   :  { %v7064_v0 = vadd.f32 %v2146_v26, %v9205_v16  ;;  %v5328_v9 = vmul.f32 -1.442695, %v7053_v55  ;;  %v7068_v43 = vadd.f32 %v2147_v39, %v9251_v22  ;;  %v7072_v57 = vadd.f32 %v2148_v6, %v9252_v15 }
 0x8a8   :  { %v5325_v19 = vmul.f32 -1.442695, %v2157_v11  ;;  %v5326_v7 = vmul.f32 -1.442695, %v2158_v5  ;;  %v5327_v50 = vmul.f32 -1.442695, %v7058_v20 }
 0x8a9   :  { %5524 = vpow2.f32 %v5328_v9  ;;  %v5329_v4 = vmul.f32 -1.442695, %v7061_v48  ;;  %v5330_v1 = vmul.f32 -1.442695, %v7064_v0  ;;  %v5331_v42 = vmul.f32 -1.442695, %v7068_v43 }
 0x8aa   :  { %5526 = vpow2.f32 %v5325_v19  ;;  %v5332_v59 = vmul.f32 -1.442695, %v7072_v57 }
 0x8ab   :  { %5528 = vpow2.f32 %v5326_v7 }
 0x8ac   :  { %5530 = vpow2.f32 %v5327_v50 }
 0x8ad   :  { %5532 = vpow2.f32 %v5329_v4 }
 0x8ae   :  { %5534 = vpow2.f32 %v5330_v1 }
 0x8af   :  { %v5525_v53 = vpop.eup %5524  ;;  %5536 = vpow2.f32 %v5331_v42 }
 0x8b0   :  { %v5527_v23 = vpop.eup %5526  ;;  %v7078_v17 = vadd.f32 1.0, %v5525_v53  ;;  %5538 = vpow2.f32 %v5332_v59 }
 0x8b1   :  { %v5529_v60 = vpop.eup %5528  ;;  %v7080_v56 = vadd.f32 1.0, %v5527_v23 }
 0x8b2   :  { %v5531_v21 = vpop.eup %5530  ;;  %v7082_v62 = vadd.f32 1.0, %v5529_v60  ;;  %5540 = vrcp.f32 %v7078_v17  ;;  %vm2247_vm6 = vweird.f32 %v7078_v17  ;;  %v2251_v30 = vand.u32 2147483647, %v7078_v17 }
 0x8b3   :  { %v5533_v34 = vpop.eup %5532  ;;  %v7085_v27 = vadd.f32 1.0, %v5531_v21  ;;  %5542 = vrcp.f32 %v7080_v56  ;;  %v2208_v14 = vand.u32 2147483648, %v7080_v56  ;;  %vm2202_vm1 = vweird.f32 %v7080_v56 }
 0x8b4   :  { %v7088_v25 = vadd.f32 1.0, %v5533_v34  ;;  %5544 = vrcp.f32 %v7082_v62  ;;  %v5535_v47 = vpop.eup %5534  ;;  %v2223_v38 = vand.u32 2147483648, %v7082_v62  ;;  %v2206_v6 = vand.u32 2147483647, %v7080_v56 }
 0x8b5   :  { %5546 = vtanh.f32 %v2157_v11  ;;  %v5537_v51 = vpop.eup %5536  ;;  %v7096_v33 = vadd.f32 1.0, %v5535_v47  ;;  %v2221_v11 = vand.u32 2147483647, %v7082_v62  ;;  %v7116_v50 = vor.u32 1.1754944e-38, %v2208_v14 }
 0x8b6   :  { %5548 = vrcp.f32 %v7085_v27  ;;  %v5539_v49 = vpop.eup %5538  ;;  %v7103_v39 = vadd.f32 1.0, %v5537_v51  ;;  %vm2217_vm5 = vweird.f32 %v7082_v62  ;;  %v2238_v4 = vand.u32 2147483648, %v7085_v27 }
 0x8b7   :  { %5550 = vtanh.f32 %v2158_v5  ;;  %v7112_v19 = vadd.f32 1.0, %v5539_v49  ;;  %v7124_v59 = vor.u32 1.1754944e-38, %v2223_v38  ;;  %vm2232_vm2 = vweird.f32 %v7085_v27 }
 0x8b8   :  { %v7094_v32 = vpop.eup %5540  ;;  %5552 = vrcp.f32 %v7088_v25  ;;  %v2236_v53 = vand.u32 2147483647, %v7085_v27  ;;  %v2253_v34 = vand.u32 2147483648, %v7078_v17  ;;  %vm7139_vm8 = vcmp.eq.f32.partialorder %v2251_v30, 8.507059e+37 }
 0x8b9   :  { %v7101_v26 = vpop.eup %5542  ;;  %v2243_v5 = vmul.f32 %v7094_v32, %v7078_v17  ;;  %vm2248_vm7 = vweird.f32 %v7094_v32  ;;  %5554 = vrcp.f32 %v7096_v33  ;;  %vm2262_vm10 = vweird.f32 %v7088_v25 }
 0x8ba   :  { %v7110_v9 = vpop.eup %5544  ;;  %v2198_v7 = vmul.f32 %v7101_v26, %v7080_v56  ;;  %vm2203_vm9 = vweird.f32 %v7101_v26  ;;  %vm7147_vm15 = vcmp.eq.f32.partialorder %v2206_v6, 8.507059e+37  ;;  %vm7151_vm0 = vcmp.eq.f32.partialorder %v2221_v11, 8.507059e+37  ;;  %vm7175_vm3 = vmor %vm2247_vm6, %vm2248_vm7 }
 0x8bb   :  { %v7120_v1 = vpop.eup %5546  ;;  %v2213_v42 = vmul.f32 %v7110_v9, %v7082_v62  ;;  %v2244_v23 = vsub.f32 1.0, %v2243_v5  ;;  %v2239_v15 = vor.u32 1.1754944e-38, %v2238_v4  ;;  %v2266_v30 = vand.u32 2147483647, %v7088_v25  ;;  %vm7183_vm11 = vmor %vm2202_vm1, %vm2203_vm9 }
 0x8bc   :  { %v7128_v60 = vpop.eup %5548  ;;  %v2199_v21 = vsub.f32 1.0, %v2198_v7  ;;  %vm7158_vm12 = vcmp.eq.f32.partialorder %v2236_v53, 8.507059e+37  ;;  %vm2218_vm4 = vweird.f32 %v7110_v9  ;;  %v2254_v4 = vor.u32 1.1754944e-38, %v2253_v34 }
 0x8bd   :  { %v7133_v47 = vpop.eup %5550  ;;  %v2214_v51 = vsub.f32 1.0, %v2213_v42  ;;  %v2228_v14 = vmul.f32 %v7128_v60, %v7085_v27  ;;  %v2245_v49 = vmul.f32 %v7094_v32, %v2244_v23  ;;  %v2268_v23 = vand.u32 2147483648, %v7088_v25  ;;  %vm7198_vm7 = vmor %vm2217_vm5, %vm2218_vm4 }
 0x8be   :  { %v7144_v5 = vpop.eup %5552  ;;  %v2200_v7 = vmul.f32 %v7101_v26, %v2199_v21  ;;  %v2281_v29 = vand.u32 2147483647, %v7096_v33  ;;  %vm2233_vm14 = vweird.f32 %v7128_v60  ;;  %vm7187_vm13 = vcmp.eq.f32.partialorder %v2266_v30, 8.507059e+37 }
 0x8bf   :  { %v2215_v22 = vmul.f32 %v7110_v9, %v2214_v51  ;;  %v2229_v16 = vsub.f32 1.0, %v2228_v14  ;;  %v2246_v6 = vadd.f32 %v7094_v32, %v2245_v49  ;;  %v2258_v11 = vmul.f32 %v7144_v5, %v7088_v25  ;;  %v5555_v49 = vpop.eup %5554  ;;  %vm7218_vm5 = vmor %vm2232_vm2, %vm2233_vm14 }
 0x8c0   :  { %v2201_v21 = vadd.f32 %v7101_v26, %v2200_v7  ;;  %v2269_v34 = vor.u32 1.1754944e-38, %v2268_v23  ;;  %vm2277_vm6 = vweird.f32 %v7096_v33  ;;  %v2283_v17 = vand.u32 2147483648, %v7096_v33 }
 0x8c1   :  { %v2216_v44 = vadd.f32 %v7110_v9, %v2215_v22  ;;  %v2230_v51 = vmul.f32 %v7128_v60, %v2229_v16  ;;  %v2259_v14 = vsub.f32 1.0, %v2258_v11  ;;  %5556 = vrcp.f32 %v7103_v39 }
 0x8c2   :  { %v2250_v30 = vsel %vm7175_vm3, %v7094_v32, %v2246_v6  ;;  %vm2263_vm1 = vweird.f32 %v7144_v5  ;;  %v2205_v11 = vsel %vm7183_vm11, %v7101_v26, %v2201_v21  ;;  %v2273_v32 = vmul.f32 %v5555_v49, %v7096_v33 }
 0x8c3   :  { %v2231_v7 = vadd.f32 %v7128_v60, %v2230_v51  ;;  %v2260_v23 = vmul.f32 %v7144_v5, %v2259_v14  ;;  %v2220_v62 = vsel %vm7198_vm7, %v7110_v9, %v2216_v44  ;;  %vm7223_vm9 = vcmp.eq.f32.partialorder %v2281_v29, 8.507059e+37  ;;  %vm7237_vm2 = vmor %vm2262_vm10, %vm2263_vm1 }
 0x8c4   :  { %v2296_v9 = vand.u32 2147483647, %v7103_v39  ;;  %v2298_v27 = vand.u32 2147483648, %v7103_v39  ;;  %v2255_v21 = vsel %vm7139_vm8, %v2254_v4, %v2250_v30  ;;  %v2274_v53 = vsub.f32 1.0, %v2273_v32 }
 0x8c5   :  { %v2235_v26 = vsel %vm7218_vm5, %v7128_v60, %v2231_v7  ;;  %v2261_v44 = vadd.f32 %v7144_v5, %v2260_v23  ;;  %v2284_v14 = vor.u32 1.1754944e-38, %v2283_v17  ;;  %5558 = vrcp.f32 %v7112_v19 }
 0x8c6   :  { %v2210_v60 = vsel %vm7147_vm15, %v7116_v50, %v2205_v11  ;;  %v2225_v22 = vsel %vm7151_vm0, %v7124_v59, %v2220_v62  ;;  %vm2278_vm8 = vweird.f32 %v5555_v49  ;;  %v2240_v4 = vsel %vm7158_vm12, %v2239_v15, %v2235_v26 }
 0x8c7   :  { %v2265_v25 = vsel %vm7237_vm2, %v7144_v5, %v2261_v44  ;;  %v5557_v38 = vpop.eup %5556  ;;  %v2275_v17 = vmul.f32 %v5555_v49, %v2274_v53  ;;  %vm2292_vm10 = vweird.f32 %v7103_v39  ;;  %5560 = vtanh.f32 %v7058_v20  ;;  %vm2279_vm0 = vmor %vm2277_vm6, %vm2278_vm8 }
 0x8c8   :  { %v2288_v36 = vmul.f32 %v5557_v38, %v7103_v39  ;;  %vm7256_vm15 = vcmp.eq.f32.partialorder %v2296_v9, 8.507059e+37  ;;  %v2299_v59 = vor.u32 1.1754944e-38, %v2298_v27  ;;  %v2311_v42 = vand.u32 2147483647, %v7112_v19 }
 0x8c9   :  { %5562 = vtanh.f32 %v7053_v55  ;;  %v2270_v63 = vsel %vm7187_vm13, %v2269_v34, %v2265_v25  ;;  %v2276_v15 = vadd.f32 %v5555_v49, %v2275_v17  ;;  %v2333_v5 = vrot.slane %v2210_v60, 3 }
 0x8ca   :  { %5564 = vtanh.f32 %v7061_v48  ;;  %v2289_v20 = vsub.f32 1.0, %v2288_v36  ;;  %v2334_v56 = vrot.slane %v2225_v22, 2  ;;  %v2336_v7 = vrot.slane %v2240_v4, 1 }
 0x8cb   :  { %5566 = vtanh.f32 %v7064_v0  ;;  %v5559_v30 = vpop.eup %5558  ;;  %v2280_v23 = vsel %vm2279_vm0, %v5555_v49, %v2276_v15  ;;  %v2313_v55 = vand.u32 2147483648, %v7112_v19  ;;  %v2356_v16 = vrot.slane %v7120_v1, 3 }
 0x8cc   :  { %5568 = vtanh.f32 %v7068_v43  ;;  %v2285_v48 = vsel %vm7223_vm9, %v2284_v14, %v2280_v23  ;;  %v2290_v34 = vmul.f32 %v5557_v38, %v2289_v20  ;;  %vm2293_vm12 = vweird.f32 %v5557_v38 }
 0x8cd   :  { %v2303_v33 = vmul.f32 %v5559_v30, %v7112_v19  ;;  %v5561_v11 = vpop.eup %5560  ;;  %5570 = vtanh.f32 %v7072_v57  ;;  %vm9277_vm4 = vcmask 1041409   ;;  %v2339_v62 = vrot.slane %v2270_v63, 7  ;;  %vm2294_vm3 = vmor %vm2292_vm10, %vm2293_vm12 }
 0x8ce   :  { %v2335_v0 = vsel %vm9277_vm4, %v2334_v56, %v2333_v5  ;;  %v2357_v49 = vrot.slane %v7133_v47, 2  ;;  %v2291_v32 = vadd.f32 %v5557_v38, %v2290_v34  ;;  %vm9278_vm14 = vcmask 1042434   ;;  %vm9280_vm6 = vmmov %vm9277_vm4 }
 0x8cf   :  { %v5563_v51 = vpop.eup %5562  ;;  %v2304_v43 = vsub.f32 1.0, %v2303_v33  ;;  %v2337_v1 = vsel %vm9278_vm14, %v2336_v7, %v2335_v0  ;;  %v2359_v26 = vrot.slane %v5561_v11, 1  ;;  %vm2308_vm11 = vweird.f32 %v5559_v30  ;;  %vm9282_vm1 = vmmov %vm9278_vm14 }
 0x8d0   :  { %v5565_v6 = vpop.eup %5564  ;;  %vm9279_vm13 = vcmask 1043459   ;;  %v2341_v9 = vrot.slane %v2285_v48, 6  ;;  %v2358_v57 = vsel %vm9280_vm6, %v2357_v49, %v2356_v16  ;;  %v2295_v29 = vsel %vm2294_vm3, %v5557_v38, %v2291_v32 }
 0x8d1   :  { %v2338_v44 = vsel %vm9279_vm13, %v2255_v21, %v2337_v1  ;;  %v5567_v27 = vpop.eup %5566  ;;  %v2305_v53 = vmul.f32 %v5559_v30, %v2304_v43  ;;  %vm9281_vm7 = vcmask 1044484   ;;  %v2360_v14 = vsel %vm9282_vm1, %v2359_v26, %v2358_v57  ;;  %vm9283_vm5 = vmmov %vm9279_vm13 }
 0x8d2   :  { %v2340_v47 = vsel %vm9281_vm7, %v2339_v62, %v2338_v44  ;;  %v5569_v60 = vpop.eup %5568  ;;  %v2300_v22 = vsel %vm7256_vm15, %v2299_v59, %v2295_v29  ;;  %v2361_v39 = vsel %vm9283_vm5, %v5563_v51, %v2360_v14  ;;  %v2362_v25 = vrot.slane %v5565_v6, 7  ;;  %vm9285_vm10 = vmmov %vm9281_vm7 }
 0x8d3   :  { %v2306_v4 = vadd.f32 %v5559_v30, %v2305_v53  ;;  %vm2307_vm9 = vweird.f32 %v7112_v19  ;;  %vm9284_vm2 = vcmask 1045509   ;;  %v2364_v17 = vrot.slane %v5567_v27, 6  ;;  %v5571_v36 = vpop.eup %5570 }
 0x8d4   :  { %v2342_v21 = vsel %vm9284_vm2, %v2341_v9, %v2340_v47  ;;  %vm2309_vm8 = vmor %vm2307_vm9, %vm2308_vm11  ;;  %v2314_v38 = vor.u32 1.1754944e-38, %v2313_v55  ;;  %v2343_v63 = vrot.slane %v2300_v22, 5  ;;  %v2363_v15 = vsel %vm9285_vm10, %v2362_v25, %v2361_v39 }
 0x8d5   :  { %v2366_v5 = vrot.slane %v5569_v60, 5  ;;  %v2310_v20 = vsel %vm2309_vm8, %v5559_v30, %v2306_v4  ;;  %vm2312_vm0 = vcmp.eq.f32.partialorder %v2311_v42, 8.507059e+37  ;;  %vm9286_vm15 = vmmov %vm9284_vm2  ;;  %vm9287_vm12 = vcmask 1046534  }
 0x8d6   :  { %v2365_v50 = vsel %vm9286_vm15, %v2364_v17, %v2363_v15  ;;  %v2315_v59 = vsel %vm2312_vm0, %v2314_v38, %v2310_v20  ;;  %v2344_v56 = vsel %vm9287_vm12, %v2343_v63, %v2342_v21  ;;  %vm9288_vm4 = vmmov %vm9287_vm12  ;;  %v2368_v23 = vrot.slane %v5571_v36, 4  ;;  %v9294_v20 = vld [vmem:[#allocation19_spill] sm:$0xff] }
 0x8d7   :  { %v2367_v19 = vsel %vm9288_vm4, %v2366_v5, %v2365_v50  ;;  %v2345_v7 = vrot.slane %v2315_v59, 4  ;;  %vm9289_vm14 = vcmask 1047559   ;;  %vm9291_vm11 = vcmp.lt.s32.totalorder %v6287_v58, 96  ;;  %v9295_v59 = vld [vmem:[#allocation20_spill] sm:$0xff] }
 0x8d8   :  { %vm9290_vm3 = vmmov %vm9289_vm14  ;;  %vm9293_vm13 = vcmask 261120  }
 0x8d9   :  { %v2346_v16 = vsel %vm9289_vm14, %v2345_v7, %v2344_v56  ;;  %v2369_v48 = vsel %vm9290_vm3, %v2368_v23, %v2367_v19  ;;  %v9296_v19 = vld [vmem:[#allocation21_spill] sm:$0xff]  ;;  %v9297_v23 = vld [vmem:[#allocation23_spill] sm:$0xff] }
 0x8da   :  { %v2371_v55 = vsel %vm9291_vm11, %v2346_v16, %v2369_v48 }
 0x8db   :  { %2374 = vrot.lane.b32.xlu1 %v2371_v55, %s5850_s3  ;;  %v2372_v34 = vmul.f32 %v2371_v55, %v7019_v18 }
 0x94d   :  { %v2375_v30 = vpop.permute.xlu1 %2374 }
 0x94e   :  { %v2377_v42 = vmul.f32 %v2375_v30, %v2371_v55 }
 0x950   :  { %2379 = vrot.lane.b32.xlu2 %v2377_v42, %s5850_s3 }
 0x9aa   :  { %v2380_v33 = vpop.permute.xlu2 %2379 }
 0x9ab   :  { %v7302_v11 = vadd.f32 %v2380_v33, %v2372_v34 }
 0x9ad   :  { %5572 = vtanh.f32 %v7302_v11 }
 0x9b3   :  { %v5573_v0 = vpop.eup %5572 }
 0x9b4   :  { %2385 = vrot.lane.b32.xlu0 %v5573_v0, %s5850_s3  ;;  %v9299_v0 = vld [vmem:[#allocation25_spill] sm:$0xff] }
 0xa26   :  { %v2386_v62 = vpop.permute.xlu0 %2385 }
 0xa27   :  { %v7306_v49 = vmul.f32 %v2386_v62, %v2371_v55  ;;  %v9298_v55 = vld [vmem:[#allocation24_spill] sm:$0xff] }
 0xa29   :  { %9292 = vst [vmem:[#allocation17_spill] sm:$0xff] %v7306_v49  ;;  %2437 = vrot.lane.b32.xlu1 %v7306_v49, %s5851_s5 }
 0xa9b   :  { %v2438_v51 = vpop.permute.xlu1 %2437 }
 0xa9c   :  { %v2439_v32 = vsel %vm9293_vm13, %v2438_v51, 0 }
 0xa9d   :  { %v2461_v43 = vand.u32 4294901760, %v2439_v32 }
 0xa9f   :  { %v2462_v1 = vsub.f32 %v2439_v32, %v2461_v43  ;;  %2507 = vmatmul.f32.vlgmr.msra.gmra.mxu1 %v2461_v43 }
 0xaa0   :  { %3039 = vmatpush.msra.mxu1 %v5971_v40 }
 0xaa1   :  { %v2463_v18 = vand.u32 4294901760, %v2462_v1  ;;  %2537 = vmatmul.f32.vlgmr.msrb.gmra.mxu2 %v2462_v1 }
 0xaa2   :  { %3041 = vmatpush.msra.mxu1 %v6009_v61  ;;  %3068 = vmatpush.msrb.mxu2 %v5980_v46 }
 0xaa3   :  { %v2464_v26 = vsub.f32 %v2462_v1, %v2463_v18  ;;  %2564 = vmatmul.f32.vlgmr.msrb.gmra.mxu3 %v2463_v18 }
 0xaa4   :  { %3043 = vmatpush.msra.mxu1 %v6031_v8  ;;  %3099 = vmatpush.msrb.mxu3 %v5971_v40 }
 0xaa5   :  { %v2465_v6 = vand.u32 4294901760, %v2464_v26  ;;  %3072 = vmatpush.msrb.mxu2 %v6020_v2 }
 0xaa6   :  { %3045 = vmatpush.msra.mxu1 %v6041_v12  ;;  %3101 = vmatpush.msrb.mxu3 %v6009_v61 }
 0xaa7   :  { %2466 = vmatmul.f32.vlgmr.msra.gmra.mxu0 %v2465_v6  ;;  %2622 = vmatmul.f32.vlgmr.msrb.gmra.mxu1 %v2461_v43 }
 0xaa8   :  { %3010 = vmatpush.msra.mxu0 %v9247_v41  ;;  %3103 = vmatpush.msrb.mxu3 %v6031_v8 }
 0xaa9   :  { %3076 = vmatpush.msrb.mxu2 %v9159_v28  ;;  %3457 = vmatpush.msrb.mxu1 %v5991_v52 }
 0xaaa   :  { %3013 = vmatpush.msra.mxu0 %v9248_v10  ;;  %3105 = vmatpush.msrb.mxu3 %v6041_v12 }
 0xaab   :  { %3080 = vmatpush.msrb.mxu2 %v9161_v31  ;;  %3463 = vmatpush.msrb.mxu1 %v9158_v24 }
 0xaac   :  { %3016 = vmatpush.msra.mxu0 %v9249_v54 }
 0xaad   :  { %3469 = vmatpush.msrb.mxu1 %v9160_v37 }
 0xaae   :  { %3019 = vmatpush.msra.mxu0 %v9250_v13 }
 0xaaf   :  { %2597 = vmatmul.f32.vlgmr.msrb.gmra.mxu0 %v2461_v43  ;;  %3475 = vmatpush.msrb.mxu1 %v9162_v3 }
 0xab0   :  { %3424 = vmatpush.msrb.mxu0 %v5971_v40 }
 0xab2   :  { %3426 = vmatpush.msrb.mxu0 %v6009_v61 }
 0xab4   :  { %3428 = vmatpush.msrb.mxu0 %v6031_v8 }
 0xab6   :  { %3430 = vmatpush.msrb.mxu0 %v6041_v12 }
 0xb1c   :  { %v2508_v44 = vpop.f32.mrf.mxu1 }
 0xb24   :  { %v2467_v9 = vpop.f32.mrf.mxu0  ;;  %v2538_v27 = vpop.f32.mrf.mxu2 }
 0xb25   :  { %v2509_v57 = vadd.f32 %v2508_v44, %v2467_v9  ;;  %v2623_v22 = vpop.f32.mrf.mxu1 }
 0xb26   :  { %v2565_v53 = vpop.f32.mrf.mxu3 }
 0xb27   :  { %v2539_v29 = vadd.f32 %v2538_v27, %v2509_v57 }
 0xb29   :  { %v2566_v47 = vadd.f32 %v2565_v53, %v2539_v29 }
 0xb2c   :  { %v2598_v14 = vpop.f32.mrf.mxu0 }
 0xb2d   :  { %v2599_v60 = vadd.f32 %v2598_v14, %v2566_v47 }
 0xb2f   :  { %v2624_v39 = vadd.f32 %v2623_v22, %v2599_v60 }
 0xb31   :  { %v2627_v25 = vrot.slane %v2624_v39, 4  ;;  %v2628_v4 = vrot.slane %v2624_v39, 5  ;;  %v2629_v21 = vrot.slane %v2624_v39, 6  ;;  %v2630_v17 = vrot.slane %v2624_v39, 7 }
 0xb32   :  { %v2631_v36 = vrot.slane %v2624_v39, 1  ;;  %v2632_v38 = vrot.slane %v2624_v39, 2  ;;  %v2633_v63 = vrot.slane %v2624_v39, 3  ;;  %v7336_v15 = vadd.f32 %v2624_v39, %v9204_v35 }
 0xb33   :  { %v2642_v5 = vadd.f32 %v2627_v25, %v6187_v45  ;;  %v2643_v50 = vadd.f32 %v2628_v4, %v9294_v20  ;;  %v7341_v56 = vadd.f32 %v2629_v21, %v9295_v59  ;;  %v7344_v7 = vadd.f32 %v2630_v17, %v9296_v19 }
 0xb34   :  { %v7347_v16 = vadd.f32 %v2631_v36, %v9297_v23  ;;  %v5337_v48 = vmul.f32 -1.442695, %v7336_v15  ;;  %v7351_v30 = vadd.f32 %v2632_v38, %v9298_v55  ;;  %v7355_v62 = vadd.f32 %v2633_v63, %v9299_v0 }
 0xb35   :  { %v5333_v42 = vmul.f32 -1.442695, %v2642_v5  ;;  %v5334_v34 = vmul.f32 -1.442695, %v2643_v50  ;;  %v5335_v33 = vmul.f32 -1.442695, %v7341_v56 }
 0xb36   :  { %v5336_v51 = vmul.f32 -1.442695, %v7344_v7  ;;  %5574 = vpow2.f32 %v5337_v48  ;;  %v5338_v32 = vmul.f32 -1.442695, %v7347_v16  ;;  %v5339_v43 = vmul.f32 -1.442695, %v7351_v30 }
 0xb37   :  { %5576 = vpow2.f32 %v5333_v42  ;;  %v5340_v1 = vmul.f32 -1.442695, %v7355_v62 }
 0xb38   :  { %5578 = vpow2.f32 %v5334_v34 }
 0xb39   :  { %5580 = vpow2.f32 %v5335_v33 }
 0xb3a   :  { %5582 = vpow2.f32 %v5336_v51 }
 0xb3b   :  { %5584 = vpow2.f32 %v5338_v32 }
 0xb3c   :  { %v5575_v18 = vpop.eup %5574  ;;  %5586 = vpow2.f32 %v5339_v43 }
 0xb3d   :  { %v5577_v26 = vpop.eup %5576  ;;  %v7361_v6 = vadd.f32 1.0, %v5575_v18  ;;  %5588 = vpow2.f32 %v5340_v1 }
 0xb3e   :  { %v5579_v44 = vpop.eup %5578  ;;  %v7363_v9 = vadd.f32 1.0, %v5577_v26 }
 0xb3f   :  { %v5581_v57 = vpop.eup %5580  ;;  %v7365_v27 = vadd.f32 1.0, %v5579_v44  ;;  %5590 = vrcp.f32 %v7361_v6  ;;  %vm2747_vm6 = vweird.f32 %v7361_v6  ;;  %v2751_v36 = vand.u32 2147483647, %v7361_v6 }
 0xb40   :  { %v5583_v29 = vpop.eup %5582  ;;  %v7368_v53 = vadd.f32 1.0, %v5581_v57  ;;  %5592 = vrcp.f32 %v7363_v9  ;;  %v2693_v60 = vand.u32 2147483648, %v7363_v9  ;;  %v2691_v17 = vand.u32 2147483647, %v7363_v9 }
 0xb41   :  { %v7371_v47 = vadd.f32 1.0, %v5583_v29  ;;  %5594 = vrcp.f32 %v7365_v27  ;;  %v5585_v14 = vpop.eup %5584  ;;  %v2708_v39 = vand.u32 2147483648, %v7365_v27  ;;  %vm2687_vm7 = vweird.f32 %v7363_v9 }
 0xb42   :  { %5596 = vtanh.f32 %v2642_v5  ;;  %v5587_v22 = vpop.eup %5586  ;;  %v7379_v21 = vadd.f32 1.0, %v5585_v14  ;;  %v7390_v5 = vor.u32 1.1754944e-38, %v2693_v60  ;;  %vm2702_vm1 = vweird.f32 %v7365_v27 }
 0xb43   :  { %5598 = vrcp.f32 %v7368_v53  ;;  %v5589_v25 = vpop.eup %5588  ;;  %v7387_v63 = vadd.f32 1.0, %v5587_v22  ;;  %v7402_v51 = vor.u32 1.1754944e-38, %v2708_v39  ;;  %v2723_v32 = vand.u32 2147483648, %v7368_v53 }
 0xb44   :  { %5600 = vtanh.f32 %v2643_v50  ;;  %v2706_v50 = vand.u32 2147483647, %v7365_v27  ;;  %v7397_v34 = vadd.f32 1.0, %v5589_v25  ;;  %vm2717_vm5 = vweird.f32 %v7368_v53 }
 0xb45   :  { %v7377_v4 = vpop.eup %5590  ;;  %5602 = vrcp.f32 %v7371_v47  ;;  %v2721_v18 = vand.u32 2147483647, %v7368_v53  ;;  %v2736_v26 = vand.u32 2147483647, %v7371_v47  ;;  %v2738_v14 = vand.u32 2147483648, %v7371_v47 }
 0xb46   :  { %v7385_v38 = vpop.eup %5592  ;;  %v2743_v48 = vmul.f32 %v7377_v4, %v7361_v6  ;;  %vm2748_vm9 = vweird.f32 %v7377_v4  ;;  %5604 = vrcp.f32 %v7379_v21  ;;  %vm7420_vm8 = vcmp.eq.f32.partialorder %v2691_v17, 8.507059e+37 }
 0xb47   :  { %v7395_v42 = vpop.eup %5594  ;;  %v2683_v33 = vmul.f32 %v7385_v38, %v7363_v9  ;;  %vm2688_vm2 = vweird.f32 %v7385_v38  ;;  %vm2732_vm10 = vweird.f32 %v7371_v47  ;;  %vm7430_vm15 = vcmp.eq.f32.partialorder %v2706_v50, 8.507059e+37  ;;  %vm7456_vm3 = vmor %vm2747_vm6, %vm2748_vm9 }
 0xb48   :  { %v7405_v43 = vpop.eup %5596  ;;  %v2698_v1 = vmul.f32 %v7395_v42, %v7365_v27  ;;  %v2744_v44 = vsub.f32 1.0, %v2743_v48  ;;  %vm2703_vm0 = vweird.f32 %v7395_v42  ;;  %v2724_v17 = vor.u32 1.1754944e-38, %v2723_v32  ;;  %vm7465_vm11 = vmor %vm2687_vm7, %vm2688_vm2 }
 0xb49   :  { %v7412_v57 = vpop.eup %5598  ;;  %v2684_v29 = vsub.f32 1.0, %v2683_v33  ;;  %v2753_v55 = vand.u32 2147483648, %v7361_v6  ;;  %vm7437_vm4 = vcmp.eq.f32.partialorder %v2721_v18, 8.507059e+37  ;;  %vm7443_vm14 = vcmp.eq.f32.partialorder %v2736_v26, 8.507059e+37  ;;  %vm7481_vm7 = vmor %vm2702_vm1, %vm2703_vm0 }
 0xb4a   :  { %v7417_v60 = vpop.eup %5600  ;;  %v2699_v39 = vsub.f32 1.0, %v2698_v1  ;;  %v2713_v25 = vmul.f32 %v7412_v57, %v7368_v53  ;;  %v2745_v48 = vmul.f32 %v7377_v4, %v2744_v44  ;;  %vm2718_vm12 = vweird.f32 %v7412_v57 }
 0xb4b   :  { %v5603_v33 = vpop.eup %5602  ;;  %v2685_v49 = vmul.f32 %v7385_v38, %v2684_v29  ;;  %v2766_v59 = vand.u32 2147483647, %v7379_v21  ;;  %5606 = vrcp.f32 %v7387_v63  ;;  %vm7469_vm13 = vcmp.eq.f32.partialorder %v2751_v36, 8.507059e+37  ;;  %vm7493_vm2 = vmor %vm2717_vm5, %vm2718_vm12 }
 0xb4c   :  { %v2700_v1 = vmul.f32 %v7395_v42, %v2699_v39  ;;  %v2714_v35 = vsub.f32 1.0, %v2713_v25  ;;  %v2728_v44 = vmul.f32 %v5603_v33, %v7371_v47  ;;  %v2746_v32 = vadd.f32 %v7377_v4, %v2745_v48  ;;  %v5605_v26 = vpop.eup %5604 }
 0xb4d   :  { %v2686_v29 = vadd.f32 %v7385_v38, %v2685_v49  ;;  %v2768_v39 = vand.u32 2147483648, %v7379_v21  ;;  %v2754_v6 = vor.u32 1.1754944e-38, %v2753_v55  ;;  %vm2762_vm6 = vweird.f32 %v7379_v21 }
 0xb4e   :  { %v2701_v25 = vadd.f32 %v7395_v42, %v2700_v1  ;;  %v2715_v18 = vmul.f32 %v7412_v57, %v2714_v35  ;;  %v2729_v20 = vsub.f32 1.0, %v2728_v44  ;;  %v2739_v35 = vor.u32 1.1754944e-38, %v2738_v14 }
 0xb4f   :  { %v2690_v44 = vsel %vm7465_vm11, %v7385_v38, %v2686_v29  ;;  %vm2733_vm9 = vweird.f32 %v5603_v33  ;;  %v2750_v27 = vsel %vm7456_vm3, %v7377_v4, %v2746_v32  ;;  %v2758_v29 = vmul.f32 %v5605_v26, %v7379_v21 }
 0xb50   :  { %v2716_v36 = vadd.f32 %v7412_v57, %v2715_v18  ;;  %v2730_v14 = vmul.f32 %v5603_v33, %v2729_v20  ;;  %v2705_v55 = vsel %vm7481_vm7, %v7395_v42, %v2701_v25  ;;  %v2769_v20 = vor.u32 1.1754944e-38, %v2768_v39  ;;  %vm2734_vm5 = vmor %vm2732_vm10, %vm2733_vm9 }
 0xb51   :  { %vm7504_vm1 = vcmp.eq.f32.partialorder %v2766_v59, 8.507059e+37  ;;  %v2781_v53 = vand.u32 2147483647, %v7387_v63  ;;  %v2783_v48 = vand.u32 2147483648, %v7387_v63  ;;  %v2695_v4 = vsel %vm7420_vm8, %v7390_v5, %v2690_v44  ;;  %v5607_v59 = vpop.eup %5606 }
 0xb52   :  { %v2720_v18 = vsel %vm7493_vm2, %v7412_v57, %v2716_v36  ;;  %v2731_v42 = vadd.f32 %v5603_v33, %v2730_v14  ;;  %v2759_v32 = vsub.f32 1.0, %v2758_v29  ;;  %vm2777_vm0 = vweird.f32 %v7387_v63 }
 0xb53   :  { %5608 = vrcp.f32 %v7397_v34  ;;  %v2710_v57 = vsel %vm7430_vm15, %v7402_v51, %v2705_v55  ;;  %v2755_v49 = vsel %vm7469_vm13, %v2754_v6, %v2750_v27  ;;  %vm2763_vm12 = vweird.f32 %v5605_v26 }
 0xb54   :  { %v2735_v39 = vsel %vm2734_vm5, %v5603_v33, %v2731_v42  ;;  %v2725_v5 = vsel %vm7437_vm4, %v2724_v17, %v2720_v18  ;;  %v2760_v47 = vmul.f32 %v5605_v26, %v2759_v32  ;;  %v2773_v22 = vmul.f32 %v5607_v59, %v7387_v63  ;;  %vm2764_vm10 = vmor %vm2762_vm6, %vm2763_vm12 }
 0xb55   :  { %vm7525_vm8 = vcmp.eq.f32.partialorder %v2781_v53, 8.507059e+37  ;;  %v2740_v9 = vsel %vm7443_vm14, %v2739_v35, %v2735_v39  ;;  %v2784_v0 = vor.u32 1.1754944e-38, %v2783_v48  ;;  %5610 = vtanh.f32 %v7341_v56 }
 0xb56   :  { %v2818_v51 = vrot.slane %v2695_v4, 4  ;;  %v2761_v33 = vadd.f32 %v5605_v26, %v2760_v47  ;;  %v2774_v1 = vsub.f32 1.0, %v2773_v22  ;;  %5612 = vtanh.f32 %v7344_v7 }
 0xb57   :  { %v2819_v19 = vrot.slane %v2710_v57, 3  ;;  %vm2778_vm15 = vweird.f32 %v5607_v59  ;;  %v2796_v17 = vand.u32 2147483647, %v7397_v34  ;;  %5614 = vtanh.f32 %v7336_v15 }
 0xb58   :  { %v2821_v6 = vrot.slane %v2725_v5, 2  ;;  %v2765_v35 = vsel %vm2764_vm10, %v5605_v26, %v2761_v33  ;;  %v2775_v36 = vmul.f32 %v5607_v59, %v2774_v1  ;;  %5616 = vtanh.f32 %v7347_v16  ;;  %vm2779_vm3 = vmor %vm2777_vm0, %vm2778_vm15 }
 0xb59   :  { %v5609_v50 = vpop.eup %5608  ;;  %vm9322_vm4 = vcmask 1041409   ;;  %v2798_v7 = vand.u32 2147483648, %v7397_v34  ;;  %5618 = vtanh.f32 %v7351_v30  ;;  %v2823_v21 = vrot.slane %v2740_v9, 1 }
 0xb5a   :  { %v2820_v56 = vsel %vm9322_vm4, %v2819_v19, %v2818_v51  ;;  %v2788_v14 = vmul.f32 %v5609_v50, %v7397_v34  ;;  %v2770_v55 = vsel %vm7504_vm1, %v2769_v20, %v2765_v35  ;;  %v2776_v38 = vadd.f32 %v5607_v59, %v2775_v36  ;;  %vm9326_vm7 = vmmov %vm9322_vm4 }
 0xb5b   :  { %5620 = vtanh.f32 %v7355_v62  ;;  %vm9323_vm14 = vcmask 1042434   ;;  %v5611_v26 = vpop.eup %5610  ;;  %vm9324_vm11 = vcmask 1043459   ;;  %v2841_v29 = vrot.slane %v7405_v43, 4 }
 0xb5c   :  { %v2822_v15 = vsel %vm9323_vm14, %v2821_v6, %v2820_v56  ;;  %v2789_v16 = vsub.f32 1.0, %v2788_v14  ;;  %v2842_v30 = vrot.slane %v7417_v60, 3  ;;  %v5613_v18 = vpop.eup %5612  ;;  %v2780_v42 = vsel %vm2779_vm3, %v5607_v59, %v2776_v38  ;;  %vm9327_vm9 = vmmov %vm9323_vm14 }
 0xb5d   :  { %v2824_v27 = vsel %vm9324_vm11, %v2823_v21, %v2822_v15  ;;  %vm2793_vm13 = vweird.f32 %v5609_v50  ;;  %vm9325_vm6 = vcmask 1044484   ;;  %v2844_v62 = vrot.slane %v5611_v26, 2  ;;  %v5615_v25 = vpop.eup %5614  ;;  %vm9329_vm0 = vmmov %vm9324_vm11 }
 0xb5e   :  { %v2825_v20 = vsel %vm9325_vm6, %v2755_v49, %v2824_v27  ;;  %v2785_v53 = vsel %vm7525_vm8, %v2784_v0, %v2780_v42  ;;  %v2790_v48 = vmul.f32 %v5609_v50, %v2789_v16  ;;  %v2826_v63 = vrot.slane %v2770_v55, 7  ;;  %v5617_v32 = vpop.eup %5616  ;;  %vm9330_vm8 = vmmov %vm9325_vm6 }
 0xb5f   :  { %v2843_v4 = vsel %vm9326_vm7, %v2842_v30, %v2841_v29  ;;  %v2846_v43 = vrot.slane %v5613_v18, 1  ;;  %v5619_v39 = vpop.eup %5618  ;;  %vm2792_vm2 = vweird.f32 %v7397_v34  ;;  %vm9328_vm1 = vcmask 1045509  }
 0xb60   :  { %v2845_v57 = vsel %vm9327_vm9, %v2844_v62, %v2843_v4  ;;  %v2791_v60 = vadd.f32 %v5609_v50, %v2790_v48  ;;  %v2827_v59 = vsel %vm9328_vm1, %v2826_v63, %v2825_v20  ;;  %vm2794_vm5 = vmor %vm2792_vm2, %vm2793_vm13  ;;  %v2799_v5 = vor.u32 1.1754944e-38, %v2798_v7 }
 0xb61   :  { %v5621_v49 = vpop.eup %5620  ;;  %v2828_v47 = vrot.slane %v2785_v53, 6  ;;  %v2847_v22 = vsel %vm9329_vm0, %v2846_v43, %v2845_v57  ;;  %v2849_v44 = vrot.slane %v5617_v32, 7  ;;  %vm2797_vm12 = vcmp.eq.f32.partialorder %v2796_v17, 8.507059e+37  ;;  %vm9332_vm15 = vmmov %vm9328_vm1 }
 0xb62   :  { %v2795_v9 = vsel %vm2794_vm5, %v5609_v50, %v2791_v60  ;;  %v2848_v0 = vsel %vm9330_vm8, %v5615_v25, %v2847_v22  ;;  %v2851_v51 = vrot.slane %v5619_v39, 6  ;;  %vm9331_vm10 = vcmask 1046534   ;;  %v9339_v22 = vld [vmem:[#allocation19_spill] sm:$0xff] }
 0xb63   :  { %v2800_v33 = vsel %vm2797_vm12, %v2799_v5, %v2795_v9  ;;  %v2829_v1 = vsel %vm9331_vm10, %v2828_v47, %v2827_v59  ;;  %v2850_v34 = vsel %vm9332_vm15, %v2849_v44, %v2848_v0  ;;  %vm9333_vm4 = vmmov %vm9331_vm10  ;;  %v2853_v35 = vrot.slane %v5621_v49, 5  ;;  %v9340_v9 = vld [vmem:[#allocation20_spill] sm:$0xff] }
 0xb64   :  { %v2830_v19 = vrot.slane %v2800_v33, 5  ;;  %v2852_v6 = vsel %vm9333_vm4, %v2851_v51, %v2850_v34  ;;  %vm9334_vm14 = vcmask 1047559   ;;  %vm9336_vm11 = vcmp.lt.s32.totalorder %v6287_v58, 96  ;;  %v9341_v51 = vld [vmem:[#allocation21_spill] sm:$0xff] }
 0xb65   :  { %vm9335_vm3 = vmmov %vm9334_vm14  ;;  %vm9338_vm13 = vcmask 261120  }
 0xb66   :  { %v2831_v36 = vsel %vm9334_vm14, %v2830_v19, %v2829_v1  ;;  %v2854_v56 = vsel %vm9335_vm3, %v2853_v35, %v2852_v6  ;;  %v9342_v1 = vld [vmem:[#allocation22_spill] sm:$0xff]  ;;  %v9343_v6 = vld [vmem:[#allocation24_spill] sm:$0xff] }
 0xb67   :  { %v2856_v50 = vsel %vm9336_vm11, %v2831_v36, %v2854_v56 }
 0xb68   :  { %2859 = vrot.lane.b32.xlu2 %v2856_v50, %s5850_s3  ;;  %v2857_v7 = vmul.f32 %v2856_v50, %v7302_v11 }
 0xbc2   :  { %v2860_v17 = vpop.permute.xlu2 %2859 }
 0xbc3   :  { %v2862_v14 = vmul.f32 %v2860_v17, %v2856_v50  ;;  %v9344_v17 = vld [vmem:[#allocation25_spill] sm:$0xff] }
 0xbc5   :  { %2864 = vrot.lane.b32.xlu0 %v2862_v14, %s5850_s3 }
 0xc37   :  { %v2865_v21 = vpop.permute.xlu0 %2864 }
 0xc38   :  { %v7572_v55 = vadd.f32 %v2865_v21, %v2857_v7 }
 0xc3a   :  { %5622 = vtanh.f32 %v7572_v55 }
 0xc40   :  { %v5623_v38 = vpop.eup %5622 }
 0xc41   :  { %2870 = vrot.lane.b32.xlu1 %v5623_v38, %s5850_s3 }
 0xcb3   :  { %v2871_v15 = vpop.permute.xlu1 %2870 }
 0xcb4   :  { %v7576_v26 = vmul.f32 %v2871_v15, %v2856_v50 }
 0xcb6   :  { %9337 = vst [vmem:[#allocation16_spill] sm:$0xff] %v7576_v26  ;;  %2922 = vrot.lane.b32.xlu2 %v7576_v26, %s5851_s5 }
 0xd10   :  { %v2923_v16 = vpop.permute.xlu2 %2922 }
 0xd11   :  { %v2924_v27 = vsel %vm9338_vm13, %v2923_v16, 0 }
 0xd12   :  { %v2946_v29 = vand.u32 4294901760, %v2924_v27 }
 0xd14   :  { %v2947_v30 = vsub.f32 %v2924_v27, %v2946_v29  ;;  %2992 = vmatmul.f32.vlgmr.msra.gmra.mxu3 %v2946_v29 }
 0xd15   :  { %3524 = vmatpush.msra.mxu3 %v5971_v40 }
 0xd16   :  { %v2948_v11 = vand.u32 4294901760, %v2947_v30  ;;  %3022 = vmatmul.f32.vlgmr.msra.gmra.mxu0 %v2947_v30 }
 0xd17   :  { %3526 = vmatpush.msra.mxu3 %v6009_v61  ;;  %3553 = vmatpush.msra.mxu0 %v5980_v46 }
 0xd18   :  { %v2949_v18 = vsub.f32 %v2947_v30, %v2948_v11  ;;  %3049 = vmatmul.f32.vlgmr.msra.gmra.mxu1 %v2948_v11 }
 0xd19   :  { %3528 = vmatpush.msra.mxu3 %v6031_v8  ;;  %3584 = vmatpush.msra.mxu1 %v5971_v40 }
 0xd1a   :  { %v2950_v42 = vand.u32 4294901760, %v2949_v18  ;;  %3557 = vmatpush.msra.mxu0 %v6020_v2 }
 0xd1b   :  { %3530 = vmatpush.msra.mxu3 %v6041_v12  ;;  %3586 = vmatpush.msra.mxu1 %v6009_v61 }
 0xd1c   :  { %2951 = vmatmul.f32.vlgmr.msra.gmra.mxu2 %v2950_v42  ;;  %3107 = vmatmul.f32.vlgmr.msrb.gmra.mxu3 %v2946_v29 }
 0xd1d   :  { %3495 = vmatpush.msra.mxu2 %v9247_v41  ;;  %3588 = vmatpush.msra.mxu1 %v6031_v8 }
 0xd1e   :  { %3561 = vmatpush.msra.mxu0 %v9159_v28  ;;  %3942 = vmatpush.msrb.mxu3 %v5991_v52 }
 0xd1f   :  { %3498 = vmatpush.msra.mxu2 %v9248_v10  ;;  %3590 = vmatpush.msra.mxu1 %v6041_v12 }
 0xd20   :  { %3565 = vmatpush.msra.mxu0 %v9161_v31  ;;  %3948 = vmatpush.msrb.mxu3 %v9158_v24 }
 0xd21   :  { %3501 = vmatpush.msra.mxu2 %v9249_v54 }
 0xd22   :  { %3954 = vmatpush.msrb.mxu3 %v9160_v37 }
 0xd23   :  { %3504 = vmatpush.msra.mxu2 %v9250_v13 }
 0xd24   :  { %3082 = vmatmul.f32.vlgmr.msrb.gmra.mxu2 %v2946_v29  ;;  %3960 = vmatpush.msrb.mxu3 %v9162_v3 }
 0xd25   :  { %3909 = vmatpush.msrb.mxu2 %v5971_v40 }
 0xd27   :  { %3911 = vmatpush.msrb.mxu2 %v6009_v61 }
 0xd29   :  { %3913 = vmatpush.msrb.mxu2 %v6031_v8 }
 0xd2b   :  { %3915 = vmatpush.msrb.mxu2 %v6041_v12 }
 0xd93   :  { %v3023_v62 = vpop.f32.mrf.mxu0 }
 0xd95   :  { %v3050_v53 = vpop.f32.mrf.mxu1 }
 0xd97   :  { %v2993_v52 = vpop.f32.mrf.mxu3 }
 0xd9f   :  { %v2952_v20 = vpop.f32.mrf.mxu2  ;;  %v3108_v4 = vpop.f32.mrf.mxu3 }
 0xda0   :  { %v2994_v24 = vadd.f32 %v2993_v52, %v2952_v20 }
 0xda2   :  { %v3024_v25 = vadd.f32 %v3023_v62, %v2994_v24 }
 0xda4   :  { %v3051_v37 = vadd.f32 %v3050_v53, %v3024_v25 }
 0xda7   :  { %v3083_v48 = vpop.f32.mrf.mxu2 }
 0xda8   :  { %v3084_v63 = vadd.f32 %v3083_v48, %v3051_v37 }
 0xdaa   :  { %v3109_v32 = vadd.f32 %v3108_v4, %v3084_v63 }
 0xdac   :  { %v3112_v3 = vrot.slane %v3109_v32, 3  ;;  %v3113_v57 = vrot.slane %v3109_v32, 4  ;;  %v3114_v43 = vrot.slane %v3109_v32, 5  ;;  %v3115_v39 = vrot.slane %v3109_v32, 6 }
 0xdad   :  { %v3116_v60 = vrot.slane %v3109_v32, 7  ;;  %v3117_v59 = vrot.slane %v3109_v32, 1  ;;  %v3118_v49 = vrot.slane %v3109_v32, 2  ;;  %v7606_v5 = vadd.f32 %v3109_v32, %v9297_v23 }
 0xdae   :  { %v3127_v47 = vadd.f32 %v3112_v3, %v6187_v45  ;;  %v3128_v44 = vadd.f32 %v3113_v57, %v9339_v22  ;;  %v7611_v0 = vadd.f32 %v3114_v43, %v9340_v9  ;;  %v7614_v33 = vadd.f32 %v3115_v39, %v9341_v51 }
 0xdaf   :  { %v7617_v34 = vadd.f32 %v3116_v60, %v9342_v1  ;;  %v5346_v19 = vmul.f32 -1.442695, %v7606_v5  ;;  %v7621_v35 = vadd.f32 %v3117_v59, %v9343_v6  ;;  %v7625_v14 = vadd.f32 %v3118_v49, %v9344_v17 }
 0xdb0   :  { %v5341_v36 = vmul.f32 -1.442695, %v3127_v47  ;;  %v5342_v56 = vmul.f32 -1.442695, %v3128_v44  ;;  %v5343_v50 = vmul.f32 -1.442695, %v7611_v0 }
 0xdb1   :  { %v5344_v7 = vmul.f32 -1.442695, %v7614_v33  ;;  %5624 = vpow2.f32 %v5346_v19  ;;  %v5345_v21 = vmul.f32 -1.442695, %v7617_v34  ;;  %v5347_v38 = vmul.f32 -1.442695, %v7621_v35 }
 0xdb2   :  { %5626 = vpow2.f32 %v5341_v36  ;;  %v5348_v15 = vmul.f32 -1.442695, %v7625_v14 }
 0xdb3   :  { %5628 = vpow2.f32 %v5342_v56 }
 0xdb4   :  { %5630 = vpow2.f32 %v5343_v50 }
 0xdb5   :  { %5632 = vpow2.f32 %v5344_v7 }
 0xdb6   :  { %5634 = vpow2.f32 %v5345_v21 }
 0xdb7   :  { %v5625_v16 = vpop.eup %5624  ;;  %5636 = vpow2.f32 %v5347_v38 }
 0xdb8   :  { %v5627_v27 = vpop.eup %5626  ;;  %v7631_v29 = vadd.f32 1.0, %v5625_v16  ;;  %5638 = vpow2.f32 %v5348_v15 }
 0xdb9   :  { %v5629_v30 = vpop.eup %5628  ;;  %v7633_v11 = vadd.f32 1.0, %v5627_v27 }
 0xdba   :  { %v5631_v18 = vpop.eup %5630  ;;  %v7635_v42 = vadd.f32 1.0, %v5629_v30  ;;  %5640 = vrcp.f32 %v7631_v29  ;;  %vm3247_vm2 = vweird.f32 %v7631_v29 }
 0xdbb   :  { %v5633_v52 = vpop.eup %5632  ;;  %v7638_v20 = vadd.f32 1.0, %v5631_v18  ;;  %5642 = vrcp.f32 %v7633_v11  ;;  %v3178_v37 = vand.u32 2147483648, %v7633_v11  ;;  %vm3172_vm6 = vweird.f32 %v7633_v11 }
 0xdbc   :  { %v5635_v24 = vpop.eup %5634  ;;  %v7641_v62 = vadd.f32 1.0, %v5633_v52  ;;  %5644 = vrcp.f32 %v7635_v42  ;;  %v3193_v4 = vand.u32 2147483648, %v7635_v42  ;;  %v3176_v3 = vand.u32 2147483647, %v7633_v11 }
 0xdbd   :  { %v7644_v25 = vadd.f32 1.0, %v5635_v24  ;;  %5646 = vtanh.f32 %v3127_v47  ;;  %v5637_v53 = vpop.eup %5636  ;;  %v7664_v59 = vor.u32 1.1754944e-38, %v3178_v37  ;;  %vm3187_vm7 = vweird.f32 %v7635_v42 }
 0xdbe   :  { %5648 = vrcp.f32 %v7638_v20  ;;  %v5639_v48 = vpop.eup %5638  ;;  %v7660_v39 = vadd.f32 1.0, %v5637_v53  ;;  %v3191_v49 = vand.u32 2147483647, %v7635_v42  ;;  %vm3202_vm9 = vweird.f32 %v7638_v20 }
 0xdbf   :  { %5650 = vtanh.f32 %v3128_v44  ;;  %v7670_v44 = vadd.f32 1.0, %v5639_v48  ;;  %v3206_v36 = vand.u32 2147483647, %v7638_v20  ;;  %v3194_v7 = vor.u32 1.1754944e-38, %v3193_v4 }
 0xdc0   :  { %v7648_v63 = vpop.eup %5640  ;;  %5652 = vrcp.f32 %v7641_v62  ;;  %v3208_v21 = vand.u32 2147483648, %v7638_v20  ;;  %vm3217_vm1 = vweird.f32 %v7641_v62  ;;  %v3221_v30 = vand.u32 2147483647, %v7641_v62 }
 0xdc1   :  { %v7652_v32 = vpop.eup %5642  ;;  %5654 = vrcp.f32 %v7644_v25  ;;  %v3243_v38 = vmul.f32 %v7648_v63, %v7631_v29  ;;  %v3223_v18 = vand.u32 2147483648, %v7641_v62  ;;  %vm7691_vm0 = vcmp.eq.f32.partialorder %v3176_v3, 8.507059e+37 }
 0xdc2   :  { %v7658_v43 = vpop.eup %5644  ;;  %v3168_v60 = vmul.f32 %v7652_v32, %v7633_v11  ;;  %vm3173_vm5 = vweird.f32 %v7652_v32  ;;  %vm7696_vm8 = vcmp.eq.f32.partialorder %v3191_v49, 8.507059e+37  ;;  %vm3232_vm10 = vweird.f32 %v7644_v25 }
 0xdc3   :  { %v7668_v47 = vpop.eup %5646  ;;  %v3183_v19 = vmul.f32 %v7658_v43, %v7635_v42  ;;  %vm3188_vm12 = vweird.f32 %v7658_v43  ;;  %v3244_v48 = vsub.f32 1.0, %v3243_v38  ;;  %vm7702_vm15 = vcmp.eq.f32.partialorder %v3206_v36, 8.507059e+37  ;;  %vm7719_vm14 = vmor %vm3172_vm6, %vm3173_vm5 }
 0xdc4   :  { %v7676_v56 = vpop.eup %5648  ;;  %v3169_v50 = vsub.f32 1.0, %v3168_v60  ;;  %v3236_v57 = vand.u32 2147483647, %v7644_v25  ;;  %v3238_v17 = vand.u32 2147483648, %v7644_v25  ;;  %vm3248_vm11 = vweird.f32 %v7648_v63  ;;  %vm7729_vm13 = vmor %vm3187_vm7, %vm3188_vm12 }
 0xdc5   :  { %v7682_v15 = vpop.eup %5650  ;;  %v3184_v16 = vsub.f32 1.0, %v3183_v19  ;;  %v3198_v27 = vmul.f32 %v7676_v56, %v7638_v20  ;;  %v3245_v38 = vmul.f32 %v7648_v63, %v3244_v48  ;;  %vm3203_vm4 = vweird.f32 %v7676_v56 }
 0xdc6   :  { %v5653_v52 = vpop.eup %5652  ;;  %v3170_v24 = vmul.f32 %v7652_v32, %v3169_v50  ;;  %5656 = vrcp.f32 %v7660_v39  ;;  %vm7743_vm7 = vmor %vm3202_vm9, %vm3203_vm4  ;;  %vm7753_vm5 = vcmp.eq.f32.partialorder %v3221_v30, 8.507059e+37  ;;  %vm7772_vm4 = vcmp.eq.f32.partialorder %v3236_v57, 8.507059e+37 }
 0xdc7   :  { %v5655_v4 = vpop.eup %5654  ;;  %v3185_v60 = vmul.f32 %v7658_v43, %v3184_v16  ;;  %v3199_v19 = vsub.f32 1.0, %v3198_v27  ;;  %v3213_v3 = vmul.f32 %v5653_v52, %v7641_v62  ;;  %vm3218_vm3 = vweird.f32 %v5653_v52  ;;  %vm7761_vm9 = vmor %vm3247_vm2, %vm3248_vm11 }
 0xdc8   :  { %v3171_v49 = vadd.f32 %v7652_v32, %v3170_v24  ;;  %v3228_v26 = vmul.f32 %v5655_v4, %v7644_v25  ;;  %vm3233_vm6 = vweird.f32 %v5655_v4  ;;  %v3209_v27 = vor.u32 1.1754944e-38, %v3208_v21  ;;  %vm7768_vm12 = vmor %vm3217_vm1, %vm3218_vm3 }
 0xdc9   :  { %v3186_v23 = vadd.f32 %v7658_v43, %v3185_v60  ;;  %v3200_v16 = vmul.f32 %v7676_v56, %v3199_v19  ;;  %v3214_v36 = vsub.f32 1.0, %v3213_v3  ;;  %v3253_v19 = vand.u32 2147483648, %v7631_v29  ;;  %vm7786_vm2 = vmor %vm3232_vm10, %vm3233_vm6 }
 0xdca   :  { %v3229_v24 = vsub.f32 1.0, %v3228_v26  ;;  %v3175_v26 = vsel %vm7719_vm14, %v7652_v32, %v3171_v49  ;;  %v3239_v30 = vor.u32 1.1754944e-38, %v3238_v17  ;;  %5658 = vrcp.f32 %v7670_v44 }
 0xdcb   :  { %v3201_v11 = vadd.f32 %v7676_v56, %v3200_v16  ;;  %v3215_v60 = vmul.f32 %v5653_v52, %v3214_v36  ;;  %v3190_v3 = vsel %vm7729_vm13, %v7658_v43, %v3186_v23  ;;  %v7748_v16 = vadd.f32 %v7648_v63, %v3245_v38 }
 0xdcc   :  { %v3230_v1 = vmul.f32 %v5655_v4, %v3229_v24  ;;  %v3224_v43 = vor.u32 1.1754944e-38, %v3223_v18  ;;  %v3180_v38 = vsel %vm7691_vm0, %v7664_v59, %v3175_v26  ;;  %v3195_v24 = vsel %vm7696_vm8, %v3194_v7, %v3190_v3  ;;  %v5657_v17 = vpop.eup %5656 }
 0xdcd   :  { %v3205_v36 = vsel %vm7743_vm7, %v7676_v56, %v3201_v11  ;;  %v3216_v32 = vadd.f32 %v5653_v52, %v3215_v60  ;;  %v3250_v7 = vsel %vm7761_vm9, %v7648_v63, %v7748_v16  ;;  %v3254_v18 = vor.u32 1.1754944e-38, %v3253_v19 }
 0xdce   :  { %v3231_v56 = vadd.f32 %v5655_v4, %v3230_v1  ;;  %v3210_v57 = vsel %vm7702_vm15, %v3209_v27, %v3205_v36  ;;  %vm3262_vm1 = vweird.f32 %v7660_v39  ;;  %v3266_v53 = vand.u32 2147483647, %v7660_v39 }
 0xdcf   :  { %v3220_v62 = vsel %vm7768_vm12, %v5653_v52, %v3216_v32  ;;  %v3258_v52 = vmul.f32 %v5657_v17, %v7660_v39  ;;  %v9367_v37 = vand.u32 2147483647, %v7631_v29  ;;  %5660 = vtanh.f32 %v7611_v0 }
 0xdd0   :  { %v3235_v59 = vsel %vm7786_vm2, %v5655_v4, %v3231_v56  ;;  %v3225_v25 = vsel %vm7753_vm5, %v3224_v43, %v3220_v62  ;;  %v3268_v4 = vand.u32 2147483648, %v7660_v39  ;;  %v3303_v63 = vrot.slane %v3180_v38, 5  ;;  %v5659_v3 = vpop.eup %5658 }
 0xdd1   :  { %vm7806_vm0 = vcmp.eq.f32.partialorder %v9367_v37, 8.507059e+37  ;;  %v3304_v48 = vrot.slane %v3195_v24, 4  ;;  %v3240_v11 = vsel %vm7772_vm4, %v3239_v30, %v3235_v59  ;;  %v3259_v60 = vsub.f32 1.0, %v3258_v52 }
 0xdd2   :  { %5662 = vtanh.f32 %v7614_v33  ;;  %v3306_v19 = vrot.slane %v3210_v57, 3  ;;  %vm3263_vm8 = vweird.f32 %v5657_v17  ;;  %vm9370_vm10 = vcmask 1041409  }
 0xdd3   :  { %5664 = vtanh.f32 %v7617_v34  ;;  %v3305_v29 = vsel %vm9370_vm10, %v3304_v48, %v3303_v63  ;;  %v3308_v26 = vrot.slane %v3225_v25, 2  ;;  %v3260_v42 = vmul.f32 %v5657_v17, %v3259_v60  ;;  %vm3264_vm11 = vmor %vm3262_vm1, %vm3263_vm8 }
 0xdd4   :  { %5666 = vtanh.f32 %v7606_v5  ;;  %vm9371_vm15 = vcmask 1042434   ;;  %v3326_v16 = vrot.slane %v7668_v47, 5  ;;  %vm7820_vm14 = vcmp.eq.f32.partialorder %v3266_v53, 8.507059e+37  ;;  %vm9376_vm6 = vmmov %vm9370_vm10 }
 0xdd5   :  { %v3307_v0 = vsel %vm9371_vm15, %v3306_v19, %v3305_v29  ;;  %v3273_v33 = vmul.f32 %v5659_v3, %v7670_v44  ;;  %5668 = vtanh.f32 %v7621_v35  ;;  %vm9374_vm3 = vcmask 1043459   ;;  %v5661_v49 = vpop.eup %5660  ;;  %vm9377_vm5 = vmmov %vm9371_vm15 }
 0xdd6   :  { %v3309_v34 = vsel %vm9374_vm3, %v3308_v26, %v3307_v0  ;;  %v3261_v27 = vadd.f32 %v5657_v17, %v3260_v42  ;;  %5670 = vtanh.f32 %v7625_v14  ;;  %v3310_v32 = vrot.slane %v3240_v11, 1  ;;  %vm9379_vm4 = vmmov %vm9374_vm3 }
 0xdd7   :  { %v3327_v5 = vrot.slane %v7682_v15, 4  ;;  %v3269_v47 = vor.u32 1.1754944e-38, %v3268_v4  ;;  %v3274_v23 = vsub.f32 1.0, %v3273_v33  ;;  %v3281_v20 = vand.u32 2147483647, %v7670_v44 }
 0xdd8   :  { %v3283_v43 = vand.u32 2147483648, %v7670_v44  ;;  %v5663_v35 = vpop.eup %5662  ;;  %v3265_v56 = vsel %vm3264_vm11, %v5657_v17, %v3261_v27  ;;  %vm9375_vm13 = vcmask 1044484   ;;  %v3329_v30 = vrot.slane %v5661_v49, 3 }
 0xdd9   :  { %v3311_v21 = vsel %vm9375_vm13, %v3310_v32, %v3309_v34  ;;  %v3328_v14 = vsel %vm9376_vm6, %v3327_v5, %v3326_v16  ;;  %v5665_v38 = vpop.eup %5664  ;;  %v3270_v15 = vsel %vm7820_vm14, %v3269_v47, %v3265_v56  ;;  %v3275_v24 = vmul.f32 %v5659_v3, %v3274_v23  ;;  %vm9380_vm1 = vmmov %vm9375_vm13 }
 0xdda   :  { %vm3278_vm7 = vweird.f32 %v5659_v3  ;;  %v3331_v39 = vrot.slane %v5663_v35, 2  ;;  %v5667_v62 = vpop.eup %5666  ;;  %v3255_v1 = vsel %vm7806_vm0, %v3254_v18, %v3250_v7  ;;  %v3330_v57 = vsel %vm9377_vm5, %v3329_v30, %v3328_v14 }
 0xddb   :  { %v3333_v59 = vrot.slane %v5665_v38, 1  ;;  %v5669_v17 = vpop.eup %5668  ;;  %v3276_v25 = vadd.f32 %v5659_v3, %v3275_v24  ;;  %vm3277_vm9 = vweird.f32 %v7670_v44  ;;  %vm9378_vm12 = vcmask 1045509  }
 0xddc   :  { %v3312_v52 = vsel %vm9378_vm12, %v3255_v1, %v3311_v21  ;;  %v3332_v53 = vsel %vm9379_vm4, %v3331_v39, %v3330_v57  ;;  %v5671_v37 = vpop.eup %5670  ;;  %vm3279_vm2 = vmor %vm3277_vm9, %vm3278_vm7  ;;  %v3284_v4 = vor.u32 1.1754944e-38, %v3283_v43  ;;  %v3313_v63 = vrot.slane %v3270_v15, 7 }
 0xddd   :  { %v3334_v48 = vsel %vm9380_vm1, %v3333_v59, %v3332_v53  ;;  %v3336_v11 = vrot.slane %v5669_v17, 7  ;;  %v3280_v50 = vsel %vm3279_vm2, %v5659_v3, %v3276_v25  ;;  %vm3282_vm0 = vcmp.eq.f32.partialorder %v3281_v20, 8.507059e+37  ;;  %vm9381_vm8 = vmmov %vm9378_vm12  ;;  %v9388_v59 = vld [vmem:[#allocation22_spill] sm:$0xff]  ;;  %v9389_v25 = vld [vmem:[#allocation23_spill] sm:$0xff] }
 0xdde   :  { %v3335_v7 = vsel %vm9381_vm8, %v5667_v62, %v3334_v48  ;;  %v3285_v18 = vsel %vm3282_vm0, %v3284_v4, %v3280_v50  ;;  %vm9382_vm10 = vcmask 1046534   ;;  %v3338_v29 = vrot.slane %v5671_v37, 6 }
 0xddf   :  { %v3314_v60 = vsel %vm9382_vm10, %v3313_v63, %v3312_v52  ;;  %vm9383_vm15 = vmmov %vm9382_vm10  ;;  %v3315_v19 = vrot.slane %v3285_v18, 6  ;;  %vm9384_vm14 = vcmask 1047559   ;;  %vm9386_vm11 = vcmp.lt.s32.totalorder %v6287_v58, 96 }
 0xde0   :  { %v3337_v44 = vsel %vm9383_vm15, %v3336_v11, %v3335_v7  ;;  %vm9385_vm3 = vmmov %vm9384_vm14  ;;  %vm9387_vm13 = vcmask 261120   ;;  %v9390_v11 = vld [vmem:[#allocation25_spill] sm:$0xff] }
 0xde1   :  { %v3316_v26 = vsel %vm9384_vm14, %v3315_v19, %v3314_v60  ;;  %v3339_v42 = vsel %vm9385_vm3, %v3338_v29, %v3337_v44 }
 0xde2   :  { %v3341_v0 = vsel %vm9386_vm11, %v3316_v26, %v3339_v42 }
 0xde3   :  { %3344 = vrot.lane.b32.xlu0 %v3341_v0, %s5850_s3  ;;  %v3342_v36 = vmul.f32 %v3341_v0, %v7572_v55 }
 0xe55   :  { %v3345_v3 = vpop.permute.xlu0 %3344 }
 0xe56   :  { %v3347_v16 = vmul.f32 %v3345_v3, %v3341_v0 }
 0xe58   :  { %3349 = vrot.lane.b32.xlu1 %v3347_v16, %s5850_s3 }
 0xeca   :  { %v3350_v33 = vpop.permute.xlu1 %3349 }
 0xecb   :  { %v7855_v34 = vadd.f32 %v3350_v33, %v3342_v36 }
 0xecd   :  { %5672 = vtanh.f32 %v7855_v34 }
 0xed3   :  { %v5673_v27 = vpop.eup %5672 }
 0xed4   :  { %3355 = vrot.lane.b32.xlu2 %v5673_v27, %s5850_s3 }
 0xf2e   :  { %v3356_v32 = vpop.permute.xlu2 %3355 }
 0xf2f   :  { %v7859_v5 = vmul.f32 %v3356_v32, %v3341_v0 }
 0xf31   :  { %3407 = vrot.lane.b32.xlu0 %v7859_v5, %s5851_s5 }
 0xfa3   :  { %v3408_v49 = vpop.permute.xlu0 %3407 }
 0xfa4   :  { %v3409_v47 = vsel %vm9387_vm13, %v3408_v49, 0 }
 0xfa5   :  { %v3431_v23 = vand.u32 4294901760, %v3409_v47 }
 0xfa7   :  { %v3432_v20 = vsub.f32 %v3409_v47, %v3431_v23  ;;  %3477 = vmatmul.f32.vlgmr.msrb.gmra.mxu1 %v3431_v23 }
 0xfa8   :  { %4009 = vmatpush.msrb.mxu1 %v5971_v40 }
 0xfa9   :  { %v3433_v55 = vand.u32 4294901760, %v3432_v20  ;;  %3507 = vmatmul.f32.vlgmr.msra.gmra.mxu2 %v3432_v20 }
 0xfaa   :  { %4011 = vmatpush.msrb.mxu1 %v6009_v61  ;;  %4038 = vmatpush.msra.mxu2 %v5980_v46 }
 0xfab   :  { %v3434_v43 = vsub.f32 %v3432_v20, %v3433_v55  ;;  %3534 = vmatmul.f32.vlgmr.msra.gmra.mxu3 %v3433_v55 }
 0xfac   :  { %4013 = vmatpush.msrb.mxu1 %v6031_v8  ;;  %4069 = vmatpush.msra.mxu3 %v5971_v40 }
 0xfad   :  { %v3435_v35 = vand.u32 4294901760, %v3434_v43  ;;  %4042 = vmatpush.msra.mxu2 %v6020_v2 }
 0xfae   :  { %4015 = vmatpush.msrb.mxu1 %v6041_v12  ;;  %4071 = vmatpush.msra.mxu3 %v6009_v61 }
 0xfaf   :  { %3436 = vmatmul.f32.vlgmr.msrb.gmra.mxu0 %v3435_v35  ;;  %3592 = vmatmul.f32.vlgmr.msra.gmra.mxu1 %v3431_v23 }
 0xfb0   :  { %3980 = vmatpush.msrb.mxu0 %v9247_v41  ;;  %4073 = vmatpush.msra.mxu3 %v6031_v8 }
 0xfb1   :  { %4046 = vmatpush.msra.mxu2 %v9159_v28 }
 0xfb2   :  { %3983 = vmatpush.msrb.mxu0 %v9248_v10  ;;  %4075 = vmatpush.msra.mxu3 %v6041_v12 }
 0xfb3   :  { %4050 = vmatpush.msra.mxu2 %v9161_v31 }
 0xfb4   :  { %3986 = vmatpush.msrb.mxu0 %v9249_v54 }
 0xfb6   :  { %3989 = vmatpush.msrb.mxu0 %v9250_v13 }
 0xfb7   :  { %3567 = vmatmul.f32.vlgmr.msra.gmra.mxu0 %v3431_v23 }
0x1024   :  { %v3478_v40 = vpop.f32.mrf.mxu1 }
0x102c   :  { %v3437_v46 = vpop.f32.mrf.mxu0  ;;  %v3508_v2 = vpop.f32.mrf.mxu2 }
0x102d   :  { %v3479_v61 = vadd.f32 %v3478_v40, %v3437_v46  ;;  %v3593_v14 = vpop.f32.mrf.mxu1 }
0x102e   :  { %v3535_v56 = vpop.f32.mrf.mxu3 }
0x102f   :  { %v3509_v41 = vadd.f32 %v3508_v2, %v3479_v61 }
0x1031   :  { %v3536_v8 = vadd.f32 %v3535_v56, %v3509_v41 }
0x1034   :  { %v3568_v21 = vpop.f32.mrf.mxu0 }
0x1035   :  { %v3569_v28 = vadd.f32 %v3568_v21, %v3536_v8 }
0x1037   :  { %v3594_v10 = vadd.f32 %v3593_v14, %v3569_v28 }
0x1039   :  { %v3597_v30 = vrot.slane %v3594_v10, 2  ;;  %v3598_v12 = vrot.slane %v3594_v10, 3  ;;  %v3599_v38 = vrot.slane %v3594_v10, 4  ;;  %v3600_v31 = vrot.slane %v3594_v10, 5 }
0x103a   :  { %v3601_v15 = vrot.slane %v3594_v10, 6  ;;  %v3602_v54 = vrot.slane %v3594_v10, 7  ;;  %v3603_v24 = vrot.slane %v3594_v10, 1  ;;  %v7881_v13 = vadd.f32 %v3594_v10, %v9343_v6 }
0x103b   :  { %v3612_v39 = vadd.f32 %v3597_v30, %v6187_v45  ;;  %v3613_v62 = vadd.f32 %v3598_v12, %v9339_v22  ;;  %v7886_v1 = vadd.f32 %v3599_v38, %v9340_v9  ;;  %v7889_v57 = vadd.f32 %v3600_v31, %v9341_v51 }
0x103c   :  { %v7892_v17 = vadd.f32 %v3601_v15, %v9388_v59  ;;  %v7895_v52 = vadd.f32 %v3602_v54, %v9389_v25  ;;  %v5355_v53 = vmul.f32 -1.442695, %v7881_v13  ;;  %v7901_v50 = vadd.f32 %v3603_v24, %v9390_v11 }
0x103d   :  { %v5349_v37 = vmul.f32 -1.442695, %v3612_v39  ;;  %v5350_v4 = vmul.f32 -1.442695, %v3613_v62  ;;  %v5351_v63 = vmul.f32 -1.442695, %v7886_v1 }
0x103e   :  { %v5352_v48 = vmul.f32 -1.442695, %v7889_v57  ;;  %5674 = vpow2.f32 %v5355_v53  ;;  %v5353_v7 = vmul.f32 -1.442695, %v7892_v17  ;;  %v5354_v18 = vmul.f32 -1.442695, %v7895_v52 }
0x103f   :  { %5676 = vpow2.f32 %v5349_v37  ;;  %v5356_v60 = vmul.f32 -1.442695, %v7901_v50 }
0x1040   :  { %5678 = vpow2.f32 %v5350_v4 }
0x1041   :  { %5680 = vpow2.f32 %v5351_v63 }
0x1042   :  { %5682 = vpow2.f32 %v5352_v48 }
0x1043   :  { %5684 = vpow2.f32 %v5353_v7 }
0x1044   :  { %v5675_v44 = vpop.eup %5674  ;;  %5686 = vpow2.f32 %v5354_v18 }
0x1045   :  { %v5677_v19 = vpop.eup %5676  ;;  %5688 = vtanh.f32 %v3612_v39  ;;  %v7912_v36 = vadd.f32 1.0, %v5675_v44 }
0x1046   :  { %v5679_v29 = vpop.eup %5678  ;;  %v7906_v26 = vadd.f32 1.0, %v5677_v19  ;;  %5690 = vpow2.f32 %v5356_v60 }
0x1047   :  { %v5681_v42 = vpop.eup %5680  ;;  %v7908_v0 = vadd.f32 1.0, %v5679_v29  ;;  %v3751_v40 = vand.u32 2147483647, %v7912_v36 }
0x1048   :  { %v5683_v3 = vpop.eup %5682  ;;  %v7910_v16 = vadd.f32 1.0, %v5681_v42  ;;  %5692 = vrcp.f32 %v7906_v26  ;;  %v3663_v23 = vand.u32 2147483648, %v7906_v26  ;;  %v3661_v2 = vand.u32 2147483647, %v7906_v26 }
0x1049   :  { %v5685_v33 = vpop.eup %5684  ;;  %v7915_v27 = vadd.f32 1.0, %v5683_v3  ;;  %5694 = vrcp.f32 %v7908_v0  ;;  %v3678_v35 = vand.u32 2147483648, %v7908_v0  ;;  %v3676_v41 = vand.u32 2147483647, %v7908_v0 }
0x104a   :  { %v5687_v32 = vpop.eup %5686  ;;  %v7918_v49 = vadd.f32 1.0, %v5685_v33  ;;  %5696 = vtanh.f32 %v3613_v62  ;;  %v3693_v56 = vand.u32 2147483648, %v7910_v16  ;;  %vm3657_vm6 = vweird.f32 %v7906_v26 }
0x104b   :  { %5698 = vrcp.f32 %v7910_v16  ;;  %v7921_v47 = vpop.eup %5688  ;;  %v7925_v55 = vadd.f32 1.0, %v5687_v32  ;;  %v7943_v21 = vor.u32 1.1754944e-38, %v3663_v23  ;;  %vm3672_vm7 = vweird.f32 %v7908_v0 }
0x104c   :  { %5700 = vrcp.f32 %v7912_v36  ;;  %v5691_v20 = vpop.eup %5690  ;;  %vm3687_vm5 = vweird.f32 %v7910_v16  ;;  %v3691_v30 = vand.u32 2147483647, %v7910_v16  ;;  %v3708_v12 = vand.u32 2147483648, %v7915_v27 }
0x104d   :  { %5702 = vrcp.f32 %v7915_v27  ;;  %v7956_v31 = vadd.f32 1.0, %v5691_v20  ;;  %v3679_v54 = vor.u32 1.1754944e-38, %v3678_v35  ;;  %vm7964_vm12 = vcmp.eq.f32.partialorder %v3661_v2, 8.507059e+37 }
0x104e   :  { %v7928_v43 = vpop.eup %5692  ;;  %5704 = vrcp.f32 %v7918_v49  ;;  %vm7968_vm4 = vcmp.eq.f32.partialorder %v3676_v41, 8.507059e+37  ;;  %v3694_v4 = vor.u32 1.1754944e-38, %v3693_v56  ;;  %vm3702_vm2 = vweird.f32 %v7915_v27 }
0x104f   :  { %v7933_v46 = vpop.eup %5694  ;;  %v3653_v61 = vmul.f32 %v7928_v43, %v7906_v26  ;;  %5706 = vrcp.f32 %v7925_v55  ;;  %vm3658_vm9 = vweird.f32 %v7928_v43  ;;  %v3706_v63 = vand.u32 2147483647, %v7915_v27 }
0x1050   :  { %v7940_v8 = vpop.eup %5696  ;;  %v3668_v28 = vmul.f32 %v7933_v46, %v7908_v0  ;;  %vm3673_vm1 = vweird.f32 %v7933_v46  ;;  %vm3717_vm0 = vweird.f32 %v7918_v49  ;;  %vm7982_vm8 = vcmp.eq.f32.partialorder %v3691_v30, 8.507059e+37  ;;  %vm7996_vm10 = vmor %vm3657_vm6, %vm3658_vm9 }
0x1051   :  { %v7948_v14 = vpop.eup %5698  ;;  %v3654_v10 = vsub.f32 1.0, %v3653_v61  ;;  %v3709_v29 = vor.u32 1.1754944e-38, %v3708_v12  ;;  %v3721_v3 = vand.u32 2147483647, %v7918_v49  ;;  %v3723_v20 = vand.u32 2147483648, %v7918_v49  ;;  %vm8012_vm11 = vmor %vm3672_vm7, %vm3673_vm1 }
0x1052   :  { %v7954_v38 = vpop.eup %5700  ;;  %v3669_v15 = vsub.f32 1.0, %v3668_v28  ;;  %v3683_v24 = vmul.f32 %v7948_v14, %v7910_v16  ;;  %vm3688_vm15 = vweird.f32 %v7948_v14  ;;  %vm8001_vm14 = vcmp.eq.f32.partialorder %v3706_v63, 8.507059e+37 }
0x1053   :  { %v7960_v39 = vpop.eup %5702  ;;  %v3655_v62 = vmul.f32 %v7928_v43, %v3654_v10  ;;  %vm3732_vm3 = vweird.f32 %v7925_v55  ;;  %v3743_v56 = vmul.f32 %v7954_v38, %v7912_v36  ;;  %v3736_v30 = vand.u32 2147483647, %v7925_v55  ;;  %vm8030_vm6 = vmor %vm3687_vm5, %vm3688_vm15 }
0x1054   :  { %v7974_v48 = vpop.eup %5704  ;;  %v3670_v7 = vmul.f32 %v7933_v46, %v3669_v15  ;;  %v3684_v18 = vsub.f32 1.0, %v3683_v24  ;;  %v3698_v60 = vmul.f32 %v7960_v39, %v7915_v27  ;;  %vm3703_vm13 = vweird.f32 %v7960_v39 }
0x1055   :  { %v3656_v44 = vadd.f32 %v7928_v43, %v3655_v62  ;;  %v3713_v42 = vmul.f32 %v7974_v48, %v7918_v49  ;;  %v5707_v35 = vpop.eup %5706  ;;  %vm3718_vm7 = vweird.f32 %v7974_v48  ;;  %vm8041_vm9 = vcmp.eq.f32.partialorder %v3721_v3, 8.507059e+37  ;;  %vm8054_vm5 = vmor %vm3702_vm2, %vm3703_vm13 }
0x1056   :  { %v3671_v33 = vadd.f32 %v7933_v46, %v3670_v7  ;;  %v3685_v32 = vmul.f32 %v7948_v14, %v3684_v18  ;;  %v3699_v23 = vsub.f32 1.0, %v3698_v60  ;;  %v3728_v24 = vmul.f32 %v5707_v35, %v7925_v55 }
0x1057   :  { %v3714_v41 = vsub.f32 1.0, %v3713_v42  ;;  %v3660_v12 = vsel %vm7996_vm10, %v7928_v43, %v3656_v44  ;;  %v3738_v43 = vand.u32 2147483648, %v7925_v55  ;;  %v3744_v7 = vsub.f32 1.0, %v3743_v56 }
0x1058   :  { %v3686_v28 = vadd.f32 %v7948_v14, %v3685_v32  ;;  %v3700_v10 = vmul.f32 %v7960_v39, %v3699_v23  ;;  %v3675_v0 = vsel %vm8012_vm11, %v7933_v46, %v3671_v33  ;;  %v3729_v16 = vsub.f32 1.0, %v3728_v24 }
0x1059   :  { %v3715_v15 = vmul.f32 %v7974_v48, %v3714_v41  ;;  %v3665_v44 = vsel %vm7964_vm12, %v7943_v21, %v3660_v12  ;;  %v3680_v42 = vsel %vm7968_vm4, %v3679_v54, %v3675_v0  ;;  %v3724_v3 = vor.u32 1.1754944e-38, %v3723_v20  ;;  %vm8064_vm12 = vmor %vm3717_vm0, %vm3718_vm7 }
0x105a   :  { %v3701_v63 = vadd.f32 %v7960_v39, %v3700_v10  ;;  %v3690_v46 = vsel %vm8030_vm6, %v7948_v14, %v3686_v28  ;;  %5708 = vrcp.f32 %v7956_v31  ;;  %v3730_v54 = vmul.f32 %v5707_v35, %v3729_v16 }
0x105b   :  { %v3716_v18 = vadd.f32 %v7974_v48, %v3715_v15  ;;  %vm3733_vm4 = vweird.f32 %v5707_v35  ;;  %vm8068_vm1 = vcmp.eq.f32.partialorder %v3736_v30, 8.507059e+37  ;;  %v3695_v53 = vsel %vm7982_vm8, %v3694_v4, %v3690_v46 }
0x105c   :  { %v3705_v33 = vsel %vm8054_vm5, %v7960_v39, %v3701_v63  ;;  %v3739_v39 = vor.u32 1.1754944e-38, %v3738_v43  ;;  %v3745_v49 = vmul.f32 %v7954_v38, %v3744_v7  ;;  %vm3747_vm2 = vweird.f32 %v7912_v36  ;;  %vm3734_vm0 = vmor %vm3732_vm3, %vm3733_vm4 }
0x105d   :  { %v3720_v37 = vsel %vm8064_vm12, %v7974_v48, %v3716_v18  ;;  %v3731_v32 = vadd.f32 %v5707_v35, %v3730_v54  ;;  %5710 = vtanh.f32 %v7886_v1  ;;  %v3788_v23 = vrot.slane %v3665_v44, 6 }
0x105e   :  { %v3789_v20 = vrot.slane %v3680_v42, 5  ;;  %v3710_v61 = vsel %vm8001_vm14, %v3709_v29, %v3705_v33  ;;  %vm3748_vm8 = vweird.f32 %v7954_v38  ;;  %v3753_v4 = vand.u32 2147483648, %v7912_v36 }
0x105f   :  { %5712 = vtanh.f32 %v7889_v57  ;;  %v3725_v48 = vsel %vm8041_vm9, %v3724_v3, %v3720_v37  ;;  %v3735_v19 = vsel %vm3734_vm0, %v5707_v35, %v3731_v32  ;;  %vm9413_vm10 = vcmask 1041409   ;;  %vm8110_vm6 = vmor %vm3747_vm2, %vm3748_vm8 }
0x1060   :  { %5714 = vtanh.f32 %v7892_v17  ;;  %v3790_v1 = vsel %vm9413_vm10, %v3789_v20, %v3788_v23  ;;  %v5709_v41 = vpop.eup %5708  ;;  %v3746_v29 = vadd.f32 %v7954_v38, %v3745_v49  ;;  %vm3762_vm15 = vweird.f32 %v7956_v31  ;;  %vm9419_vm7 = vmmov %vm9413_vm10 }
0x1061   :  { %5716 = vtanh.f32 %v7895_v52  ;;  %v3791_v55 = vrot.slane %v3695_v53, 4  ;;  %v3740_v2 = vsel %vm8068_vm1, %v3739_v39, %v3735_v19  ;;  %v3758_v57 = vmul.f32 %v5709_v41, %v7956_v31 }
0x1062   :  { %v3766_v56 = vand.u32 2147483647, %v7956_v31  ;;  %v3793_v35 = vrot.slane %v3710_v61, 3  ;;  %5718 = vtanh.f32 %v7901_v50  ;;  %vm9414_vm14 = vcmask 1042434  }
0x1063   :  { %v3792_v17 = vsel %vm9414_vm14, %v3791_v55, %v3790_v1  ;;  %v3795_v26 = vrot.slane %v3725_v48, 2  ;;  %v3811_v28 = vrot.slane %v7921_v47, 6  ;;  %v5711_v10 = vpop.eup %5710  ;;  %v3759_v30 = vsub.f32 1.0, %v3758_v57  ;;  %vm9420_vm9 = vmmov %vm9414_vm14 }
0x1064   :  { %5720 = vtanh.f32 %v7881_v13  ;;  %vm9415_vm3 = vcmask 1043459   ;;  %v3812_v12 = vrot.slane %v7940_v8, 5  ;;  %vm3763_vm11 = vweird.f32 %v5709_v41 }
0x1065   :  { %v3794_v52 = vsel %vm9415_vm3, %v3793_v35, %v3792_v17  ;;  %v5713_v0 = vpop.eup %5712  ;;  %v3768_v15 = vand.u32 2147483648, %v7956_v31  ;;  %vm9416_vm13 = vcmask 1044484   ;;  %v3814_v50 = vrot.slane %v5711_v10, 4  ;;  %vm9422_vm12 = vmmov %vm9415_vm3  ;;  %v9432_v17 = vld [vmem:[#allocation14_spill] sm:$0xff] }
0x1066   :  { %v3796_v24 = vsel %vm9416_vm13, %v3795_v26, %v3794_v52  ;;  %v5715_v62 = vpop.eup %5714  ;;  %v3760_v13 = vmul.f32 %v5709_v41, %v3759_v30  ;;  %v3797_v63 = vrot.slane %v3740_v2, 1  ;;  %v3813_v8 = vsel %vm9419_vm7, %v3812_v12, %v3811_v28  ;;  %vm3764_vm1 = vmor %vm3762_vm15, %vm3763_vm11  ;;  %v9431_v2 = vld [vmem:[#allocation16_spill] sm:$0xff]  ;;  %v9433_v30 = vld [vmem:[#allocation26_spill] sm:$0xff] }
0x1067   :  { %v3816_v43 = vrot.slane %v5713_v0, 3  ;;  %v5717_v7 = vpop.eup %5716  ;;  %v3750_v46 = vsel %vm8110_vm6, %v7954_v38, %v3746_v29  ;;  %v3754_v18 = vor.u32 1.1754944e-38, %v3753_v4  ;;  %v3815_v60 = vsel %vm9420_vm9, %v3814_v50, %v3813_v8  ;;  %vm9423_vm2 = vmmov %vm9416_vm13  ;;  %v9430_v29 = vld [vmem:[#allocation12_spill] sm:$0xff]  ;;  %v9434_v0 = vld [vmem:[#allocation17_spill] sm:$0xff] }
0x1068   :  { %v3818_v16 = vrot.slane %v5715_v62, 2  ;;  %v3761_v44 = vadd.f32 %v5709_v41, %v3760_v13  ;;  %vm9421_vm5 = vcmask 1045509   ;;  %v3820_v3 = vrot.slane %v5717_v7, 1  ;;  %v5719_v33 = vpop.eup %5718 }
0x1069   :  { %v3798_v42 = vsel %vm9421_vm5, %v3797_v63, %v3796_v24  ;;  %v3817_v14 = vsel %vm9422_vm12, %v3816_v43, %v3815_v60  ;;  %vm3752_vm4 = vcmp.eq.f32.partialorder %v3751_v40, 8.507059e+37  ;;  %v3769_v21 = vor.u32 1.1754944e-38, %v3768_v15  ;;  %vm9424_vm8 = vmmov %vm9421_vm5 }
0x106a   :  { %v3819_v38 = vsel %vm9423_vm2, %v3818_v16, %v3817_v14  ;;  %v5721_v54 = vpop.eup %5720  ;;  %v3755_v27 = vsel %vm3752_vm4, %v3754_v18, %v3750_v46  ;;  %v3765_v53 = vsel %vm3764_vm1, %v5709_v41, %v3761_v44  ;;  %vm3767_vm0 = vcmp.eq.f32.partialorder %v3766_v56, 8.507059e+37 }
0x106b   :  { %v3821_v37 = vsel %vm9424_vm8, %v3820_v3, %v3819_v38  ;;  %v3770_v39 = vsel %vm3767_vm0, %v3769_v21, %v3765_v53  ;;  %vm9425_vm10 = vcmask 1046534   ;;  %v3823_v40 = vrot.slane %v5719_v33, 7 }
0x106c   :  { %v3799_v49 = vsel %vm9425_vm10, %v3755_v27, %v3798_v42  ;;  %vm9426_vm14 = vmmov %vm9425_vm10  ;;  %v3800_v36 = vrot.slane %v3770_v39, 7  ;;  %vm9427_vm3 = vcmask 1047559   ;;  %vm9429_vm15 = vcmp.lt.s32.totalorder %v6287_v58, 96 }
0x106d   :  { %v3822_v32 = vsel %vm9426_vm14, %v5721_v54, %v3821_v37  ;;  %vm9428_vm13 = vmmov %vm9427_vm3  ;;  %v1427_v55 = vperm.slane %v9430_v29, 0  ;;  %v2882_v57 = vperm.slane %v9431_v2, 0  ;;  %vm9116_vm11 = vcmask 253952  }
0x106e   :  { %v3801_v23 = vsel %vm9427_vm3, %v3800_v36, %v3799_v49  ;;  %v3824_v31 = vsel %vm9428_vm13, %v3823_v40, %v3822_v32  ;;  %v1912_v26 = vperm.slane %v9432_v17, 0  ;;  %v3367_v10 = vperm.slane %v7859_v5, 0 }
0x106f   :  { %v3826_v20 = vsel %vm9429_vm15, %v3801_v23, %v3824_v31  ;;  %v934_v52 = vrot.slane %v9433_v30, 1  ;;  %v2390_v15 = vrot.slane %v9434_v0, 1  ;;  %v1421_v47 = vrot.slane %v9430_v29, 2 }
0x1070   :  { %3829 = vrot.lane.b32.xlu1 %v3826_v20, %s5850_s3  ;;  %v3827_v48 = vmul.f32 %v3826_v20, %v7855_v34  ;;  %v2876_v63 = vrot.slane %v9431_v2, 2  ;;  %v1907_v43 = vrot.slane %v9432_v17, 3  ;;  %vm9435_vm6 = vcmask 261120  }
0x1071   :  { %v942_v12 = vperm.slane %v934_v52, 0  ;;  %v2398_v24 = vperm.slane %v2390_v15, 0  ;;  %v1429_v13 = vperm.slane %v1421_v47, 0 }
0x1072   :  { %v2884_v8 = vperm.slane %v2876_v63, 0  ;;  %v1915_v7 = vperm.slane %v1907_v43, 0 }
0x10e2   :  { %v3830_v61 = vpop.permute.xlu1 %3829 }
0x10e3   :  { %v3832_v4 = vmul.f32 %v3830_v61, %v3826_v20 }
0x10e5   :  { %3834 = vrot.lane.b32.xlu2 %v3832_v4, %s5850_s3 }
0x113f   :  { %v3835_v19 = vpop.permute.xlu2 %3834 }
0x1140   :  { %v8137_v1 = vadd.f32 %v3835_v19, %v3827_v48 }
0x1142   :  { %5722 = vtanh.f32 %v8137_v1 }
0x1148   :  { %v5723_v41 = vpop.eup %5722 }
0x1149   :  { %3840 = vrot.lane.b32.xlu0 %v5723_v41, %s5850_s3 }
0x1151   :  { %1435 = vrot.lane.b32.xlu0 %v1427_v55, %s5851_s5 }
0x1159   :  { %2890 = vrot.lane.b32.xlu0 %v2882_v57, %s5851_s5 }
0x11bb   :  { %v3841_v56 = vpop.permute.xlu0 %3840 }
0x11bc   :  { %v8145_v35 = vmul.f32 %v3841_v56, %v3826_v20 }
0x11be   :  { %3892 = vrot.lane.b32.xlu1 %v8145_v35, %s5851_s5  ;;  %v3845_v50 = vrot.slane %v8145_v35, 1 }
0x11c0   :  { %v3853_v62 = vperm.slane %v3845_v50, 0 }
0x11c3   :  { %v1436_v34 = vpop.permute.xlu0 %1435 }
0x11c4   :  { %1459 = vst.msk [vmem:[#allocation2 + $0x1] sm:$0x1] %vm9116_vm11, %v1436_v34 }
0x11c6   :  { %1920 = vrot.lane.b32.xlu1 %v1912_v26, %s5851_s5 }
0x11cb   :  { %v2891_v28 = vpop.permute.xlu0 %2890 }
0x11cc   :  { %2914 = vst.msk [vmem:[#allocation2 + $0x4] sm:$0x1] %vm9116_vm11, %v2891_v28 }
0x11ce   :  { %3375 = vrot.lane.b32.xlu1 %v3367_v10, %s5851_s5 }
0x11d6   :  { %951 = vrot.lane.b32.xlu1 %v942_v12, %s5851_s5 }
0x11de   :  { %2407 = vrot.lane.b32.xlu1 %v2398_v24, %s5851_s5 }
0x11e6   :  { %3862 = vrot.lane.b32.xlu1 %v3853_v62, %s5851_s5 }
0x11ee   :  { %1439 = vrot.lane.b32.xlu1 %v1429_v13, %s5851_s5 }
0x11f6   :  { %2894 = vrot.lane.b32.xlu1 %v2884_v8, %s5851_s5 }
0x11fe   :  { %1926 = vrot.lane.b32.xlu1 %v1915_v7, %s5851_s5 }
0x1230   :  { %v3893_v46 = vpop.permute.xlu1 %3892 }
0x1231   :  { %v3894_v18 = vsel %vm9435_vm6, %v3893_v46, 0 }
0x1232   :  { %v3916_v60 = vand.u32 4294901760, %v3894_v18 }
0x1234   :  { %v3917_v16 = vsub.f32 %v3894_v18, %v3916_v60  ;;  %3962 = vmatmul.f32.vlgmr.msrb.gmra.mxu3 %v3916_v60 }
0x1236   :  { %v3918_v44 = vand.u32 4294901760, %v3917_v16  ;;  %3992 = vmatmul.f32.vlgmr.msrb.gmra.mxu0 %v3917_v16 }
0x1238   :  { %v3919_v42 = vsub.f32 %v3917_v16, %v3918_v44  ;;  %4019 = vmatmul.f32.vlgmr.msrb.gmra.mxu1 %v3918_v44  ;;  %v1921_v14 = vpop.permute.xlu1 %1920 }
0x1239   :  { %1944 = vst.msk [vmem:[#allocation2 + $0x2] sm:$0x1] %vm9116_vm11, %v1921_v14 }
0x123a   :  { %v3920_v3 = vand.u32 4294901760, %v3919_v42 }
0x123c   :  { %3921 = vmatmul.f32.vlgmr.msrb.gmra.mxu2 %v3920_v3  ;;  %4077 = vmatmul.f32.vlgmr.msra.gmra.mxu3 %v3916_v60 }
0x1240   :  { %v3376_v33 = vpop.permute.xlu1 %3375 }
0x1241   :  { %3399 = vst.msk [vmem:[#allocation2 + $0x5] sm:$0x1] %vm9116_vm11, %v3376_v33 }
0x1244   :  { %4052 = vmatmul.f32.vlgmr.msra.gmra.mxu2 %v3916_v60 }
0x1248   :  { %v952_v21 = vpop.permute.xlu1 %951 }
0x1249   :  { %975 = vst.msk [vmem:[#allocation2 + $0x8] sm:$0x1] %vm9116_vm11, %v952_v21 }
0x1250   :  { %v2408_v38 = vpop.permute.xlu1 %2407 }
0x1251   :  { %2430 = vst.msk [vmem:[#allocation2 + $0xb] sm:$0x1] %vm9116_vm11, %v2408_v38 }
0x1258   :  { %v3863_v54 = vpop.permute.xlu1 %3862 }
0x1259   :  { %3885 = vst.msk [vmem:[#allocation2 + $0xe] sm:$0x1] %vm9116_vm11, %v3863_v54 }
0x1260   :  { %v1440_v27 = vpop.permute.xlu1 %1439 }
0x1261   :  { %1461 = vst.msk [vmem:[#allocation2 + $0x11] sm:$0x1] %vm9116_vm11, %v1440_v27 }
0x1268   :  { %v2895_v53 = vpop.permute.xlu1 %2894 }
0x1269   :  { %2916 = vst.msk [vmem:[#allocation2 + $0x14] sm:$0x1] %vm9116_vm11, %v2895_v53 }
0x1270   :  { %v1927_v37 = vpop.permute.xlu1 %1926 }
0x1271   :  { %1947 = vst.msk [vmem:[#allocation2 + $0x1a] sm:$0x1] %vm9116_vm11, %v1927_v37 }
0x12b3   :  { %v3993_v36 = vpop.f32.mrf.mxu0 }
0x12b5   :  { %v4020_v23 = vpop.f32.mrf.mxu1 }
0x12b7   :  { %v3963_v39 = vpop.f32.mrf.mxu3 }
0x12bf   :  { %v3922_v49 = vpop.f32.mrf.mxu2  ;;  %v4078_v4 = vpop.f32.mrf.mxu3 }
0x12c0   :  { %v3964_v32 = vadd.f32 %v3963_v39, %v3922_v49 }
0x12c2   :  { %v3994_v40 = vadd.f32 %v3993_v36, %v3964_v32 }
0x12c4   :  { %v4021_v31 = vadd.f32 %v4020_v23, %v3994_v40 }
0x12c7   :  { %v4053_v20 = vpop.f32.mrf.mxu2 }
0x12c8   :  { %v4054_v61 = vadd.f32 %v4053_v20, %v4021_v31 }
0x12ca   :  { %v4079_v48 = vadd.f32 %v4078_v4, %v4054_v61 }
0x12cc   :  { %v4082_v19 = vrot.slane %v4079_v48, 1  ;;  %v4083_v41 = vrot.slane %v4079_v48, 2  ;;  %v4084_v55 = vrot.slane %v4079_v48, 3  ;;  %v4085_v57 = vrot.slane %v4079_v48, 4 }
0x12cd   :  { %v4086_v56 = vrot.slane %v4079_v48, 5  ;;  %v4087_v34 = vrot.slane %v4079_v48, 6  ;;  %v4088_v26 = vrot.slane %v4079_v48, 7  ;;  %v8177_v28 = vadd.f32 %v4079_v48, %v9390_v11 }
0x12ce   :  { %v4097_v10 = vadd.f32 %v4082_v19, %v6187_v45  ;;  %v4098_v52 = vadd.f32 %v4083_v41, %v9339_v22  ;;  %v8182_v12 = vadd.f32 %v4084_v55, %v9340_v9  ;;  %v8185_v15 = vadd.f32 %v4085_v57, %v9341_v51 }
0x12cf   :  { %v8188_v24 = vadd.f32 %v4086_v56, %v9388_v59  ;;  %v8191_v50 = vadd.f32 %v4087_v34, %v9389_v25  ;;  %v5364_v62 = vmul.f32 -1.442695, %v8177_v28  ;;  %v8197_v9 = vadd.f32 %v4088_v26, %v9343_v6 }
0x12d0   :  { %v5357_v11 = vmul.f32 -1.442695, %v4097_v10  ;;  %v5358_v47 = vmul.f32 -1.442695, %v4098_v52  ;;  %v5359_v45 = vmul.f32 -1.442695, %v8182_v12 }
0x12d1   :  { %v5360_v22 = vmul.f32 -1.442695, %v8185_v15  ;;  %5724 = vpow2.f32 %v5364_v62  ;;  %v5361_v51 = vmul.f32 -1.442695, %v8188_v24  ;;  %v5362_v59 = vmul.f32 -1.442695, %v8191_v50 }
0x12d2   :  { %5726 = vpow2.f32 %v5357_v11  ;;  %v5363_v25 = vmul.f32 -1.442695, %v8197_v9 }
0x12d3   :  { %5728 = vpow2.f32 %v5358_v47 }
0x12d4   :  { %5730 = vpow2.f32 %v5359_v45 }
0x12d5   :  { %5732 = vpow2.f32 %v5360_v22 }
0x12d6   :  { %5734 = vpow2.f32 %v5361_v51 }
0x12d7   :  { %v5725_v13 = vpop.eup %5724  ;;  %5736 = vpow2.f32 %v5362_v59 }
0x12d8   :  { %v5727_v63 = vpop.eup %5726  ;;  %5738 = vtanh.f32 %v4097_v10  ;;  %v8208_v60 = vadd.f32 1.0, %v5725_v13 }
0x12d9   :  { %v5729_v8 = vpop.eup %5728  ;;  %v8202_v43 = vadd.f32 1.0, %v5727_v63  ;;  %5740 = vpow2.f32 %v5363_v25 }
0x12da   :  { %v5731_v6 = vpop.eup %5730  ;;  %v8204_v7 = vadd.f32 1.0, %v5729_v8  ;;  %v4251_v37 = vand.u32 2147483647, %v8208_v60 }
0x12db   :  { %v5733_v46 = vpop.eup %5732  ;;  %v8206_v18 = vadd.f32 1.0, %v5731_v6  ;;  %5742 = vrcp.f32 %v8202_v43  ;;  %v4148_v3 = vand.u32 2147483648, %v8202_v43  ;;  %vm4142_vm7 = vweird.f32 %v8202_v43 }
0x12dc   :  { %v5735_v16 = vpop.eup %5734  ;;  %v8211_v44 = vadd.f32 1.0, %v5733_v46  ;;  %5744 = vrcp.f32 %v8204_v7  ;;  %v4163_v21 = vand.u32 2147483648, %v8204_v7  ;;  %v4146_v53 = vand.u32 2147483647, %v8202_v43 }
0x12dd   :  { %v5737_v42 = vpop.eup %5736  ;;  %v8214_v14 = vadd.f32 1.0, %v5735_v16  ;;  %5746 = vtanh.f32 %v4098_v52  ;;  %v8235_v32 = vor.u32 1.1754944e-38, %v4148_v3  ;;  %vm4157_vm9 = vweird.f32 %v8204_v7 }
0x12de   :  { %5748 = vrcp.f32 %v8206_v18  ;;  %v8218_v33 = vpop.eup %5738  ;;  %v8222_v54 = vadd.f32 1.0, %v5737_v42  ;;  %v4161_v36 = vand.u32 2147483647, %v8204_v7  ;;  %v4178_v40 = vand.u32 2147483648, %v8206_v18 }
0x12df   :  { %5750 = vrcp.f32 %v8208_v60  ;;  %v5741_v38 = vpop.eup %5740  ;;  %v8246_v61 = vor.u32 1.1754944e-38, %v4163_v21  ;;  %vm4172_vm5 = vweird.f32 %v8206_v18  ;;  %v4176_v4 = vand.u32 2147483647, %v8206_v18 }
0x12e0   :  { %5752 = vrcp.f32 %v8211_v44  ;;  %v8242_v31 = vadd.f32 1.0, %v5741_v38  ;;  %v4191_v41 = vand.u32 2147483647, %v8211_v44  ;;  %v4193_v55 = vand.u32 2147483648, %v8211_v44 }
0x12e1   :  { %v8225_v27 = vpop.eup %5742  ;;  %5754 = vrcp.f32 %v8214_v14  ;;  %vm4187_vm4 = vweird.f32 %v8211_v44  ;;  %vm8264_vm1 = vcmp.eq.f32.partialorder %v4146_v53, 8.507059e+37  ;;  %vm8269_vm0 = vcmp.eq.f32.partialorder %v4161_v36, 8.507059e+37 }
0x12e2   :  { %v8231_v39 = vpop.eup %5744  ;;  %v4138_v49 = vmul.f32 %v8225_v27, %v8202_v43  ;;  %5756 = vrcp.f32 %v8222_v54  ;;  %vm4143_vm12 = vweird.f32 %v8225_v27  ;;  %v4179_v11 = vor.u32 1.1754944e-38, %v4178_v40 }
0x12e3   :  { %v8240_v23 = vpop.eup %5746  ;;  %v4153_v20 = vmul.f32 %v8231_v39, %v8204_v7  ;;  %vm4158_vm2 = vweird.f32 %v8231_v39  ;;  %v4208_v47 = vand.u32 2147483648, %v8214_v14  ;;  %vm8277_vm8 = vcmp.eq.f32.partialorder %v4176_v4, 8.507059e+37  ;;  %vm8302_vm13 = vmor %vm4142_vm7, %vm4143_vm12 }
0x12e4   :  { %v8250_v48 = vpop.eup %5748  ;;  %v4139_v19 = vsub.f32 1.0, %v4138_v49  ;;  %vm4202_vm10 = vweird.f32 %v8214_v14  ;;  %v4206_v13 = vand.u32 2147483647, %v8214_v14  ;;  %vm8287_vm3 = vcmp.eq.f32.partialorder %v4191_v41, 8.507059e+37  ;;  %vm8313_vm6 = vmor %vm4157_vm9, %vm4158_vm2 }
0x12e5   :  { %v8255_v57 = vpop.eup %5750  ;;  %v4154_v56 = vsub.f32 1.0, %v4153_v20  ;;  %v4168_v34 = vmul.f32 %v8250_v48, %v8206_v18  ;;  %vm4173_vm14 = vweird.f32 %v8250_v48  ;;  %v4194_v6 = vor.u32 1.1754944e-38, %v4193_v55 }
0x12e6   :  { %v8261_v26 = vpop.eup %5752  ;;  %v4140_v10 = vmul.f32 %v8225_v27, %v4139_v19  ;;  %v4221_v21 = vand.u32 2147483647, %v8222_v54  ;;  %v4209_v36 = vor.u32 1.1754944e-38, %v4208_v47  ;;  %vm4217_vm15 = vweird.f32 %v8222_v54  ;;  %vm8335_vm9 = vmor %vm4172_vm5, %vm4173_vm14 }
0x12e7   :  { %v8274_v45 = vpop.eup %5754  ;;  %v4155_v22 = vmul.f32 %v8231_v39, %v4154_v56  ;;  %v4169_v51 = vsub.f32 1.0, %v4168_v34  ;;  %v4183_v25 = vmul.f32 %v8261_v26, %v8211_v44  ;;  %v4223_v40 = vand.u32 2147483648, %v8222_v54 }
0x12e8   :  { %v4141_v63 = vadd.f32 %v8225_v27, %v4140_v10  ;;  %v4198_v46 = vmul.f32 %v8274_v45, %v8214_v14  ;;  %v8296_v38 = vpop.eup %5756  ;;  %5758 = vrcp.f32 %v8242_v31  ;;  %vm4188_vm7 = vweird.f32 %v8261_v26 }
0x12e9   :  { %v4156_v16 = vadd.f32 %v8231_v39, %v4155_v22  ;;  %v4170_v42 = vmul.f32 %v8250_v48, %v4169_v51  ;;  %v4184_v3 = vsub.f32 1.0, %v4183_v25  ;;  %vm4203_vm12 = vweird.f32 %v8274_v45  ;;  %vm8355_vm14 = vmor %vm4187_vm4, %vm4188_vm7 }
0x12ea   :  { %v4199_v49 = vsub.f32 1.0, %v4198_v46  ;;  %vm8321_vm11 = vcmp.eq.f32.partialorder %v4206_v13, 8.507059e+37  ;;  %v4145_v7 = vsel %vm8302_vm13, %v8225_v27, %v4141_v63  ;;  %v4213_v34 = vmul.f32 %v8296_v38, %v8222_v54 }
0x12eb   :  { %v4171_v43 = vadd.f32 %v8250_v48, %v4170_v42  ;;  %v4185_v4 = vmul.f32 %v8261_v26, %v4184_v3  ;;  %v4160_v41 = vsel %vm8313_vm6, %v8231_v39, %v4156_v16  ;;  %vm8346_vm2 = vcmp.eq.f32.partialorder %v4221_v21, 8.507059e+37 }
0x12ec   :  { %v4200_v56 = vmul.f32 %v8274_v45, %v4199_v49  ;;  %v4236_v18 = vand.u32 2147483647, %v8242_v31  ;;  %v4238_v47 = vand.u32 2147483648, %v8242_v31  ;;  %vm4247_vm5 = vweird.f32 %v8208_v60 }
0x12ed   :  { %v4175_v27 = vsel %vm8335_vm9, %v8250_v48, %v4171_v43  ;;  %v4186_v10 = vadd.f32 %v8261_v26, %v4185_v4  ;;  %v4214_v51 = vsub.f32 1.0, %v4213_v34  ;;  %v4224_v25 = vor.u32 1.1754944e-38, %v4223_v40 }
0x12ee   :  { %v4201_v48 = vadd.f32 %v8274_v45, %v4200_v56  ;;  %v4243_v13 = vmul.f32 %v8255_v57, %v8208_v60  ;;  %v4150_v63 = vsel %vm8264_vm1, %v8235_v32, %v4145_v7  ;;  %v4165_v46 = vsel %vm8269_vm0, %v8246_v61, %v4160_v41  ;;  %v5759_v16 = vpop.eup %5758  ;;  %vm8379_vm1 = vmor %vm4202_vm10, %vm4203_vm12 }
0x12ef   :  { %v4190_v44 = vsel %vm8355_vm14, %v8261_v26, %v4186_v10  ;;  %vm4218_vm4 = vweird.f32 %v8296_v38  ;;  %vm4232_vm13 = vweird.f32 %v8242_v31  ;;  %v4180_v42 = vsel %vm8277_vm8, %v4179_v11, %v4175_v27 }
0x12f0   :  { %v4215_v61 = vmul.f32 %v8296_v38, %v4214_v51  ;;  %v4239_v52 = vor.u32 1.1754944e-38, %v4238_v47  ;;  %v4244_v26 = vsub.f32 1.0, %v4243_v13  ;;  %v4195_v62 = vsel %vm8287_vm3, %v4194_v6, %v4190_v44  ;;  %vm4219_vm10 = vmor %vm4217_vm15, %vm4218_vm4 }
0x12f1   :  { %v4205_v59 = vsel %vm8379_vm1, %v8274_v45, %v4201_v48  ;;  %v4228_v11 = vmul.f32 %v5759_v16, %v8242_v31  ;;  %vm8390_vm0 = vcmp.eq.f32.partialorder %v4236_v18, 8.507059e+37  ;;  %vm4248_vm8 = vweird.f32 %v8255_v57 }
0x12f2   :  { %v4216_v14 = vadd.f32 %v8296_v38, %v4215_v61  ;;  %v4245_v21 = vmul.f32 %v8255_v57, %v4244_v26  ;;  %v4253_v53 = vand.u32 2147483648, %v8208_v60  ;;  %5760 = vtanh.f32 %v8182_v12 }
0x12f3   :  { %v4229_v45 = vsub.f32 1.0, %v4228_v11  ;;  %5762 = vtanh.f32 %v8185_v15  ;;  %v4273_v8 = vrot.slane %v4150_v63, 7  ;;  %v4274_v6 = vrot.slane %v4165_v46, 6 }
0x12f4   :  { %v4210_v49 = vsel %vm8321_vm11, %v4209_v36, %v4205_v59  ;;  %v4220_v40 = vsel %vm4219_vm10, %v8296_v38, %v4216_v14  ;;  %v4246_v20 = vadd.f32 %v8255_v57, %v4245_v21  ;;  %5764 = vtanh.f32 %v8188_v24  ;;  %vm8417_vm11 = vmor %vm4247_vm5, %vm4248_vm8 }
0x12f5   :  { %v4230_v12 = vmul.f32 %v5759_v16, %v4229_v45  ;;  %vm4233_vm3 = vweird.f32 %v5759_v16  ;;  %5766 = vtanh.f32 %v8191_v50  ;;  %vm9460_vm6 = vcmask 1041409  }
0x12f6   :  { %v4275_v54 = vsel %vm9460_vm6, %v4274_v6, %v4273_v8  ;;  %v4225_v15 = vsel %vm8346_vm2, %v4224_v25, %v4220_v40  ;;  %v4254_v38 = vor.u32 1.1754944e-38, %v4253_v53  ;;  %5768 = vtanh.f32 %v8197_v9  ;;  %vm4234_vm15 = vmor %vm4232_vm13, %vm4233_vm3 }
0x12f7   :  { %v4276_v24 = vrot.slane %v4180_v42, 5  ;;  %v4231_v43 = vadd.f32 %v5759_v16, %v4230_v12  ;;  %v4250_v50 = vsel %vm8417_vm11, %v8255_v57, %v4246_v20  ;;  %5770 = vtanh.f32 %v8177_v28  ;;  %vm9466_vm2 = vmmov %vm9460_vm6 }
0x12f8   :  { %v4278_v4 = vrot.slane %v4195_v62, 4  ;;  %v5761_v19 = vpop.eup %5760  ;;  %vm9463_vm7 = vcmask 1042434   ;;  %v4280_v41 = vrot.slane %v4210_v49, 3  ;;  %v4296_v55 = vrot.slane %v8218_v33, 7 }
0x12f9   :  { %v4277_v7 = vsel %vm9463_vm7, %v4276_v24, %v4275_v54  ;;  %v4297_v9 = vrot.slane %v8240_v23, 6  ;;  %v5763_v56 = vpop.eup %5762  ;;  %v4235_v34 = vsel %vm4234_vm15, %v5759_v16, %v4231_v43  ;;  %vm9464_vm12 = vcmask 1043459   ;;  %vm9468_vm14 = vmmov %vm9463_vm7 }
0x12fa   :  { %v4279_v27 = vsel %vm9464_vm12, %v4278_v4, %v4277_v7  ;;  %v4282_v10 = vrot.slane %v4225_v15, 2  ;;  %v4299_v57 = vrot.slane %v5761_v19, 5  ;;  %v5765_v39 = vpop.eup %5764  ;;  %v4240_v28 = vsel %vm8390_vm0, %v4239_v52, %v4235_v34  ;;  %vm9469_vm13 = vmmov %vm9464_vm12 }
0x12fb   :  { %vm9465_vm9 = vcmask 1044484   ;;  %v4298_v18 = vsel %vm9466_vm2, %v4297_v9, %v4296_v55  ;;  %v4301_v47 = vrot.slane %v5763_v56, 4  ;;  %v5767_v22 = vpop.eup %5766  ;;  %vm9467_vm5 = vcmask 1045509  }
0x12fc   :  { %v4281_v31 = vsel %vm9465_vm9, %v4280_v41, %v4279_v27  ;;  %v4284_v48 = vrot.slane %v4240_v28, 1  ;;  %v4300_v23 = vsel %vm9468_vm14, %v4299_v57, %v4298_v18  ;;  %v4303_v51 = vrot.slane %v5765_v39, 3  ;;  %v5769_v25 = vpop.eup %5768  ;;  %vm9471_vm0 = vmmov %vm9465_vm9 }
0x12fd   :  { %v4283_v33 = vsel %vm9467_vm5, %v4282_v10, %v4281_v31  ;;  %vm4252_vm4 = vcmp.eq.f32.partialorder %v4251_v37, 8.507059e+37  ;;  %v4302_v13 = vsel %vm9469_vm13, %v4301_v47, %v4300_v23  ;;  %v4305_v63 = vrot.slane %v5767_v22, 2  ;;  %v5771_v46 = vpop.eup %5770  ;;  %vm9473_vm10 = vmmov %vm9467_vm5 }
0x12fe   :  { %v4255_v44 = vsel %vm4252_vm4, %v4254_v38, %v4250_v50  ;;  %vm9470_vm1 = vcmask 1046534   ;;  %v4304_v42 = vsel %vm9471_vm0, %v4303_v51, %v4302_v13  ;;  %v4307_v32 = vrot.slane %v5769_v25, 1 }
0x12ff   :  { %v4285_v16 = vsel %vm9470_vm1, %v4284_v48, %v4283_v33  ;;  %vm9472_vm8 = vcmask 1047559   ;;  %v4306_v52 = vsel %vm9473_vm10, %v4305_v63, %v4304_v42  ;;  %vm9474_vm3 = vmmov %vm9470_vm1  ;;  %vm9476_vm11 = vcmp.lt.s32.totalorder %v6287_v58, 96 }
0x1300   :  { %v4286_v61 = vsel %vm9472_vm8, %v4255_v44, %v4285_v16  ;;  %v4308_v26 = vsel %vm9474_vm3, %v4307_v32, %v4306_v52  ;;  %vm9475_vm6 = vmmov %vm9472_vm8  ;;  %v941_v37 = vperm.slane %v9433_v30, 0  ;;  %v2397_v59 = vperm.slane %v9434_v0, 0 }
0x1301   :  { %v4309_v62 = vsel %vm9475_vm6, %v5771_v46, %v4308_v26  ;;  %v3852_v11 = vperm.slane %v8145_v35, 0  ;;  %v1420_v3 = vrot.slane %v9430_v29, 1  ;;  %v2875_v14 = vrot.slane %v9431_v2, 1 }
0x1302   :  { %v8449_v60 = vsel %vm9476_vm11, %v4286_v61, %v4309_v62  ;;  %v1906_v53 = vrot.slane %v9432_v17, 2  ;;  %v3361_v8 = vrot.slane %v7859_v5, 2  ;;  %v936_v49 = vrot.slane %v9433_v30, 3 }
0x1303   :  { %4314 = vrot.lane.b32.xlu2 %v8449_v60, %s5850_s3  ;;  %v1428_v58 = vperm.slane %v1420_v3, 0  ;;  %v2883_v21 = vperm.slane %v2875_v14, 0  ;;  %v2392_v20 = vrot.slane %v9434_v0, 3  ;;  %v3847_v54 = vrot.slane %v8145_v35, 3 }
0x1304   :  { %v1914_v45 = vperm.slane %v1906_v53, 0  ;;  %v3369_v6 = vperm.slane %v3361_v8, 0  ;;  %v944_v40 = vperm.slane %v936_v49, 0  ;;  %v1423_v36 = vrot.slane %v9430_v29, 4 }
0x1305   :  { %v2400_v12 = vperm.slane %v2392_v20, 0  ;;  %v3855_v15 = vperm.slane %v3847_v54, 0  ;;  %v2878_v43 = vrot.slane %v9431_v2, 4  ;;  %v1905_v19 = vrot.slane %v9432_v17, 1 }
0x1306   :  { %v1431_v38 = vperm.slane %v1423_v36, 0  ;;  %v1909_v41 = vrot.slane %v9432_v17, 5  ;;  %vm9477_vm15 = vcmask 253952   ;;  %v3360_v56 = vrot.slane %v7859_v5, 1 }
0x1307   :  { %v2886_v4 = vperm.slane %v2878_v43, 0  ;;  %v1913_v55 = vperm.slane %v1905_v19, 0  ;;  %v3364_v27 = vrot.slane %v7859_v5, 5  ;;  %vm9478_vm7 = vmmov %vm9477_vm15  ;;  %v935_v39 = vrot.slane %v9433_v30, 2 }
0x1308   :  { %v1917_v9 = vperm.slane %v1909_v41, 0  ;;  %v3368_v10 = vperm.slane %v3360_v56, 0  ;;  %v939_v31 = vrot.slane %v9433_v30, 6  ;;  %vm9479_vm12 = vmmov %vm9478_vm7  ;;  %v2391_v22 = vrot.slane %v9434_v0, 2 }
0x1309   :  { %v3372_v57 = vperm.slane %v3364_v27, 0  ;;  %v943_v18 = vperm.slane %v935_v39, 0  ;;  %vm9480_vm9 = vmmov %vm9478_vm7  ;;  %v3846_v23 = vrot.slane %v8145_v35, 2  ;;  %v1422_v13 = vrot.slane %v9430_v29, 3 }
0x130a   :  { %v947_v47 = vperm.slane %v939_v31, 0  ;;  %v2399_v48 = vperm.slane %v2391_v22, 0  ;;  %vm9481_vm2 = vmmov %vm9478_vm7  ;;  %v2877_v44 = vrot.slane %v9431_v2, 3  ;;  %v1908_v32 = vrot.slane %v9432_v17, 4 }
0x130b   :  { %949 = vrot.lane.b32.xlu2 %v941_v37, %s5851_s5  ;;  %v3854_v25 = vperm.slane %v3846_v23, 0  ;;  %vm9482_vm5 = vmmov %vm9481_vm2  ;;  %v1430_v46 = vperm.slane %v1422_v13, 0  ;;  %v3363_v26 = vrot.slane %v7859_v5, 4  ;;  %v2879_v27 = vrot.slane %v9431_v2, 5 }
0x130c   :  { %vm9483_vm14 = vmmov %vm9481_vm2  ;;  %v2885_v42 = vperm.slane %v2877_v44, 0  ;;  %v1916_v52 = vperm.slane %v1908_v32, 0  ;;  %v1910_v39 = vrot.slane %v9432_v17, 6 }
0x130d   :  { %vm9484_vm4 = vmmov %vm9481_vm2  ;;  %v3371_v37 = vperm.slane %v3363_v26, 0 }
0x130e   :  { %vm9485_vm13 = vmmov %vm9481_vm2  ;;  %v1918_v31 = vperm.slane %v1910_v39, 0  ;;  %v4387_v39 = vld [vmem:[%s9057_s6 + $0x10] sm:$0xff] }
0x130f   :  { %vm9486_vm1 = vmmov %vm9481_vm2 }
0x1310   :  { %vm9487_vm0 = vmmov %vm9486_vm1 }
0x1311   :  { %vm9488_vm8 = vmmov %vm9487_vm0 }
0x1312   :  { %vm9489_vm10 = vmmov %vm9487_vm0 }
0x1313   :  { %2405 = vrot.lane.b32.xlu2 %v2397_v59, %s5851_s5  ;;  %v938_v59 = vrot.slane %v9433_v30, 5  ;;  %vm9490_vm3 = vmmov %vm9487_vm0 }
0x1314   :  { %vm9491_vm6 = vmmov %vm9487_vm0 }
0x1315   :  { %v946_v3 = vperm.slane %v938_v59, 0  ;;  %vm9492_vm11 = vmmov %vm9487_vm0 }
0x131b   :  { %3860 = vrot.lane.b32.xlu2 %v3852_v11, %s5851_s5 }
0x1323   :  { %1437 = vrot.lane.b32.xlu2 %v1428_v58, %s5851_s5  ;;  %v2394_v58 = vrot.slane %v9434_v0, 5 }
0x132b   :  { %2892 = vrot.lane.b32.xlu2 %v2883_v21, %s5851_s5  ;;  %v2402_v21 = vperm.slane %v2394_v58, 0 }
0x1333   :  { %1924 = vrot.lane.b32.xlu2 %v1914_v45, %s5851_s5 }
0x133b   :  { %3379 = vrot.lane.b32.xlu2 %v3369_v6, %s5851_s5  ;;  %v4312_v6 = vmul.f32 %v8449_v60, %v8137_v1  ;;  %v937_v1 = vrot.slane %v9433_v30, 4 }
0x133d   :  { %v945_v43 = vperm.slane %v937_v1, 0 }
0x1343   :  { %955 = vrot.lane.b32.xlu2 %v944_v40, %s5851_s5 }
0x134b   :  { %2411 = vrot.lane.b32.xlu2 %v2400_v12, %s5851_s5 }
0x1353   :  { %3866 = vrot.lane.b32.xlu2 %v3855_v15, %s5851_s5  ;;  %v3362_v15 = vrot.slane %v7859_v5, 3 }
0x135b   :  { %1443 = vrot.lane.b32.xlu2 %v1431_v38, %s5851_s5  ;;  %v3370_v38 = vperm.slane %v3362_v15, 0 }
0x135d   :  { %v4315_v24 = vpop.permute.xlu2 %4314 }
0x135e   :  { %v4317_v50 = vmul.f32 %v4315_v24, %v8449_v60 }
0x1360   :  { %4319 = vrot.lane.b32.xlu0 %v4317_v50, %s5850_s3  ;;  %v2393_v50 = vrot.slane %v9434_v0, 4 }
0x1362   :  { %v2401_v19 = vperm.slane %v2393_v50, 0 }
0x1363   :  { %2898 = vrot.lane.b32.xlu2 %v2886_v4, %s5851_s5 }
0x1365   :  { %v950_v7 = vpop.permute.xlu2 %949 }
0x1366   :  { %974 = vst.msk [vmem:[#allocation2] sm:$0x1] %vm9477_vm15, %v950_v7  ;;  %vm9493_vm15 = vmmov %vm9487_vm0  ;;  %v3848_v7 = vrot.slane %v8145_v35, 4 }
0x1368   :  { %1922 = vrot.lane.b32.xlu0 %v1913_v55, %s5851_s5  ;;  %v3856_v55 = vperm.slane %v3848_v7, 0 }
0x136b   :  { %1930 = vrot.lane.b32.xlu2 %v1917_v9, %s5851_s5  ;;  %v1424_v9 = vrot.slane %v9430_v29, 5 }
0x136d   :  { %v2406_v34 = vpop.permute.xlu2 %2405 }
0x136e   :  { %2429 = vst.msk [vmem:[#allocation2 + $0x3] sm:$0x1] %vm9478_vm7, %v2406_v34  ;;  %vm9494_vm7 = vmmov %vm9487_vm0  ;;  %v1432_v34 = vperm.slane %v1424_v9, 0  ;;  %v4391_v9 = vld [vmem:[%s9057_s6 + $0x30] sm:$0xff] }
0x1370   :  { %3377 = vrot.lane.b32.xlu0 %v3368_v10, %s5851_s5 }
0x1373   :  { %3385 = vrot.lane.b32.xlu2 %v3372_v57, %s5851_s5  ;;  %v2887_v57 = vperm.slane %v2879_v27, 0 }
0x1375   :  { %v3861_v28 = vpop.permute.xlu2 %3860 }
0x1376   :  { %3884 = vst.msk [vmem:[#allocation2 + $0x6] sm:$0x1] %vm9479_vm12, %v3861_v28  ;;  %vm9495_vm12 = vmmov %vm9487_vm0 }
0x1378   :  { %953 = vrot.lane.b32.xlu0 %v943_v18, %s5851_s5 }
0x137b   :  { %961 = vrot.lane.b32.xlu2 %v947_v47, %s5851_s5 }
0x137d   :  { %v1438_v33 = vpop.permute.xlu2 %1437 }
0x137e   :  { %1460 = vst.msk [vmem:[#allocation2 + $0x9] sm:$0x1] %vm9480_vm9, %v1438_v33  ;;  %vm9496_vm9 = vmmov %vm9487_vm0 }
0x1380   :  { %2409 = vrot.lane.b32.xlu0 %v2399_v48, %s5851_s5 }
0x1385   :  { %v2893_v51 = vpop.permute.xlu2 %2892 }
0x1386   :  { %2915 = vst.msk [vmem:[#allocation2 + $0xc] sm:$0x1] %vm9481_vm2, %v2893_v51  ;;  %vm9497_vm2 = vmmov %vm9487_vm0 }
0x1388   :  { %3864 = vrot.lane.b32.xlu0 %v3854_v25, %s5851_s5 }
0x138d   :  { %v1925_v63 = vpop.permute.xlu2 %1924 }
0x138e   :  { %1946 = vst.msk [vmem:[#allocation2 + $0x12] sm:$0x1] %vm9482_vm5, %v1925_v63  ;;  %vm9498_vm5 = vmmov %vm9487_vm0 }
0x1390   :  { %1441 = vrot.lane.b32.xlu0 %v1430_v46, %s5851_s5  ;;  %v3849_v46 = vrot.slane %v8145_v35, 5 }
0x1395   :  { %v3380_v16 = vpop.permute.xlu2 %3379 }
0x1396   :  { %3401 = vst.msk [vmem:[#allocation2 + $0x15] sm:$0x1] %vm9483_vm14, %v3380_v16  ;;  %vm9499_vm14 = vmmov %vm9487_vm0  ;;  %v2395_v16 = vrot.slane %v9434_v0, 6 }
0x1398   :  { %2896 = vrot.lane.b32.xlu0 %v2885_v42, %s5851_s5  ;;  %v3857_v42 = vperm.slane %v3849_v46, 0 }
0x139d   :  { %v956_v61 = vpop.permute.xlu2 %955 }
0x139e   :  { %977 = vst.msk [vmem:[#allocation2 + $0x18] sm:$0x1] %vm9484_vm4, %v956_v61  ;;  %vm9500_vm4 = vmmov %vm9487_vm0  ;;  %v2403_v61 = vperm.slane %v2395_v16, 0 }
0x13a0   :  { %1928 = vrot.lane.b32.xlu0 %v1916_v52, %s5851_s5  ;;  %v1425_v52 = vrot.slane %v9430_v29, 6 }
0x13a2   :  { %v1433_v59 = vperm.slane %v1425_v52, 0 }
0x13a5   :  { %v2412_v62 = vpop.permute.xlu2 %2411 }
0x13a6   :  { %2432 = vst.msk [vmem:[#allocation2 + $0x1b] sm:$0x1] %vm9485_vm13, %v2412_v62  ;;  %vm9501_vm13 = vmmov %vm9487_vm0  ;;  %v940_v62 = vrot.slane %v9433_v30, 7 }
0x13a8   :  { %3383 = vrot.lane.b32.xlu0 %v3371_v37, %s5851_s5  ;;  %v3850_v37 = vrot.slane %v8145_v35, 6 }
0x13ad   :  { %v3867_v11 = vpop.permute.xlu2 %3866 }
0x13ae   :  { %3887 = vst.msk [vmem:[#allocation2 + $0x1e] sm:$0x1] %vm9486_vm1, %v3867_v11  ;;  %vm9502_vm1 = vmmov %vm9487_vm0  ;;  %v948_v11 = vperm.slane %v940_v62, 0 }
0x13b0   :  { %959 = vrot.lane.b32.xlu0 %v946_v3, %s5851_s5  ;;  %v3858_v3 = vperm.slane %v3850_v37, 0 }
0x13b5   :  { %v1444_v14 = vpop.permute.xlu2 %1443 }
0x13b6   :  { %1463 = vst.msk [vmem:[#allocation2 + $0x21] sm:$0x1] %vm9487_vm0, %v1444_v14 }
0x13b8   :  { %2415 = vrot.lane.b32.xlu0 %v2402_v21, %s5851_s5 }
0x13bd   :  { %v2899_v53 = vpop.permute.xlu2 %2898 }
0x13be   :  { %2918 = vst.msk [vmem:[#allocation2 + $0x24] sm:$0x1] %vm9488_vm8, %v2899_v53  ;;  %vm9503_vm8 = vmmov %vm9487_vm0 }
0x13c5   :  { %v1931_v45 = vpop.permute.xlu2 %1930 }
0x13c6   :  { %1949 = vst.msk [vmem:[#allocation2 + $0x2a] sm:$0x1] %vm9489_vm10, %v1931_v45  ;;  %vm9504_vm10 = vmmov %vm9487_vm0 }
0x13cd   :  { %v3386_v8 = vpop.permute.xlu2 %3385 }
0x13ce   :  { %3404 = vst.msk [vmem:[#allocation2 + $0x2d] sm:$0x1] %vm9490_vm3, %v3386_v8  ;;  %vm9505_vm3 = vmmov %vm9487_vm0 }
0x13d2   :  { %v4320_v49 = vpop.permute.xlu0 %4319 }
0x13d3   :  { %v8523_v40 = vadd.f32 %v4320_v49, %v4312_v6  ;;  %v2880_v6 = vrot.slane %v9431_v2, 6 }
0x13d5   :  { %5772 = vtanh.f32 %v8523_v40  ;;  %v962_v20 = vpop.permute.xlu2 %961 }
0x13d6   :  { %980 = vst.msk [vmem:[#allocation2 + $0x30] sm:$0x1] %vm9491_vm6, %v962_v20  ;;  %v2396_v20 = vrot.slane %v9434_v0, 7  ;;  %vm9506_vm6 = vmmov %vm9487_vm0  ;;  %v2881_v0 = vrot.slane %v9431_v2, 7 }
0x13d8   :  { %v2404_v15 = vperm.slane %v2396_v20, 0  ;;  %v2889_v50 = vperm.slane %v2881_v0, 0 }
0x13da   :  { %v1923_v12 = vpop.permute.xlu0 %1922 }
0x13db   :  { %v5773_v54 = vpop.eup %5772  ;;  %1945 = vst.msk [vmem:[#allocation2 + $0xa] sm:$0x1] %vm9492_vm11, %v1923_v12  ;;  %v1426_v12 = vrot.slane %v9430_v29, 7  ;;  %vm9507_vm11 = vmmov %vm9487_vm0 }
0x13dc   :  { %4325 = vrot.lane.b32.xlu1 %v5773_v54, %s5850_s3  ;;  %v2888_v54 = vperm.slane %v2880_v6, 0 }
0x13e2   :  { %v3378_v36 = vpop.permute.xlu0 %3377 }
0x13e3   :  { %3400 = vst.msk [vmem:[#allocation2 + $0xd] sm:$0x1] %vm9493_vm15, %v3378_v36  ;;  %v1434_v36 = vperm.slane %v1426_v12, 0  ;;  %vm9508_vm15 = vmmov %vm9487_vm0 }
0x13e4   :  { %3381 = vrot.lane.b32.xlu1 %v3370_v38, %s5851_s5  ;;  %v1911_v38 = vrot.slane %v9432_v17, 7 }
0x13ea   :  { %v954_v24 = vpop.permute.xlu0 %953 }
0x13eb   :  { %976 = vst.msk [vmem:[#allocation2 + $0x10] sm:$0x1] %vm9494_vm7, %v954_v24  ;;  %v3851_v24 = vrot.slane %v8145_v35, 7  ;;  %v3366_v35 = vrot.slane %v7859_v5, 7  ;;  %vm9509_vm7 = vmmov %vm9487_vm0 }
0x13ec   :  { %957 = vrot.lane.b32.xlu1 %v945_v43, %s5851_s5  ;;  %v1919_v43 = vperm.slane %v1911_v38, 0 }
0x13ed   :  { %v3859_v29 = vperm.slane %v3851_v24, 0 }
0x13f2   :  { %v2410_v4 = vpop.permute.xlu0 %2409 }
0x13f3   :  { %2431 = vst.msk [vmem:[#allocation2 + $0x13] sm:$0x1] %vm9495_vm12, %v2410_v4  ;;  %vm9510_vm12 = vmmov %vm9487_vm0 }
0x13f4   :  { %2413 = vrot.lane.b32.xlu1 %v2401_v19, %s5851_s5 }
0x13fa   :  { %v3865_v41 = vpop.permute.xlu0 %3864 }
0x13fb   :  { %3886 = vst.msk [vmem:[#allocation2 + $0x16] sm:$0x1] %vm9496_vm9, %v3865_v41  ;;  %vm9511_vm9 = vmmov %vm9487_vm0 }
0x13fc   :  { %3868 = vrot.lane.b32.xlu1 %v3856_v55, %s5851_s5  ;;  %v3374_v55 = vperm.slane %v3366_v35, 0 }
0x1402   :  { %v1442_v56 = vpop.permute.xlu0 %1441 }
0x1403   :  { %1462 = vst.msk [vmem:[#allocation2 + $0x19] sm:$0x1] %vm9497_vm2, %v1442_v56  ;;  %v4435_v56 = vand.u32 4294901760, %v4391_v9  ;;  %vm9512_vm2 = vmmov %vm9487_vm0 }
0x1404   :  { %1445 = vrot.lane.b32.xlu1 %v1432_v34, %s5851_s5 }
0x1405   :  { %4655 = vmatpush.msrb.mxu3 %v4435_v56  ;;  %4436 = vmatpush.msra.mxu0 %v4435_v56 }
0x140a   :  { %v2897_v10 = vpop.permute.xlu0 %2896 }
0x140b   :  { %2917 = vst.msk [vmem:[#allocation2 + $0x1c] sm:$0x1] %vm9498_vm5, %v2897_v10  ;;  %vm9513_vm5 = vmmov %vm9487_vm0 }
0x140c   :  { %2900 = vrot.lane.b32.xlu1 %v2887_v57, %s5851_s5 }
0x1412   :  { %v1929_v28 = vpop.permute.xlu0 %1928 }
0x1413   :  { %1948 = vst.msk [vmem:[#allocation2 + $0x22] sm:$0x1] %vm9499_vm14, %v1929_v28  ;;  %vm9514_vm14 = vmmov %vm9487_vm0 }
0x1414   :  { %1932 = vrot.lane.b32.xlu1 %v1918_v31, %s5851_s5  ;;  %v4439_v31 = vand.u32 4294901760, %v4387_v39 }
0x141a   :  { %v3384_v18 = vpop.permute.xlu0 %3383 }
0x141b   :  { %3403 = vst.msk [vmem:[#allocation2 + $0x25] sm:$0x1] %vm9500_vm4, %v3384_v18  ;;  %vm9515_vm4 = vcmask 261120  }
0x1422   :  { %v960_v47 = vpop.permute.xlu0 %959 }
0x1423   :  { %979 = vst.msk [vmem:[#allocation2 + $0x28] sm:$0x1] %vm9501_vm13, %v960_v47  ;;  %vm9516_vm13 = vmmov %vm9487_vm0 }
0x142a   :  { %v2416_v22 = vpop.permute.xlu0 %2415 }
0x142b   :  { %2434 = vst.msk [vmem:[#allocation2 + $0x2b] sm:$0x1] %vm9502_vm1, %v2416_v22  ;;  %v4533_v22 = vsub.f32 %v4387_v39, %v4439_v31  ;;  %vm9517_vm1 = vmmov %vm9515_vm4 }
0x144e   :  { %v4326_v33 = vpop.permute.xlu1 %4325 }
0x144f   :  { %v8554_v48 = vmul.f32 %v4326_v33, %v8449_v60  ;;  %v3365_v60 = vrot.slane %v7859_v5, 6  ;;  %v4521_v5 = vsub.f32 %v4391_v9, %v4435_v56  ;;  %v4385_v33 = vld [vmem:[%s9057_s6] sm:$0xff] }
0x1451   :  { %v4337_v23 = vperm.slane %v8554_v48, 0  ;;  %v4331_v51 = vrot.slane %v8554_v48, 2  ;;  %v4330_v25 = vrot.slane %v8554_v48, 1  ;;  %v3373_v32 = vperm.slane %v3365_v60, 0  ;;  %4591 = vmatpush.msrb.mxu2 %v4521_v5 }
0x1452   :  { %v4332_v58 = vrot.slane %v8554_v48, 3  ;;  %v4334_v21 = vrot.slane %v8554_v48, 5  ;;  %v4333_v30 = vrot.slane %v8554_v48, 4  ;;  %v4335_v4 = vrot.slane %v8554_v48, 6 }
0x1453   :  { %4345 = vrot.lane.b32.xlu0 %v4337_v23, %s5851_s5  ;;  %v4339_v13 = vperm.slane %v4331_v51, 0  ;;  %v4338_v63 = vperm.slane %v4330_v25, 0  ;;  %v4336_v17 = vrot.slane %v8554_v48, 7  ;;  %v4522_v10 = vand.u32 4294901760, %v4521_v5 }
0x1454   :  { %v4340_v53 = vperm.slane %v4332_v58, 0  ;;  %v4342_v45 = vperm.slane %v4334_v21, 0  ;;  %v4341_v8 = vperm.slane %v4333_v30, 0  ;;  %v4343_v7 = vperm.slane %v4335_v4, 0 }
0x1455   :  { %4349 = vrot.lane.b32.xlu1 %v4339_v13, %s5851_s5  ;;  %4347 = vrot.lane.b32.xlu2 %v4338_v63, %s5851_s5  ;;  %v4344_v2 = vperm.slane %v4336_v17, 0  ;;  %v4523_v18 = vsub.f32 %v4521_v5, %v4522_v10  ;;  %v4441_v51 = vand.u32 4294901760, %v4385_v33  ;;  %v4534_v25 = vand.u32 4294901760, %v4533_v22  ;;  %v4388_v17 = vld [vmem:[%s9057_s6 + $0x18] sm:$0xff] }
0x1456   :  { %v3382_v44 = vpop.permute.xlu1 %3381  ;;  %v8689_v9 = vand.u32 4294901760, %v4388_v17 }
0x1457   :  { %3402 = vst.msk [vmem:[#allocation2 + $0x1d] sm:$0x1] %vm9487_vm0, %v3382_v44  ;;  %v4539_v13 = vsub.f32 %v4385_v33, %v4441_v51  ;;  %v4535_v63 = vsub.f32 %v4533_v22, %v4534_v25  ;;  %v4392_v44 = vld [vmem:[%s9057_s6 + $0x38] sm:$0xff] }
0x1459   :  { %v4540_v46 = vand.u32 4294901760, %v4539_v13  ;;  %v4536_v16 = vand.u32 4294901760, %v4535_v63 }
0x145b   :  { %3870 = vrot.lane.b32.xlu0 %v3857_v42, %s5851_s5  ;;  %v8624_v42 = vand.u32 4294901760, %v4392_v44 }
0x145d   :  { %3387 = vrot.lane.b32.xlu1 %v3373_v32, %s5851_s5  ;;  %2417 = vrot.lane.b32.xlu2 %v2403_v61, %s5851_s5  ;;  %v4541_v32 = vsub.f32 %v4539_v13, %v4540_v46  ;;  %v8629_v61 = vsub.f32 %v4392_v44, %v8624_v42 }
0x145e   :  { %v958_v26 = vpop.permute.xlu1 %957 }
0x145f   :  { %978 = vst.msk [vmem:[#allocation2 + $0x20] sm:$0x1] %vm9503_vm8, %v958_v26  ;;  %v4542_v52 = vand.u32 4294901760, %v4541_v32  ;;  %v4924_v26 = vand.u32 4294901760, %v8629_v61  ;;  %vm9518_vm8 = vmmov %vm9487_vm0 }
0x1461   :  { %v4925_v62 = vsub.f32 %v8629_v61, %v4924_v26 }
0x1463   :  { %1447 = vrot.lane.b32.xlu0 %v1433_v59, %s5851_s5  ;;  %v4926_v59 = vand.u32 4294901760, %v4925_v62 }
0x1465   :  { %963 = vrot.lane.b32.xlu1 %v948_v11, %s5851_s5  ;;  %3872 = vrot.lane.b32.xlu2 %v3858_v3, %s5851_s5  ;;  %v4390_v3 = vld [vmem:[%s9057_s6 + $0x28] sm:$0xff] }
0x1466   :  { %v2414_v14 = vpop.permute.xlu1 %2413  ;;  %v8640_v21 = vand.u32 4294901760, %v4390_v3 }
0x1467   :  { %2433 = vst.msk [vmem:[#allocation2 + $0x23] sm:$0x1] %vm9504_vm10, %v2414_v14  ;;  %vm9519_vm10 = vmmov %vm9517_vm1 }
0x146b   :  { %4351 = vrot.lane.b32.xlu0 %v4340_v53, %s5851_s5  ;;  %v8646_v53 = vsub.f32 %v4390_v3, %v8640_v21 }
0x146d   :  { %4355 = vrot.lane.b32.xlu1 %v4342_v45, %s5851_s5  ;;  %4353 = vrot.lane.b32.xlu2 %v4341_v8, %s5851_s5  ;;  %v4930_v45 = vand.u32 4294901760, %v8646_v53 }
0x146e   :  { %v3869_v49 = vpop.permute.xlu1 %3868 }
0x146f   :  { %3888 = vst.msk [vmem:[#allocation2 + $0x26] sm:$0x1] %vm9505_vm3, %v3869_v49  ;;  %v4931_v20 = vsub.f32 %v8646_v53, %v4930_v45  ;;  %vm9520_vm3 = vmmov %vm9487_vm0 }
0x1473   :  { %2902 = vrot.lane.b32.xlu0 %v2888_v54, %s5851_s5 }
0x1475   :  { %2419 = vrot.lane.b32.xlu1 %v2404_v15, %s5851_s5  ;;  %1449 = vrot.lane.b32.xlu2 %v1434_v36, %s5851_s5 }
0x1476   :  { %v1446_v1 = vpop.permute.xlu1 %1445 }
0x1477   :  { %1464 = vst.msk [vmem:[#allocation2 + $0x29] sm:$0x1] %vm9506_vm6, %v1446_v1  ;;  %v4932_v1 = vand.u32 4294901760, %v4931_v20  ;;  %vm9521_vm6 = vmmov %vm9487_vm0 }
0x147b   :  { %1934 = vrot.lane.b32.xlu0 %v1919_v43, %s5851_s5 }
0x147d   :  { %3874 = vrot.lane.b32.xlu1 %v3859_v29, %s5851_s5  ;;  %2904 = vrot.lane.b32.xlu2 %v2889_v50, %s5851_s5 }
0x147e   :  { %v2901_v19 = vpop.permute.xlu1 %2900 }
0x147f   :  { %2919 = vst.msk [vmem:[#allocation2 + $0x2c] sm:$0x1] %vm9507_vm11, %v2901_v19  ;;  %vm9522_vm11 = vmmov %vm9487_vm0 }
0x1483   :  { %4357 = vrot.lane.b32.xlu0 %v4343_v7, %s5851_s5 }
0x1485   :  { %5248 = vrot.lane.b32.xlu1 %v8523_v40, %s5852_s1  ;;  %4359 = vrot.lane.b32.xlu2 %v4344_v2, %s5851_s5  ;;  %v4389_v40 = vld [vmem:[%s9057_s6 + $0x20] sm:$0xff]  ;;  %s5256_s1 = sshll.u32 %s5855_s10, 4  ;;  %s5257_s1 = int_to_ptr.vmem [resolvable:$true] %s5256_s1 }
0x1486   :  { %v1933_v41 = vpop.permute.xlu1 %1932  ;;  %v4437_v34 = vand.u32 4294901760, %v4389_v40 }
0x1487   :  { %1950 = vst.msk [vmem:[#allocation2 + $0x32] sm:$0x1] %vm9508_vm15, %v1933_v41  ;;  %vm9523_vm15 = vmmov %vm9487_vm0 }
0x1488   :  { %v4527_v27 = vsub.f32 %v4389_v40, %v4437_v34  ;;  %4657 = vmatpush.msrb.mxu3 %v4437_v34  ;;  %4438 = vmatpush.msra.mxu0 %v4437_v34  ;;  %v8696_v40 = vsub.f32 %v4388_v17, %v8689_v9 }
0x148a   :  { %v4528_v57 = vand.u32 4294901760, %v4527_v27  ;;  %4594 = vmatpush.msrb.mxu2 %v4527_v27  ;;  %4659 = vmatpush.msrb.mxu3 %v4439_v31  ;;  %v4936_v5 = vand.u32 4294901760, %v8696_v40 }
0x148b   :  { %3389 = vrot.lane.b32.xlu0 %v3374_v55, %s5851_s5  ;;  %4440 = vmatpush.msra.mxu0 %v4439_v31 }
0x148c   :  { %v4529_v47 = vsub.f32 %v4527_v27, %v4528_v57  ;;  %4597 = vmatpush.msrb.mxu2 %v4533_v22  ;;  %4661 = vmatpush.msrb.mxu3 %v4441_v51 }
0x148d   :  { %4442 = vmatpush.msra.mxu0 %v4441_v51 }
0x148e   :  { %v4530_v23 = vand.u32 4294901760, %v4529_v47  ;;  %4600 = vmatpush.msrb.mxu2 %v4539_v13  ;;  %4927 = vmatpush.msra.mxu3 %v4926_v59 }
0x148f   :  { %4726 = vmatpush.msrb.mxu0 %v4522_v10  ;;  %v4937_v10 = vsub.f32 %v8696_v40, %v4936_v5 }
0x1490   :  { %4838 = vmatpush.msra.mxu2 %v8624_v42  ;;  %4933 = vmatpush.msra.mxu3 %v4932_v1 }
0x1491   :  { %4730 = vmatpush.msrb.mxu0 %v4528_v57 }
0x1492   :  { %4840 = vmatpush.msra.mxu2 %v8640_v21 }
0x1493   :  { %5243 = vrot.lane.b32.xlu0 %v8554_v48, %s5851_s5  ;;  %v4524_v48 = vand.u32 4294901760, %v4523_v18  ;;  %4734 = vmatpush.msrb.mxu0 %v4534_v25  ;;  %v4938_v18 = vand.u32 4294901760, %v4937_v10  ;;  %v4386_v25 = vld [vmem:[%s9057_s6 + $0x8] sm:$0xff]  ;;  %s5281_s5 = sshll.u32 %s5854_s26, 4  ;;  %s5282_s5 = int_to_ptr.vmem [resolvable:$true] %s5281_s5 }
0x1494   :  { %4842 = vmatpush.msra.mxu2 %v8689_v9 }
0x1495   :  { %4525 = vmatpush.msra.mxu1 %v4524_v48  ;;  %4738 = vmatpush.msrb.mxu0 %v4540_v46 }
0x1496   :  { %4939 = vmatpush.msra.mxu3 %v4938_v18 }
0x1497   :  { %4531 = vmatpush.msra.mxu1 %v4530_v23 }
0x1499   :  { %4537 = vmatpush.msra.mxu1 %v4536_v16 }
0x149b   :  { %4543 = vmatpush.msra.mxu1 %v4542_v52 }
0x149d   :  { %4785 = vmatpush.msrb.mxu1 %v4435_v56 }
0x149f   :  { %4787 = vmatpush.msrb.mxu1 %v4437_v34 }
0x14a1   :  { %4789 = vmatpush.msrb.mxu1 %v4439_v31 }
0x14a3   :  { %4791 = vmatpush.msrb.mxu1 %v4441_v51 }
0x14af   :  { %v4348_v28 = vpop.permute.xlu2 %4347 }
0x14b0   :  { %4370 = vst.msk [vmem:[#allocation2 + $0xf] sm:$0x1] %vm9509_vm7, %v4348_v28  ;;  %vm9524_vm7 = vmmov %vm9487_vm0 }
0x14b7   :  { %v2418_v60 = vpop.permute.xlu2 %2417  ;;  %v4378_v30 = vld [vmem:[#allocation2 + $0x8] sm:$0xff] }
0x14b8   :  { %2435 = vst.msk [vmem:[#allocation2 + $0x33] sm:$0x1] %vm9510_vm12, %v2418_v60  ;;  %v4403_v8 = vsel %vm9515_vm4, %v4378_v30, 0  ;;  %vm9525_vm12 = vmmov %vm9487_vm0  ;;  %v4843_v60 = vand.u32 4294901760, %v4386_v25 }
0x14b9   :  { %v8657_v38 = vand.u32 4294901760, %v4403_v8  ;;  %vm9530_vm4 = vmmov %vm9517_vm1 }
0x14ba   :  { %v4941_v52 = vsub.f32 %v4386_v25, %v4843_v60  ;;  %4844 = vmatpush.msra.mxu2 %v4843_v60 }
0x14bb   :  { %v8671_v29 = vsub.f32 %v4403_v8, %v8657_v38 }
0x14bc   :  { %v4942_v59 = vand.u32 4294901760, %v4941_v52 }
0x14bd   :  { %v8685_v41 = vand.u32 4294901760, %v8671_v29 }
0x14bf   :  { %v3873_v37 = vpop.permute.xlu2 %3872  ;;  %v4454_v56 = vsub.f32 %v8671_v29, %v8685_v41 }
0x14c0   :  { %3890 = vst.msk [vmem:[#allocation2 + $0x36] sm:$0x1] %vm9511_vm9, %v3873_v37  ;;  %vm9526_vm9 = vmmov %vm9517_vm1 }
0x14c1   :  { %v8713_v28 = vand.u32 4294901760, %v4454_v56 }
0x14c5   :  { %v4346_v11 = vpop.permute.xlu0 %4345 }
0x14c6   :  { %4369 = vst.msk [vmem:[#allocation2 + $0x7] sm:$0x1] %vm9512_vm2, %v4346_v11  ;;  %vm9527_vm2 = vmmov %vm9487_vm0 }
0x14c7   :  { %v4354_v58 = vpop.permute.xlu2 %4353  ;;  %v4350_v14 = vpop.permute.xlu1 %4349 }
0x14c8   :  { %4373 = vst.msk [vmem:[#allocation2 + $0x27] sm:$0x1] %vm9513_vm5, %v4354_v58  ;;  %vm9528_vm5 = vmmov %vm9517_vm1 }
0x14c9   :  { %4371 = vst.msk [vmem:[#allocation2 + $0x17] sm:$0x1] %vm9514_vm14, %v4350_v14  ;;  %vm9529_vm14 = vmmov %vm9487_vm0  ;;  %v4943_v14 = vsub.f32 %v4941_v52, %v4942_v59 }
0x14cd   :  { %v3871_v6 = vpop.permute.xlu0 %3870  ;;  %v4377_v49 = vld [vmem:[#allocation2] sm:$0xff] }
0x14ce   :  { %3889 = vst.msk [vmem:[#allocation2 + $0x2e] sm:$0x1] %vm9516_vm13, %v3871_v6  ;;  %v4400_v12 = vsel %vm9517_vm1, %v4377_v49, 0  ;;  %vm9531_vm13 = vmmov %vm9487_vm0 }
0x14cf   :  { %v1450_v54 = vpop.permute.xlu2 %1449  ;;  %v3388_v15 = vpop.permute.xlu1 %3387  ;;  %v8655_v36 = vand.u32 4294901760, %v4400_v12  ;;  %v4381_v47 = vld [vmem:[#allocation2 + $0x20] sm:$0xff]  ;;  %vm9532_vm1 = vmmov %vm9487_vm0 }
0x14d0   :  { %1466 = vst.msk [vmem:[#allocation2 + $0x39] sm:$0x1] %vm9487_vm0, %v1450_v54  ;;  %v4379_v0 = vld [vmem:[#allocation2 + $0x10] sm:$0xff]  ;;  %v4412_v33 = vsel %vm9526_vm9, %v4381_v47, 0 }
0x14d1   :  { %3405 = vst.msk [vmem:[#allocation2 + $0x35] sm:$0x1] %vm9518_vm8, %v3388_v15  ;;  %4545 = vmatmul.f32.vlgmr.msra.gmra.mxu1 %v8655_v36  ;;  %v8663_v24 = vsub.f32 %v4400_v12, %v8655_v36  ;;  %v4406_v50 = vsel %vm9519_vm10, %v4379_v0, 0  ;;  %v8736_v44 = vand.u32 4294901760, %v4412_v33  ;;  %vm9533_vm8 = vmmov %vm9530_vm4 }
0x14d2   :  { %5057 = vmatpush.msra.mxu1 %v8624_v42  ;;  %v8687_v55 = vand.u32 4294901760, %v4406_v50  ;;  %vm9534_vm10 = vmmov %vm9487_vm0 }
0x14d3   :  { %4603 = vmatmul.f32.vlgmr.msrb.gmra.mxu2 %v8663_v24  ;;  %v8668_v43 = vand.u32 4294901760, %v8663_v24  ;;  %v8749_v37 = vsub.f32 %v4412_v33, %v8736_v44 }
0x14d4   :  { %5059 = vmatpush.msra.mxu1 %v8640_v21  ;;  %v8704_v34 = vsub.f32 %v4406_v50, %v8687_v55  ;;  %5128 = vmatpush.msrb.mxu2 %v4924_v26  ;;  %v4944_v26 = vand.u32 4294901760, %v4943_v14 }
0x14d5   :  { %4665 = vmatmul.f32.vlgmr.msrb.gmra.mxu3 %v8668_v43  ;;  %v1448_v4 = vpop.permute.xlu0 %1447  ;;  %v4446_v19 = vsub.f32 %v8663_v24, %v8668_v43  ;;  %v8763_v6 = vand.u32 4294901760, %v8749_v37 }
0x14d6   :  { %1465 = vst.msk [vmem:[#allocation2 + $0x31] sm:$0x1] %vm9520_vm3, %v1448_v4  ;;  %5061 = vmatpush.msra.mxu1 %v8689_v9  ;;  %v8716_v31 = vand.u32 4294901760, %v8704_v34  ;;  %5132 = vmatpush.msrb.mxu2 %v4930_v45  ;;  %vm9535_vm3 = vmmov %vm9530_vm4 }
0x14d7   :  { %v2905_v7 = vpop.permute.xlu2 %2904  ;;  %v964_v2 = vpop.permute.xlu1 %963  ;;  %v8682_v35 = vand.u32 4294901760, %v4446_v19  ;;  %4945 = vmatpush.msra.mxu3 %v4944_v26 }
0x14d8   :  { %2921 = vst.msk [vmem:[#allocation2 + $0x3c] sm:$0x1] %vm9521_vm6, %v2905_v7  ;;  %v4462_v22 = vsub.f32 %v8704_v34, %v8716_v31  ;;  %5063 = vmatpush.msra.mxu1 %v4843_v60  ;;  %5136 = vmatpush.msrb.mxu2 %v4936_v5  ;;  %vm9536_vm6 = vmmov %vm9535_vm3 }
0x14d9   :  { %981 = vst.msk [vmem:[#allocation2 + $0x38] sm:$0x1] %vm9522_vm11, %v964_v2  ;;  %4448 = vmatmul.f32.vlgmr.msra.gmra.mxu0 %v8682_v35  ;;  %4549 = vmatmul.f32.gmra.mxu1 %v8657_v38  ;;  %vm9537_vm11 = vmmov %vm9535_vm3 }
0x14da   :  { %4993 = vmatpush.msra.mxu0 %v8629_v61  ;;  %v8732_v63 = vand.u32 4294901760, %v4462_v22  ;;  %5140 = vmatpush.msrb.mxu2 %v4942_v59 }
0x14db   :  { %4608 = vmatmul.f32.gmra.mxu2 %v8671_v29  ;;  %5187 = vmatpush.msrb.mxu3 %v8624_v42 }
0x14dc   :  { %4996 = vmatpush.msra.mxu0 %v8646_v53  ;;  %v4478_v53 = vsub.f32 %v8749_v37, %v8763_v6 }
0x14dd   :  { %v4352_v27 = vpop.permute.xlu0 %4351  ;;  %4671 = vmatmul.f32.gmra.mxu3 %v8685_v41 }
0x14de   :  { %4372 = vst.msk [vmem:[#allocation2 + $0x1f] sm:$0x1] %vm9523_vm15, %v4352_v27  ;;  %4999 = vmatpush.msra.mxu0 %v8696_v40  ;;  %5189 = vmatpush.msrb.mxu3 %v8640_v21  ;;  %v4479_v12 = vand.u32 4294901760, %v4478_v53 }
0x14df   :  { %v4360_v57 = vpop.permute.xlu2 %4359  ;;  %v4356_v39 = vpop.permute.xlu1 %4355 }
0x14e0   :  { %4376 = vst.msk [vmem:[#allocation2 + $0x3f] sm:$0x1] %vm9524_vm7, %v4360_v57  ;;  %5002 = vmatpush.msra.mxu0 %v4941_v52  ;;  %5191 = vmatpush.msrb.mxu3 %v8689_v9 }
0x14e1   :  { %4374 = vst.msk [vmem:[#allocation2 + $0x2f] sm:$0x1] %vm9525_vm12, %v4356_v39  ;;  %4456 = vmatmul.f32.gmra.mxu0 %v8713_v28  ;;  %4553 = vmatmul.f32.gmra.mxu1 %v8687_v55 }
0x14e2   :  { %5193 = vmatpush.msrb.mxu3 %v4843_v60 }
0x14e3   :  { %4613 = vmatmul.f32.gmra.mxu2 %v8704_v34 }
0x14e5   :  { %v2903_v48 = vpop.permute.xlu0 %2902  ;;  %4677 = vmatmul.f32.gmra.mxu3 %v8716_v31  ;;  %v4380_v23 = vld [vmem:[#allocation2 + $0x18] sm:$0xff] }
0x14e6   :  { %2920 = vst.msk [vmem:[#allocation2 + $0x34] sm:$0x1] %vm9527_vm2, %v2903_v48  ;;  %v4409_v51 = vsel %vm9528_vm5, %v4380_v23, 0 }
0x14e7   :  { %v2420_v13 = vpop.permute.xlu1 %2419  ;;  %v8734_v46 = vand.u32 4294901760, %v4409_v51 }
0x14e8   :  { %2436 = vst.msk [vmem:[#allocation2 + $0x3b] sm:$0x1] %vm9529_vm14, %v2420_v13  ;;  %v4382_v32 = vld [vmem:[#allocation2 + $0x28] sm:$0xff] }
0x14e9   :  { %4464 = vmatmul.f32.gmra.mxu0 %v8732_v63  ;;  %4557 = vmatmul.f32.gmra.mxu1 %v8734_v46  ;;  %v8742_v16 = vsub.f32 %v4409_v51, %v8734_v46  ;;  %v4415_v11 = vsel %vm9530_vm4, %v4382_v32, 0 }
0x14ea   :  { %v8765_v61 = vand.u32 4294901760, %v4415_v11 }
0x14eb   :  { %4618 = vmatmul.f32.gmra.mxu2 %v8742_v16  ;;  %v8746_v62 = vand.u32 4294901760, %v8742_v16 }
0x14ec   :  { %v8774_v45 = vsub.f32 %v4415_v11, %v8765_v61 }
0x14ed   :  { %v1935_v3 = vpop.permute.xlu0 %1934  ;;  %4683 = vmatmul.f32.gmra.mxu3 %v8746_v62  ;;  %v4470_v58 = vsub.f32 %v8742_v16, %v8746_v62 }
0x14ee   :  { %1951 = vst.msk [vmem:[#allocation2 + $0x3a] sm:$0x1] %vm9531_vm13, %v1935_v3  ;;  %v8781_v54 = vand.u32 4294901760, %v8774_v45 }
0x14ef   :  { %v3875_v30 = vpop.permute.xlu1 %3874  ;;  %v8760_v8 = vand.u32 4294901760, %v4470_v58 }
0x14f0   :  { %3891 = vst.msk [vmem:[#allocation2 + $0x3e] sm:$0x1] %vm9532_vm1, %v3875_v30  ;;  %v4486_v42 = vsub.f32 %v8774_v45, %v8781_v54 }
0x14f1   :  { %4472 = vmatmul.f32.gmra.mxu0 %v8760_v8  ;;  %4561 = vmatmul.f32.gmra.mxu1 %v8736_v44 }
0x14f2   :  { %v4487_v0 = vand.u32 4294901760, %v4486_v42 }
0x14f3   :  { %4623 = vmatmul.f32.gmra.mxu2 %v8749_v37 }
0x14f5   :  { %v4358_v49 = vpop.permute.xlu0 %4357  ;;  %4689 = vmatmul.f32.gmra.mxu3 %v8763_v6 }
0x14f6   :  { %4375 = vst.msk [vmem:[#allocation2 + $0x37] sm:$0x1] %vm9487_vm0, %v4358_v49 }
0x14f7   :  { %v5249_v20 = vpop.permute.xlu1 %5248 }
0x14f8   :  { %5251 = vst.msk [vmem:[#allocation7] sm:$0xff] %vm9533_vm8, %v5249_v20 }
0x14f9   :  { %4480 = vmatmul.f32.gmra.mxu0 %v4479_v12  ;;  %4565 = vmatmul.f32.gmra.mxu1 %v8765_v61 }
0x14fb   :  { %4628 = vmatmul.f32.gmra.mxu2 %v8774_v45 }
0x14fd   :  { %v3390_v15 = vpop.permute.xlu0 %3389  ;;  %4695 = vmatmul.f32.gmra.mxu3 %v8781_v54  ;;  %v4383_v21 = vld [vmem:[#allocation2 + $0x30] sm:$0xff] }
0x14fe   :  { %3406 = vst.msk [vmem:[#allocation2 + $0x3d] sm:$0x1] %vm9534_vm10, %v3390_v15  ;;  %v4418_v1 = vsel %vm9535_vm3, %v4383_v21, 0 }
0x14ff   :  { %v8792_v50 = vand.u32 4294901760, %v4418_v1 }
0x1501   :  { %4488 = vmatmul.f32.gmra.mxu0 %v4487_v0  ;;  %4569 = vmatmul.f32.gmra.mxu1 %v8792_v50  ;;  %v8796_v4 = vsub.f32 %v4418_v1, %v8792_v50 }
0x1503   :  { %4633 = vmatmul.f32.gmra.mxu2 %v8796_v4  ;;  %v8800_v19 = vand.u32 4294901760, %v8796_v4 }
0x1505   :  { %v5244_v17 = vpop.permute.xlu0 %5243  ;;  %4701 = vmatmul.f32.gmra.mxu3 %v8800_v19  ;;  %v4494_v7 = vsub.f32 %v8796_v4, %v8800_v19  ;;  %v4384_v2 = vld [vmem:[#allocation2 + $0x38] sm:$0xff] }
0x1506   :  { %5246 = vst.msk [vmem:[#allocation5] sm:$0xff] %vm9536_vm6, %v5244_v17  ;;  %v4421_v9 = vsel %vm9537_vm11, %v4384_v2, 0 }
0x1507   :  { %v4495_v40 = vand.u32 4294901760, %v4494_v7  ;;  %v8807_v56 = vand.u32 4294901760, %v4421_v9  ;;  %5275 = dma.vmem_to_hbm [thread:$0]  %s5271_s24, 128, %s5273_s23, [#allocation6]  }
0x1508   :  { %5286 = dma.vmem_to_hbm [thread:$0]  %s5282_s5, 128, %s5284_s25, [#allocation6]  }
0x1509   :  { %4496 = vmatmul.f32.gmra.mxu0 %v4495_v40  ;;  %4573 = vmatmul.f32.gmra.mxu1 %v8807_v56  ;;  %v8811_v5 = vsub.f32 %v4421_v9, %v8807_v56 }
0x150b   :  { %4638 = vmatmul.f32.gmra.mxu2 %v8811_v5  ;;  %v8815_v27 = vand.u32 4294901760, %v8811_v5 }
0x150d   :  { %4707 = vmatmul.f32.gmra.mxu3 %v8815_v27  ;;  %v4502_v10 = vsub.f32 %v8811_v5, %v8815_v27 }
0x150f   :  { %v4503_v57 = vand.u32 4294901760, %v4502_v10 }
0x1511   :  { %4504 = vmatmul.f32.gmra.mxu0 %v4503_v57  ;;  %4793 = vmatmul.f32.vlgmr.msrb.gmra.mxu1 %v8655_v36 }
0x1513   :  { %4850 = vmatmul.f32.vlgmr.msra.gmra.mxu2 %v8682_v35 }
0x1515   :  { %4947 = vmatmul.f32.vlgmr.msra.gmra.mxu3 %v8655_v36 }
0x1519   :  { %4740 = vmatmul.f32.vlgmr.msrb.gmra.mxu0 %v8655_v36  ;;  %4797 = vmatmul.f32.gmra.mxu1 %v8657_v38 }
0x151b   :  { %4858 = vmatmul.f32.gmra.mxu2 %v8713_v28 }
0x151d   :  { %4951 = vmatmul.f32.gmra.mxu3 %v8657_v38 }
0x1521   :  { %4744 = vmatmul.f32.gmra.mxu0 %v8657_v38  ;;  %4801 = vmatmul.f32.gmra.mxu1 %v8687_v55 }
0x1523   :  { %4866 = vmatmul.f32.gmra.mxu2 %v8732_v63 }
0x1525   :  { %4955 = vmatmul.f32.gmra.mxu3 %v8687_v55 }
0x1529   :  { %4748 = vmatmul.f32.gmra.mxu0 %v8687_v55  ;;  %4805 = vmatmul.f32.gmra.mxu1 %v8734_v46 }
0x152b   :  { %4874 = vmatmul.f32.gmra.mxu2 %v8760_v8 }
0x152d   :  { %4959 = vmatmul.f32.gmra.mxu3 %v8734_v46 }
0x1531   :  { %4752 = vmatmul.f32.gmra.mxu0 %v8734_v46  ;;  %4809 = vmatmul.f32.gmra.mxu1 %v8736_v44 }
0x1533   :  { %4882 = vmatmul.f32.gmra.mxu2 %v4479_v12 }
0x1535   :  { %4963 = vmatmul.f32.gmra.mxu3 %v8736_v44 }
0x1539   :  { %4756 = vmatmul.f32.gmra.mxu0 %v8736_v44  ;;  %4813 = vmatmul.f32.gmra.mxu1 %v8765_v61 }
0x153b   :  { %4890 = vmatmul.f32.gmra.mxu2 %v4487_v0 }
0x153d   :  { %4967 = vmatmul.f32.gmra.mxu3 %v8765_v61 }
0x1541   :  { %4760 = vmatmul.f32.gmra.mxu0 %v8765_v61  ;;  %4817 = vmatmul.f32.gmra.mxu1 %v8792_v50 }
0x1543   :  { %4898 = vmatmul.f32.gmra.mxu2 %v4495_v40 }
0x1545   :  { %4971 = vmatmul.f32.gmra.mxu3 %v8792_v50 }
0x1549   :  { %4764 = vmatmul.f32.gmra.mxu0 %v8792_v50  ;;  %4821 = vmatmul.f32.gmra.mxu1 %v8807_v56 }
0x154b   :  { %4906 = vmatmul.f32.gmra.mxu2 %v4503_v57 }
0x154d   :  { %4975 = vmatmul.f32.gmra.mxu3 %v8807_v56 }
0x154e   :  { %v8847_v35 = vpop.f32.mrf.mxu1 }
0x1551   :  { %4768 = vmatmul.f32.gmra.mxu0 %v8807_v56  ;;  %5067 = vmatmul.f32.vlgmr.msra.gmra.mxu1 %v8668_v43 }
0x1553   :  { %5142 = vmatmul.f32.vlgmr.msrb.gmra.mxu2 %v8655_v36 }
0x1555   :  { %5195 = vmatmul.f32.vlgmr.msrb.gmra.mxu3 %v8655_v36 }
0x1556   :  { %v4449_v39 = vpop.f32.mrf.mxu0  ;;  %v8853_v28 = vpop.f32.mrf.mxu1 }
0x1557   :  { %v4604_v18 = vpop.f32.mrf.mxu2 }
0x1558   :  { %v8855_v47 = vpop.f32.mrf.mxu3 }
0x1559   :  { %5005 = vmatmul.f32.vlgmr.msra.gmra.mxu0 %v8663_v24  ;;  %5073 = vmatmul.f32.gmra.mxu1 %v8685_v41 }
0x155b   :  { %5146 = vmatmul.f32.gmra.mxu2 %v8657_v38 }
0x155d   :  { %5199 = vmatmul.f32.gmra.mxu3 %v8657_v38 }
0x155e   :  { %v4457_v22 = vpop.f32.mrf.mxu0  ;;  %v8861_v43 = vpop.f32.mrf.mxu1 }
0x155f   :  { %v8863_v33 = vpop.f32.mrf.mxu2 }
0x1560   :  { %v8865_v36 = vpop.f32.mrf.mxu3 }
0x1561   :  { %5010 = vmatmul.f32.gmra.mxu0 %v8671_v29  ;;  %5079 = vmatmul.f32.gmra.mxu1 %v8716_v31 }
0x1563   :  { %5150 = vmatmul.f32.gmra.mxu2 %v8687_v55 }
0x1565   :  { %5203 = vmatmul.f32.gmra.mxu3 %v8687_v55 }
0x1566   :  { %v8871_v24 = vpop.f32.mrf.mxu0  ;;  %v8873_v41 = vpop.f32.mrf.mxu1 }
0x1567   :  { %v8875_v38 = vpop.f32.mrf.mxu2 }
0x1568   :  { %v8877_v48 = vpop.f32.mrf.mxu3 }
0x1569   :  { %5015 = vmatmul.f32.gmra.mxu0 %v8704_v34  ;;  %5085 = vmatmul.f32.gmra.mxu1 %v8746_v62 }
0x156b   :  { %5154 = vmatmul.f32.gmra.mxu2 %v8734_v46 }
0x156d   :  { %5207 = vmatmul.f32.gmra.mxu3 %v8734_v46 }
0x156e   :  { %v8883_v29 = vpop.f32.mrf.mxu0  ;;  %v8885_v31 = vpop.f32.mrf.mxu1 }
0x156f   :  { %v8887_v55 = vpop.f32.mrf.mxu2 }
0x1570   :  { %v8889_v23 = vpop.f32.mrf.mxu3 }
0x1571   :  { %5020 = vmatmul.f32.gmra.mxu0 %v8742_v16  ;;  %5091 = vmatmul.f32.gmra.mxu1 %v8763_v6  ;;  %v8920_v16 = vld [vmem:[%s9058_s7] sm:$0x3] }
0x1572   :  { %v8924_v32 = vperm.slane %v8920_v16, 0 }
0x1573   :  { %5158 = vmatmul.f32.gmra.mxu2 %v8736_v44 }
0x1574   :  { %v4450_v11 = vadd.f32 %v4449_v39, %v8924_v32  ;;  %v4466_v15 = vadd.f32 %v8871_v24, %v8924_v32  ;;  %v4474_v9 = vadd.f32 %v8883_v29, %v8924_v32 }
0x1575   :  { %5211 = vmatmul.f32.gmra.mxu3 %v8736_v44 }
0x1576   :  { %v8895_v34 = vpop.f32.mrf.mxu0  ;;  %v8897_v51 = vpop.f32.mrf.mxu1  ;;  %v4547_v3 = vadd.f32 %v8847_v35, %v4450_v11  ;;  %v4555_v0 = vadd.f32 %v8861_v43, %v4466_v15 }
0x1577   :  { %v8899_v25 = vpop.f32.mrf.mxu2 }
0x1578   :  { %v8901_v13 = vpop.f32.mrf.mxu3  ;;  %v4605_v6 = vadd.f32 %v4604_v18, %v4547_v3  ;;  %v4615_v2 = vadd.f32 %v8875_v38, %v4555_v0  ;;  %v4482_v18 = vadd.f32 %v8895_v34, %v8924_v32 }
0x1579   :  { %5025 = vmatmul.f32.gmra.mxu0 %v8749_v37  ;;  %5097 = vmatmul.f32.gmra.mxu1 %v8781_v54 }
0x157a   :  { %v4667_v26 = vadd.f32 %v8855_v47, %v4605_v6  ;;  %v4563_v43 = vadd.f32 %v8885_v31, %v4482_v18 }
0x157b   :  { %5162 = vmatmul.f32.gmra.mxu2 %v8765_v61 }
0x157d   :  { %5215 = vmatmul.f32.gmra.mxu3 %v8765_v61  ;;  %v4458_v61 = vadd.f32 %v4457_v22, %v8924_v32 }
0x157e   :  { %v8907_v63 = vpop.f32.mrf.mxu0  ;;  %v8909_v46 = vpop.f32.mrf.mxu1 }
0x157f   :  { %v8911_v44 = vpop.f32.mrf.mxu2  ;;  %v4551_v53 = vadd.f32 %v8853_v28, %v4458_v61  ;;  %v4490_v29 = vadd.f32 %v8907_v63, %v8924_v32 }
0x1580   :  { %v8913_v60 = vpop.f32.mrf.mxu3 }
0x1581   :  { %5030 = vmatmul.f32.gmra.mxu0 %v8774_v45  ;;  %5103 = vmatmul.f32.gmra.mxu1 %v8800_v19  ;;  %v4610_v42 = vadd.f32 %v8863_v33, %v4551_v53 }
0x1583   :  { %5166 = vmatmul.f32.gmra.mxu2 %v8792_v50  ;;  %v4673_v1 = vadd.f32 %v8865_v36, %v4610_v42 }
0x1585   :  { %5219 = vmatmul.f32.gmra.mxu3 %v8792_v50 }
0x1586   :  { %v8927_v52 = vpop.f32.mrf.mxu0  ;;  %v8929_v62 = vpop.f32.mrf.mxu1 }
0x1587   :  { %v8931_v37 = vpop.f32.mrf.mxu2 }
0x1588   :  { %v8933_v59 = vpop.f32.mrf.mxu3 }
0x1589   :  { %5035 = vmatmul.f32.gmra.mxu0 %v8796_v4  ;;  %5109 = vmatmul.f32.gmra.mxu1 %v8815_v27 }
0x158b   :  { %5170 = vmatmul.f32.gmra.mxu2 %v8807_v56 }
0x158d   :  { %5223 = vmatmul.f32.gmra.mxu3 %v8807_v56  ;;  %v4679_v56 = vadd.f32 %v8877_v48, %v4615_v2  ;;  %v4625_v48 = vadd.f32 %v8899_v25, %v4563_v43  ;;  %v4498_v25 = vadd.f32 %v8927_v52, %v8924_v32 }
0x158e   :  { %v8941_v58 = vpop.f32.mrf.mxu0  ;;  %v4794_v14 = vpop.f32.mrf.mxu1 }
0x158f   :  { %v8943_v30 = vpop.f32.mrf.mxu2  ;;  %v4691_v34 = vadd.f32 %v8901_v13, %v4625_v48  ;;  %v4571_v13 = vadd.f32 %v8909_v46, %v4498_v25 }
0x1590   :  { %v8945_v8 = vpop.f32.mrf.mxu3 }
0x1591   :  { %5040 = vmatmul.f32.gmra.mxu0 %v8811_v5  ;;  %v4559_v5 = vadd.f32 %v8873_v41, %v4474_v9  ;;  %v4635_v42 = vadd.f32 %v8931_v37, %v4571_v13 }
0x1593   :  { %v4620_v28 = vadd.f32 %v8887_v55, %v4559_v5  ;;  %v4703_v52 = vadd.f32 %v8933_v59, %v4635_v42 }
0x1595   :  { %v4685_v22 = vadd.f32 %v8889_v23, %v4620_v28  ;;  %v4567_v23 = vadd.f32 %v8897_v51, %v4490_v29 }
0x1596   :  { %v4741_v45 = vpop.f32.mrf.mxu0  ;;  %v4798_v49 = vpop.f32.mrf.mxu1 }
0x1597   :  { %v4742_v20 = vadd.f32 %v4741_v45, %v4667_v26  ;;  %v8951_v12 = vpop.f32.mrf.mxu2  ;;  %v4630_v61 = vadd.f32 %v8911_v44, %v4567_v23  ;;  %v4506_v44 = vadd.f32 %v8941_v58, %v8924_v32  ;;  %v9018_v32 = vperm.slane %v8920_v16, 1 }
0x1598   :  { %v8956_v54 = vpop.f32.mrf.mxu3 }
0x1599   :  { %v4795_v21 = vadd.f32 %v4794_v14, %v4742_v20  ;;  %v4697_v63 = vadd.f32 %v8913_v60, %v4630_v61  ;;  %v4575_v60 = vadd.f32 %v8929_v62, %v4506_v44 }
0x159b   :  { %5227 = vst [vmem:[#allocation3] sm:$0xff] %v4795_v21 }
0x159e   :  { %v4745_v50 = vpop.f32.mrf.mxu0  ;;  %v4802_v4 = vpop.f32.mrf.mxu1 }
0x159f   :  { %v4746_v19 = vadd.f32 %v4745_v50, %v4673_v1  ;;  %v8966_v17 = vpop.f32.mrf.mxu2 }
0x15a0   :  { %v8968_v7 = vpop.f32.mrf.mxu3 }
0x15a1   :  { %v4799_v40 = vadd.f32 %v4798_v49, %v4746_v19 }
0x15a3   :  { %5229 = vst [vmem:[#allocation3 + $0x10] sm:$0xff] %v4799_v40  ;;  %v4852_v40 = vadd.f32 %v8951_v12, %v9018_v32 }
0x15a6   :  { %v4749_v27 = vpop.f32.mrf.mxu0  ;;  %v4806_v10 = vpop.f32.mrf.mxu1 }
0x15a7   :  { %v4750_v57 = vadd.f32 %v4749_v27, %v4679_v56  ;;  %v8975_v35 = vpop.f32.mrf.mxu2 }
0x15a8   :  { %v8977_v39 = vpop.f32.mrf.mxu3 }
0x15a9   :  { %v4803_v47 = vadd.f32 %v4802_v4, %v4750_v57  ;;  %v4640_v4 = vadd.f32 %v8943_v30, %v4575_v60  ;;  %v4949_v30 = vadd.f32 %v8956_v54, %v4852_v40  ;;  %v4860_v57 = vadd.f32 %v8966_v17, %v9018_v32 }
0x15aa   :  { %v4868_v54 = vadd.f32 %v8975_v35, %v9018_v32 }
0x15ab   :  { %5231 = vst [vmem:[#allocation3 + $0x20] sm:$0xff] %v4803_v47  ;;  %v4709_v37 = vadd.f32 %v8945_v8, %v4640_v4  ;;  %v4953_v47 = vadd.f32 %v8968_v7, %v4860_v57 }
0x15ae   :  { %v4753_v33 = vpop.f32.mrf.mxu0  ;;  %v4810_v36 = vpop.f32.mrf.mxu1 }
0x15af   :  { %v4754_v24 = vadd.f32 %v4753_v33, %v4685_v22  ;;  %v8984_v41 = vpop.f32.mrf.mxu2 }
0x15b0   :  { %v8986_v38 = vpop.f32.mrf.mxu3 }
0x15b1   :  { %v4807_v55 = vadd.f32 %v4806_v10, %v4754_v24 }
0x15b3   :  { %5233 = vst [vmem:[#allocation3 + $0x30] sm:$0xff] %v4807_v55  ;;  %v4957_v55 = vadd.f32 %v8977_v39, %v4868_v54 }
0x15b6   :  { %v4757_v11 = vpop.f32.mrf.mxu0  ;;  %v4814_v31 = vpop.f32.mrf.mxu1 }
0x15b7   :  { %v4758_v3 = vadd.f32 %v4757_v11, %v4691_v34  ;;  %v8993_v14 = vpop.f32.mrf.mxu2 }
0x15b8   :  { %v8995_v6 = vpop.f32.mrf.mxu3 }
0x15b9   :  { %v4811_v26 = vadd.f32 %v4810_v36, %v4758_v3  ;;  %v4876_v3 = vadd.f32 %v8984_v41, %v9018_v32 }
0x15bb   :  { %5235 = vst [vmem:[#allocation3 + $0x40] sm:$0xff] %v4811_v26  ;;  %v4961_v26 = vadd.f32 %v8986_v38, %v4876_v3 }
0x15be   :  { %v4761_v53 = vpop.f32.mrf.mxu0  ;;  %v4818_v51 = vpop.f32.mrf.mxu1 }
0x15bf   :  { %v4762_v45 = vadd.f32 %v4761_v53, %v4697_v63  ;;  %v9002_v49 = vpop.f32.mrf.mxu2 }
0x15c0   :  { %v9004_v20 = vpop.f32.mrf.mxu3 }
0x15c1   :  { %v4815_v15 = vadd.f32 %v4814_v31, %v4762_v45 }
0x15c3   :  { %5237 = vst [vmem:[#allocation3 + $0x50] sm:$0xff] %v4815_v15 }
0x15c6   :  { %v4765_v21 = vpop.f32.mrf.mxu0  ;;  %v4822_v46 = vpop.f32.mrf.mxu1 }
0x15c7   :  { %v4766_v1 = vadd.f32 %v4765_v21, %v4703_v52  ;;  %v9011_v0 = vpop.f32.mrf.mxu2 }
0x15c8   :  { %v9013_v50 = vpop.f32.mrf.mxu3  ;;  %v4900_v40 = vadd.f32 %v9011_v0, %v9018_v32 }
0x15c9   :  { %v4819_v19 = vadd.f32 %v4818_v51, %v4766_v1  ;;  %v4884_v51 = vadd.f32 %v8993_v14, %v9018_v32 }
0x15cb   :  { %5239 = vst [vmem:[#allocation3 + $0x60] sm:$0xff] %v4819_v19  ;;  %v4965_v15 = vadd.f32 %v8995_v6, %v4884_v51 }
0x15ce   :  { %v4769_v58 = vpop.f32.mrf.mxu0  ;;  %v5068_v59 = vpop.f32.mrf.mxu1 }
0x15cf   :  { %v4770_v2 = vadd.f32 %v4769_v58, %v4709_v37  ;;  %v9020_v62 = vpop.f32.mrf.mxu2 }
0x15d0   :  { %v9022_v9 = vpop.f32.mrf.mxu3 }
0x15d1   :  { %v4823_v56 = vadd.f32 %v4822_v46, %v4770_v2  ;;  %v4892_v46 = vadd.f32 %v9002_v49, %v9018_v32 }
0x15d3   :  { %5241 = vst [vmem:[#allocation3 + $0x70] sm:$0xff] %v4823_v56  ;;  %v4969_v37 = vadd.f32 %v9004_v20, %v4892_v46  ;;  %v4908_v20 = vadd.f32 %v9020_v62, %v9018_v32 }
0x15d6   :  { %v5006_v5 = vpop.f32.mrf.mxu0  ;;  %v5074_v27 = vpop.f32.mrf.mxu1 }
0x15d7   :  { %v5007_v8 = vadd.f32 %v5006_v5, %v4949_v30  ;;  %v5143_v10 = vpop.f32.mrf.mxu2  ;;  %v4973_v5 = vadd.f32 %v9013_v50, %v4900_v40 }
0x15d8   :  { %v5196_v16 = vpop.f32.mrf.mxu3 }
0x15d9   :  { %v5069_v28 = vadd.f32 %v5068_v59, %v5007_v8 }
0x15db   :  { %v5144_v18 = vadd.f32 %v5143_v10, %v5069_v28 }
0x15dd   :  { %v5197_v22 = vadd.f32 %v5196_v16, %v5144_v18 }
0x15de   :  { %v5011_v43 = vpop.f32.mrf.mxu0  ;;  %v5080_v33 = vpop.f32.mrf.mxu1 }
0x15df   :  { %5228 = vst [vmem:[#allocation3 + $0x8] sm:$0xff] %v5197_v22  ;;  %v5012_v12 = vadd.f32 %v5011_v43, %v4953_v47  ;;  %v5147_v36 = vpop.f32.mrf.mxu2  ;;  %v4977_v47 = vadd.f32 %v9022_v9, %v4908_v20 }
0x15e0   :  { %v5200_v24 = vpop.f32.mrf.mxu3 }
0x15e1   :  { %v5075_v48 = vadd.f32 %v5074_v27, %v5012_v12 }
0x15e3   :  { %v5148_v29 = vadd.f32 %v5147_v36, %v5075_v48 }
0x15e5   :  { %v5201_v34 = vadd.f32 %v5200_v24, %v5148_v29 }
0x15e6   :  { %v5016_v17 = vpop.f32.mrf.mxu0  ;;  %v5086_v7 = vpop.f32.mrf.mxu1 }
0x15e7   :  { %5230 = vst [vmem:[#allocation3 + $0x18] sm:$0xff] %v5201_v34  ;;  %v5017_v23 = vadd.f32 %v5016_v17, %v4957_v55  ;;  %v5151_v11 = vpop.f32.mrf.mxu2 }
0x15e8   :  { %v5204_v31 = vpop.f32.mrf.mxu3 }
0x15e9   :  { %v5081_v61 = vadd.f32 %v5080_v33, %v5017_v23 }
0x15eb   :  { %v5152_v25 = vadd.f32 %v5151_v11, %v5081_v61 }
0x15ed   :  { %v5205_v63 = vadd.f32 %v5204_v31, %v5152_v25 }
0x15ee   :  { %v5021_v35 = vpop.f32.mrf.mxu0  ;;  %v5092_v42 = vpop.f32.mrf.mxu1 }
0x15ef   :  { %5232 = vst [vmem:[#allocation3 + $0x28] sm:$0xff] %v5205_v63  ;;  %v5022_v13 = vadd.f32 %v5021_v35, %v4961_v26  ;;  %v5155_v53 = vpop.f32.mrf.mxu2 }
0x15f0   :  { %v5208_v39 = vpop.f32.mrf.mxu3 }
0x15f1   :  { %v5087_v45 = vadd.f32 %v5086_v7, %v5022_v13 }
0x15f3   :  { %v5156_v44 = vadd.f32 %v5155_v53, %v5087_v45 }
0x15f5   :  { %v5209_v52 = vadd.f32 %v5208_v39, %v5156_v44 }
0x15f6   :  { %v5026_v41 = vpop.f32.mrf.mxu0  ;;  %v5098_v19 = vpop.f32.mrf.mxu1 }
0x15f7   :  { %5234 = vst [vmem:[#allocation3 + $0x38] sm:$0xff] %v5209_v52  ;;  %v5027_v60 = vadd.f32 %v5026_v41, %v4965_v15  ;;  %v5159_v21 = vpop.f32.mrf.mxu2 }
0x15f8   :  { %v5212_v38 = vpop.f32.mrf.mxu3 }
0x15f9   :  { %v5093_v1 = vadd.f32 %v5092_v42, %v5027_v60 }
0x15fb   :  { %v5160_v4 = vadd.f32 %v5159_v21, %v5093_v1 }
0x15fd   :  { %v5213_v14 = vadd.f32 %v5212_v38, %v5160_v4 }
0x15fe   :  { %v5031_v58 = vpop.f32.mrf.mxu0  ;;  %v5104_v49 = vpop.f32.mrf.mxu1 }
0x15ff   :  { %5236 = vst [vmem:[#allocation3 + $0x48] sm:$0xff] %v5213_v14  ;;  %v5032_v59 = vadd.f32 %v5031_v58, %v4969_v37  ;;  %v5163_v2 = vpop.f32.mrf.mxu2 }
0x1600   :  { %v5216_v6 = vpop.f32.mrf.mxu3 }
0x1601   :  { %v5099_v56 = vadd.f32 %v5098_v19, %v5032_v59 }
0x1603   :  { %v5164_v30 = vadd.f32 %v5163_v2, %v5099_v56 }
0x1605   :  { %v5217_v27 = vadd.f32 %v5216_v6, %v5164_v30 }
0x1606   :  { %v5036_v8 = vpop.f32.mrf.mxu0  ;;  %v5110_v33 = vpop.f32.mrf.mxu1 }
0x1607   :  { %5238 = vst [vmem:[#allocation3 + $0x58] sm:$0xff] %v5217_v27  ;;  %v5037_v10 = vadd.f32 %v5036_v8, %v4973_v5  ;;  %v5167_v16 = vpop.f32.mrf.mxu2 }
0x1608   :  { %v5220_v28 = vpop.f32.mrf.mxu3 }
0x1609   :  { %v5105_v57 = vadd.f32 %v5104_v49, %v5037_v10 }
0x160b   :  { %v5168_v18 = vadd.f32 %v5167_v16, %v5105_v57 }
0x160d   :  { %v5221_v22 = vadd.f32 %v5220_v28, %v5168_v18 }
0x160e   :  { %v5041_v0 = vpop.f32.mrf.mxu0 }
0x160f   :  { %5240 = vst [vmem:[#allocation3 + $0x68] sm:$0xff] %v5221_v22  ;;  %v5042_v43 = vadd.f32 %v5041_v0, %v4977_v47  ;;  %v5171_v12 = vpop.f32.mrf.mxu2 }
0x1610   :  { %v5224_v32 = vpop.f32.mrf.mxu3 }
0x1611   :  { %v5111_v50 = vadd.f32 %v5110_v33, %v5042_v43 }
0x1613   :  { %v5172_v36 = vadd.f32 %v5171_v12, %v5111_v50 }
0x1615   :  { %v5225_v62 = vadd.f32 %v5224_v32, %v5172_v36 }
0x1617   :  { %5242 = vst [vmem:[#allocation3 + $0x78] sm:$0xff] %v5225_v62 }
0x1618   :  { %5264 = dma.vmem_to_hbm [thread:$0]  %s5257_s1, 2048, %s5259_s29, [#allocation4], %s5856_s30, %s5856_s30, %s5857_s11  }
0x1619   :  { %5846 = dma.done.wait [#allocation4], 2048  }
0x161a   :  { %5847 = vsyncadd [#allocation4], 4294965248 }
0x161b   :  { %5848 = dma.done.wait [#allocation6], 256  }
0x161c   :  { %5849 = vsyncadd [#allocation6], 4294967040 }
0x161d   :  { %5299 = vsyncpa [#allocation4], 1 }
0x161e   :  { %5300 = vsyncpa [#allocation6], 1 }

</bundles_post_ra>
